<compile_context>
chip_gen: v7x
topology: tpu7x:2x2x1
jax: 0.10.0
libtpu: 0.0.40
codegen_flags: <defaults>
</compile_context>

<pallas_src>
import functools

import jax
import jax.numpy as jnp
from jax.experimental import pallas as pl
from jax.experimental.pallas import tpu as pltpu


def _ceil_to(a, b):
    return (a + b - 1) // b * b


# ------------------------------ Pallas kernels ------------------------------

def _mm_bn_kernel(*refs, has_gate, has_res, relu, n_k):
    """Fused (1x1 conv as matmul) + BN affine, optional SE gate on the input,
    optional residual add, optional ReLU.  bf16 MXU, f32 accumulator, K-tiled."""
    x_ref, w_ref, scale_ref, bias_ref = refs[:4]
    i = 4
    gate_ref = None
    res_ref = None
    if has_gate:
        gate_ref = refs[i]
        i += 1
    if has_res:
        res_ref = refs[i]
        i += 1
    o_ref = refs[i]
    acc_ref = refs[i + 1]

    k = pl.program_id(2)

    @pl.when(k == 0)
    def _():
        acc_ref[...] = jnp.zeros_like(acc_ref)

    x = x_ref[0]                                    # (tm, tk) bf16
    if has_gate:
        # SE gate is per (batch, input-channel): scale x before contraction.
        x = (x.astype(jnp.float32) * gate_ref[0]).astype(jnp.bfloat16)
    acc_ref[...] += jnp.dot(x, w_ref[...], preferred_element_type=jnp.float32)

    @pl.when(k == n_k - 1)
    def _():
        y = acc_ref[...] * scale_ref[...] + bias_ref[...]
        if has_res:
            y = y + res_ref[0].astype(jnp.float32)
        if relu:
            y = jnp.maximum(y, 0.0)
        o_ref[0] = y.astype(o_ref.dtype)


def _conv2_se_kernel(*refs, stride, Ho, Wo, has_se):
    """3x3 grouped conv (9 in-kernel tap matmuls over a polyphase-decomposed
    padded input) + bn2 + ReLU, with the SE pool + FCs fused into the epilogue."""
    if has_se:
        (xp_ref, w_ref, scale_ref, bias_ref,
         sw1_ref, sb1_ref, sw2_ref, sb2_ref, out_ref, gate_ref) = refs
    else:
        xp_ref, w_ref, scale_ref, bias_ref, out_ref = refs

    C = w_ref.shape[2]
    M = Ho * Wo
    acc = jnp.zeros((M, C), jnp.float32)
    for dh in range(3):
        for dw in range(3):
            phase = (dh % stride) * stride + (dw % stride)
            tap = xp_ref[phase, 0,
                         pl.ds(dh // stride, Ho),
                         pl.ds(dw // stride, Wo), :]        # (Ho, Wo, C) bf16
            acc = acc + jnp.dot(tap.reshape(M, C), w_ref[dh * 3 + dw],
                                preferred_element_type=jnp.float32)

    y = jnp.maximum(acc * scale_ref[...] + bias_ref[...], 0.0)
    out_ref[0] = y.astype(out_ref.dtype)

    if has_se:
        # Squeeze-and-Excitation fused into the epilogue (per-batch grid step).
        pooled = jnp.mean(y, axis=0, keepdims=True)          # (1, C) f32
        h = jnp.dot(pooled, sw1_ref[...].astype(jnp.float32),
                    preferred_element_type=jnp.float32) + sb1_ref[...]
        h = jnp.maximum(h, 0.0)
        g = jnp.dot(h, sw2_ref[...].astype(jnp.float32),
                    preferred_element_type=jnp.float32) + sb2_ref[...]
        gate_ref[0] = jax.nn.sigmoid(g)


# ------------------------------ kernel wrappers ------------------------------

def _pointwise_bn(x3, w, scale, bias, *, relu, gate=None, residual=None,
                  out_dtype=jnp.bfloat16, tm_max=512, tk_max=512):
    """out = act((x3 @ w) * scale + bias [+ residual]); x3: (B, M, K).
    Optional per-(batch, K-channel) gate multiplied into x (SE fusion)."""
    B, M, K = x3.shape
    Cout = w.shape[1]

    Kp = _ceil_to(K, 8)
    tk = min(tk_max, Kp)
    Kp = _ceil_to(Kp, tk)
    nk = Kp // tk

    Mp = _ceil_to(M, 8)
    tm = min(tm_max, Mp)
    Mp = _ceil_to(Mp, tm)

    xb = x3.astype(jnp.bfloat16)
    if (Mp, Kp) != (M, K):
        xb = jnp.pad(xb, ((0, 0), (0, Mp - M), (0, Kp - K)))
    wb = w.astype(jnp.bfloat16)
    if Kp != K:
        wb = jnp.pad(wb, ((0, Kp - K), (0, 0)))
    scale2 = scale.reshape(1, Cout).astype(jnp.float32)
    bias2 = bias.reshape(1, Cout).astype(jnp.float32)

    in_specs = [
        pl.BlockSpec((1, tm, tk), lambda b, i, k: (b, i, k)),
        pl.BlockSpec((tk, Cout), lambda b, i, k: (k, 0)),
        pl.BlockSpec((1, Cout), lambda b, i, k: (0, 0)),
        pl.BlockSpec((1, Cout), lambda b, i, k: (0, 0)),
    ]
    args = [xb, wb, scale2, bias2]

    if gate is not None:
        gb = gate.astype(jnp.float32)                      # (B, 1, K)
        if Kp != K:
            gb = jnp.pad(gb, ((0, 0), (0, 0), (0, Kp - K)))
        in_specs.append(pl.BlockSpec((1, 1, tk), lambda b, i, k: (b, 0, k)))
        args.append(gb)
    if residual is not None:
        rb = residual
        if Mp != M:
            rb = jnp.pad(rb, ((0, 0), (0, Mp - M), (0, 0)))
        in_specs.append(pl.BlockSpec((1, tm, Cout), lambda b, i, k: (b, i, 0)))
        args.append(rb)

    kernel = functools.partial(_mm_bn_kernel, has_gate=gate is not None,
                               has_res=residual is not None, relu=relu, n_k=nk)
    out = pl.pallas_call(
        kernel,
        grid=(B, Mp // tm, nk),
        in_specs=in_specs,
        out_specs=pl.BlockSpec((1, tm, Cout), lambda b, i, k: (b, i, 0)),
        out_shape=jax.ShapeDtypeStruct((B, Mp, Cout), out_dtype),
        scratch_shapes=[pltpu.VMEM((tm, Cout), jnp.float32)],
        compiler_params=pltpu.CompilerParams(
            dimension_semantics=("parallel", "parallel", "arbitrary")),
    )(*args)
    if Mp != M:
        out = out[:, :M, :]
    return out


def _conv2_bn_se(x_nhwc, w9, scale, bias, se_args, *, stride, Ho, Wo):
    """3x3 grouped conv (stride, pad=1) + bn + relu, SE pool/FC fused.
    Returns (activation (N, Ho*Wo, C) bf16, gate (N, 1, C) f32 or None)."""
    N, H, W, C = x_nhwc.shape
    s = stride

    xb = x_nhwc.astype(jnp.bfloat16)
    xp = jnp.pad(xb, ((0, 0), (1, 1), (1, 1), (0, 0)))
    Hp, Wp = H + 2, W + 2
    Hq, Wq = -(-Hp // s), -(-Wp // s)
    xp = jnp.pad(xp, ((0, 0), (0, s * Hq - Hp), (0, s * Wq - Wp), (0, 0)))
    # Polyphase decomposition: component (a,b) == xp[:, a::s, b::s, :].
    # Same total size as xp (no 9x im2col inflation); taps become contiguous
    # slices inside the kernel.
    xpoly = (xp.reshape(N, Hq, s, Wq, s, C)
               .transpose(2, 4, 0, 1, 3, 5)
               .reshape(s * s, N, Hq, Wq, C))

    scale2 = scale.reshape(1, C).astype(jnp.float32)
    bias2 = bias.reshape(1, C).astype(jnp.float32)
    M = Ho * Wo
    has_se = se_args is not None

    in_specs = [
        pl.BlockSpec((s * s, 1, Hq, Wq, C), lambda n: (0, n, 0, 0, 0)),
        pl.BlockSpec((9, C, C), lambda n: (0, 0, 0)),
        pl.BlockSpec((1, C), lambda n: (0, 0)),
        pl.BlockSpec((1, C), lambda n: (0, 0)),
    ]
    args = [xpoly, w9, scale2, bias2]
    if has_se:
        sw1, sb1, sw2, sb2 = se_args
        Cse = sw1.shape[1]
        in_specs += [
            pl.BlockSpec((C, Cse), lambda n: (0, 0)),
            pl.BlockSpec((1, Cse), lambda n: (0, 0)),
            pl.BlockSpec((Cse, C), lambda n: (0, 0)),
            pl.BlockSpec((1, C), lambda n: (0, 0)),
        ]
        args += [sw1.astype(jnp.bfloat16), sb1.reshape(1, Cse).astype(jnp.float32),
                 sw2.astype(jnp.bfloat16), sb2.reshape(1, C).astype(jnp.float32)]
        out_shape = (jax.ShapeDtypeStruct((N, M, C), jnp.bfloat16),
                     jax.ShapeDtypeStruct((N, 1, C), jnp.float32))
        out_specs = (pl.BlockSpec((1, M, C), lambda n: (n, 0, 0)),
                     pl.BlockSpec((1, 1, C), lambda n: (n, 0, 0)))
    else:
        out_shape = jax.ShapeDtypeStruct((N, M, C), jnp.bfloat16)
        out_specs = pl.BlockSpec((1, M, C), lambda n: (n, 0, 0))

    kernel = functools.partial(_conv2_se_kernel, stride=s, Ho=Ho, Wo=Wo,
                               has_se=has_se)
    res = pl.pallas_call(
        kernel,
        grid=(N,),
        in_specs=in_specs,
        out_specs=out_specs,
        out_shape=out_shape,
        compiler_params=pltpu.CompilerParams(dimension_semantics=("parallel",)),
    )(*args)
    if has_se:
        return res[0], res[1]
    return res, None


# --------------------------------- glue -------------------------------------

def _fold_bn(gamma, beta, mean, var, eps=1e-5):
    scale = gamma / jnp.sqrt(var + eps)
    return scale, beta - mean * scale


def _conv2_weight(w, groups):
    """Torch grouped weight (Cout, Cin/g, 3, 3) -> per-tap block-diagonal
    (9, Cin, Cout), bf16.  Groups are packed along lanes: for C <= 128 the
    block-diagonal matmul occupies the same MXU tile as a true grouped one."""
    Cout, cin_g, kh, kw = w.shape
    cout_g = Cout // groups
    wt = jnp.transpose(w, (2, 3, 1, 0)).reshape(kh * kw, cin_g, Cout)
    dense = jnp.zeros((kh * kw, cin_g * groups, Cout), jnp.float32)
    for g in range(groups):
        dense = dense.at[:, g * cin_g:(g + 1) * cin_g,
                         g * cout_g:(g + 1) * cout_g].set(
            wt[:, :, g * cout_g:(g + 1) * cout_g])
    return dense.astype(jnp.bfloat16)


# ------------------------------ Block forward -------------------------------

def block_forward(x_nchw, p, *, stride, group_width):
    # TODO(synk): in a full network keep activations NHWC end-to-end so this
    # transpose happens once per model, not once per block.
    x = jnp.transpose(x_nchw, (0, 2, 3, 1)).astype(jnp.float32)   # -> NHWC
    N, H, W, w_in = x.shape
    w_b = p['conv1_w'].shape[0]
    w_out = p['conv3_w'].shape[0]
    groups = w_b // group_width
    x3 = x.reshape(N, H * W, w_in)

    # conv1 (1x1) + bn1 + relu
    s1, b1 = _fold_bn(p['bn1_g'], p['bn1_b'], p['bn1_m'], p['bn1_v'])
    w1 = jnp.transpose(p['conv1_w'][:, :, 0, 0], (1, 0))
    out1 = _pointwise_bn(x3, w1, s1, b1, relu=True)               # (N, HW, w_b) bf16
    out1 = out1.reshape(N, H, W, w_b)

    # conv2 (3x3 grouped, stride, pad=1) + bn2 + relu, SE fused into epilogue
    Ho = (H + 2 - 3) // stride + 1
    Wo = (W + 2 - 3) // stride + 1
    s2, b2 = _fold_bn(p['bn2_g'], p['bn2_b'], p['bn2_m'], p['bn2_v'])
    w2 = _conv2_weight(p['conv2_w'], groups)
    se_args = None
    if 'se1_w' in p:
        se_args = (jnp.transpose(p['se1_w'][:, :, 0, 0], (1, 0)), p['se1_b'],
                   jnp.transpose(p['se2_w'][:, :, 0, 0], (1, 0)), p['se2_b'])
    out2, gate = _conv2_bn_se(out1, w2, s2, b2, se_args,
                              stride=stride, Ho=Ho, Wo=Wo)

    # shortcut (1x1 stride conv + bn, or identity)
    if 'sc_w' in p:
        # TODO(synk): the strided subsample could be folded into the matmul's
        # DMA instead of an XLA slice; it is a small fraction of the traffic.
        xs = x[:, ::stride, ::stride, :].reshape(N, Ho * Wo, w_in)
        ss, bs = _fold_bn(p['bnsc_g'], p['bnsc_b'], p['bnsc_m'], p['bnsc_v'])
        wsc = jnp.transpose(p['sc_w'][:, :, 0, 0], (1, 0))
        sc = _pointwise_bn(xs, wsc, ss, bs, relu=False, out_dtype=jnp.float32)
    else:
        assert stride == 1 and w_in == w_out, "identity shortcut shape mismatch"
        sc = x3

    # conv3 (1x1) + bn3 + SE gate (on input) + residual add + relu, one kernel
    s3, b3 = _fold_bn(p['bn3_g'], p['bn3_b'], p['bn3_m'], p['bn3_v'])
    w3 = jnp.transpose(p['conv3_w'][:, :, 0, 0], (1, 0))
    out = _pointwise_bn(out2, w3, s3, b3, relu=True, gate=gate, residual=sc,
                        out_dtype=jnp.float32)                     # (N, HoWo, w_out)
    return jnp.transpose(out.reshape(N, Ho, Wo, w_out), (0, 3, 1, 2))  # -> NCHW


# -------------------------- params & pure-JAX reference ----------------------

def make_params(key, w_in, w_out, stride, group_width, bottleneck_ratio, se_ratio):
    w_b = int(round(w_out * bottleneck_ratio))
    groups = w_b // group_width
    w_se = int(round(w_in * se_ratio))
    keys = iter(jax.random.split(key, 32))

    def conv(shape):
        return 0.1 * jax.random.normal(next(keys), shape, jnp.float32)

    def bn(c):
        return (jax.random.uniform(next(keys), (c,), jnp.float32, 0.5, 1.5),   # gamma
                0.1 * jax.random.normal(next(keys), (c,), jnp.float32),        # beta
                0.1 * jax.random.normal(next(keys), (c,), jnp.float32),        # running mean
                jax.random.uniform(next(keys), (c,), jnp.float32, 0.5, 1.5))   # running var

    p = {}
    p['conv1_w'] = conv((w_b, w_in, 1, 1))
    p['bn1_g'], p['bn1_b'], p['bn1_m'], p['bn1_v'] = bn(w_b)
    p['conv2_w'] = conv((w_b, w_b // groups, 3, 3))
    p['bn2_g'], p['bn2_b'], p['bn2_m'], p['bn2_v'] = bn(w_b)
    if se_ratio > 0:
        p['se1_w'] = conv((w_se, w_b, 1, 1))
        p['se1_b'] = 0.1 * jax.random.normal(next(keys), (w_se,), jnp.float32)
        p['se2_w'] = conv((w_b, w_se, 1, 1))
        p['se2_b'] = 0.1 * jax.random.normal(next(keys), (w_b,), jnp.float32)
    p['conv3_w'] = conv((w_out, w_b, 1, 1))
    p['bn3_g'], p['bn3_b'], p['bn3_m'], p['bn3_v'] = bn(w_out)
    if stride != 1 or w_in != w_out:
        p['sc_w'] = conv((w_out, w_in, 1, 1))
        p['bnsc_g'], p['bnsc_b'], p['bnsc_m'], p['bnsc_v'] = bn(w_out)
    return p


def block_forward_ref(x_nchw, p, *, stride, group_width):
    x = jnp.transpose(x_nchw, (0, 2, 3, 1)).astype(jnp.float32)
    w_b = p['conv1_w'].shape[0]
    groups = w_b // group_width

    def conv(x, w, stride=1, g=1, padding='VALID'):
        wh = jnp.transpose(w, (2, 3, 1, 0))  # torch OIHW -> HWIO
        return jax.lax.conv_general_dilated(
            x, wh, (stride, stride), padding,
            dimension_numbers=('NHWC', 'HWIO', 'NHWC'), feature_group_count=g)

    def bn(x, pre):
        g_, b_, m_, v_ = p[pre + '_g'], p[pre + '_b'], p[pre + '_m'], p[pre + '_v']
        return (x - m_) / jnp.sqrt(v_ + 1e-5) * g_ + b_

    out = jax.nn.relu(bn(conv(x, p['conv1_w']), 'bn1'))
    out = jax.nn.relu(bn(conv(out, p['conv2_w'], stride, groups, [(1, 1), (1, 1)]), 'bn2'))
    if 'se1_w' in p:
        pooled = jnp.mean(out, axis=(1, 2), keepdims=True)
        h = jax.nn.relu(conv(pooled, p['se1_w']) + p['se1_b'])
        gate = jax.nn.sigmoid(conv(h, p['se2_w']) + p['se2_b'])
        out = out * gate
    out = bn(conv(out, p['conv3_w']), 'bn3')
    sc = bn(conv(x, p['sc_w'], stride), 'bnsc') if 'sc_w' in p else x
    return jnp.transpose(jax.nn.relu(out + sc), (0, 3, 1, 2))


# ---------------------------------- main -------------------------------------

if __name__ == "__main__":
    w_in, w_out = 24, 32
    stride, group_width = 2, 8
    bottleneck_ratio, se_ratio = 1.0, 0.25

    key = jax.random.PRNGKey(0)
    kx, kp = jax.random.split(key)
    x = jax.random.normal(kx, (2, w_in, 16, 16), jnp.float32)  # NCHW, like PyTorch
    p = make_params(kp, w_in, w_out, stride, group_width, bottleneck_ratio, se_ratio)

    fwd = jax.jit(functools.partial(block_forward, stride=stride,
                                    group_width=group_width))
    out = jax.block_until_ready(fwd(x, p))
    ref = jax.block_until_ready(
        block_forward_ref(x, p, stride=stride, group_width=group_width))

    assert out.shape == ref.shape == (2, w_out, 8, 8), (out.shape, ref.shape)
    err = float(jnp.max(jnp.abs(out - ref)))
    # bf16 MXU operands + bf16 intermediate activations -> slightly looser
    # tolerance than the pure-f32 reference.
    assert err < 7.5e-2, f"max abs error {err}"
    print("KERNEL_OK")
</pallas_src>

<mosaic_0001>
module attributes {stable_mosaic.version = 11 : i64} {
  func.func @_mm_bn_kernel(%arg0: i32, %arg1: i32, %arg2: i32, %arg3: memref<1x256x24xbf16, #tpu.memory_space<vmem>>, %arg4: memref<24x32xbf16, #tpu.memory_space<vmem>>, %arg5: memref<1x32xf32, #tpu.memory_space<vmem>>, %arg6: memref<1x32xf32, #tpu.memory_space<vmem>>, %arg7: memref<1x256x32xbf16, #tpu.memory_space<vmem>>, %arg8: memref<256x32xf32, #tpu.memory_space<vmem>>) attributes {dimension_semantics = [#tpu.dimension_semantics<parallel>, #tpu.dimension_semantics<parallel>, #tpu.dimension_semantics<arbitrary>], iteration_bounds = array<i64: 2, 1, 1>, scalar_prefetch = 0 : i64, scratch_operands = 1 : i64, tpu.core_type = #tpu.core_type<tc>, window_params = [{transform_indices = @transform_0, window_bounds = array<i64: 1, 256, 24>}, {transform_indices = @transform_1, window_bounds = array<i64: 24, 32>}, {pipeline_mode = #tpu.pipeline_mode<synchronous>, transform_indices = @transform_2, window_bounds = array<i64: 1, 32>}, {pipeline_mode = #tpu.pipeline_mode<synchronous>, transform_indices = @transform_3, window_bounds = array<i64: 1, 32>}, {transform_indices = @transform_4, window_bounds = array<i64: 1, 256, 32>}]} {
    %c0_i32 = arith.constant 0 : i32
    %0 = arith.cmpi eq, %arg2, %c0_i32 : i32
    %1 = arith.extui %0 : i1 to i32
    %c0_i32_0 = arith.constant 0 : i32
    %2 = arith.cmpi ne, %1, %c0_i32_0 : i32
    scf.if %2 {
      %cst_11 = arith.constant 0.000000e+00 : f32
      %13 = vector.broadcast %cst_11 : f32 to vector<256x32xf32>
      %c0_12 = arith.constant 0 : index
      %c0_13 = arith.constant 0 : index
      %14 = vector.load %arg8[%c0_12, %c0_13] : memref<256x32xf32, #tpu.memory_space<vmem>>, vector<256x32xf32>
      tpu.vector_store %arg8[%c0_12, %c0_13], %13 {strides = array<i32>} : memref<256x32xf32, #tpu.memory_space<vmem>>, vector<256x32xf32>,
    } else {
    }
    %c0 = arith.constant 0 : index
    %c0_1 = arith.constant 0 : index
    %c0_2 = arith.constant 0 : index
    %3 = vector.load %arg3[%c0, %c0_1, %c0_2] : memref<1x256x24xbf16, #tpu.memory_space<vmem>>, vector<1x256x24xbf16>
    %4 = vector.shape_cast %3 : vector<1x256x24xbf16> to vector<256x24xbf16>
    %c0_3 = arith.constant 0 : index
    %c0_4 = arith.constant 0 : index
    %5 = vector.load %arg8[%c0_3, %c0_4] : memref<256x32xf32, #tpu.memory_space<vmem>>, vector<256x32xf32>
    %c0_5 = arith.constant 0 : index
    %c0_6 = arith.constant 0 : index
    %6 = vector.load %arg4[%c0_5, %c0_6] : memref<24x32xbf16, #tpu.memory_space<vmem>>, vector<24x32xbf16>
    %cst = arith.constant dense<0.000000e+00> : vector<256x32xf32>
    %7 = tpu.matmul %4, %6, %cst {dimension_numbers = #tpu.dot_dimension_numbers<[1], [0], [0], [1], [0, 0, 1, 1], [], []>} : vector<256x24xbf16>, vector<24x32xbf16>, vector<256x32xf32> -> vector<256x32xf32>
    %8 = arith.addf %5, %7 : vector<256x32xf32>
    %c0_7 = arith.constant 0 : index
    %c0_8 = arith.constant 0 : index
    %9 = vector.load %arg8[%c0_7, %c0_8] : memref<256x32xf32, #tpu.memory_space<vmem>>, vector<256x32xf32>
    tpu.vector_store %arg8[%c0_7, %c0_8], %8 {strides = array<i32>} : memref<256x32xf32, #tpu.memory_space<vmem>>, vector<256x32xf32>,
    %c0_i32_9 = arith.constant 0 : i32
    %10 = arith.cmpi eq, %arg2, %c0_i32_9 : i32
    %11 = arith.extui %10 : i1 to i32
    %c0_i32_10 = arith.constant 0 : i32
    %12 = arith.cmpi ne, %11, %c0_i32_10 : i32
    scf.if %12 {
      %c0_11 = arith.constant 0 : index
      %c0_12 = arith.constant 0 : index
      %13 = vector.load %arg8[%c0_11, %c0_12] : memref<256x32xf32, #tpu.memory_space<vmem>>, vector<256x32xf32>
      %c0_13 = arith.constant 0 : index
      %c0_14 = arith.constant 0 : index
      %14 = vector.load %arg5[%c0_13, %c0_14] : memref<1x32xf32, #tpu.memory_space<vmem>>, vector<1x32xf32>
      %15 = vector.broadcast %14 : vector<1x32xf32> to vector<256x32xf32>
      %16 = arith.mulf %13, %15 : vector<256x32xf32>
      %c0_15 = arith.constant 0 : index
      %c0_16 = arith.constant 0 : index
      %17 = vector.load %arg6[%c0_15, %c0_16] : memref<1x32xf32, #tpu.memory_space<vmem>>, vector<1x32xf32>
      %18 = vector.broadcast %17 : vector<1x32xf32> to vector<256x32xf32>
      %19 = arith.addf %16, %18 : vector<256x32xf32>
      %cst_17 = arith.constant 0.000000e+00 : f32
      %20 = vector.broadcast %cst_17 : f32 to vector<256x32xf32>
      %21 = arith.maximumf %19, %20 : vector<256x32xf32>
      %22 = arith.truncf %21 : vector<256x32xf32> to vector<256x32xbf16>
      %c0_18 = arith.constant 0 : index
      %c0_19 = arith.constant 0 : index
      %c0_20 = arith.constant 0 : index
      %23 = vector.load %arg7[%c0_18, %c0_19, %c0_20] : memref<1x256x32xbf16, #tpu.memory_space<vmem>>, vector<1x256x32xbf16>
      %24 = vector.shape_cast %23 : vector<1x256x32xbf16> to vector<256x32xbf16>
      %25 = vector.shape_cast %22 : vector<256x32xbf16> to vector<1x256x32xbf16>
      tpu.vector_store %arg7[%c0_18, %c0_19, %c0_20], %25 {strides = array<i32>} : memref<1x256x32xbf16, #tpu.memory_space<vmem>>, vector<1x256x32xbf16>,
    } else {
    }
    return
  }
  func.func @transform_0(%arg0: i32, %arg1: i32, %arg2: i32) -> (i32, i32, i32) {
    %c0_i32 = arith.constant 0 : i32
    return %arg0, %arg1, %arg2 : i32, i32, i32
  }
  func.func @transform_1(%arg0: i32, %arg1: i32, %arg2: i32) -> (i32, i32) {
    %c0_i32 = arith.constant 0 : i32
    %c0_i32_0 = arith.constant 0 : i32
    return %arg2, %c0_i32 : i32, i32
  }
  func.func @transform_2(%arg0: i32, %arg1: i32, %arg2: i32) -> (i32, i32) {
    %c0_i32 = arith.constant 0 : i32
    %c0_i32_0 = arith.constant 0 : i32
    %c0_i32_1 = arith.constant 0 : i32
    return %c0_i32, %c0_i32_0 : i32, i32
  }
  func.func @transform_3(%arg0: i32, %arg1: i32, %arg2: i32) -> (i32, i32) {
    %c0_i32 = arith.constant 0 : i32
    %c0_i32_0 = arith.constant 0 : i32
    %c0_i32_1 = arith.constant 0 : i32
    return %c0_i32, %c0_i32_0 : i32, i32
  }
  func.func @transform_4(%arg0: i32, %arg1: i32, %arg2: i32) -> (i32, i32, i32) {
    %c0_i32 = arith.constant 0 : i32
    %c0_i32_0 = arith.constant 0 : i32
    return %arg0, %arg1, %c0_i32 : i32, i32, i32
  }
}

module attributes {stable_mosaic.version = 11 : i64} {
  func.func @_conv2_se_kernel(%arg0: i32, %arg1: memref<4x1x9x9x32xbf16, #tpu.memory_space<vmem>>, %arg2: memref<9x32x32xbf16, #tpu.memory_space<vmem>>, %arg3: memref<1x32xf32, #tpu.memory_space<vmem>>, %arg4: memref<1x32xf32, #tpu.memory_space<vmem>>, %arg5: memref<32x6xbf16, #tpu.memory_space<vmem>>, %arg6: memref<1x6xf32, #tpu.memory_space<vmem>>, %arg7: memref<6x32xbf16, #tpu.memory_space<vmem>>, %arg8: memref<1x32xf32, #tpu.memory_space<vmem>>, %arg9: memref<1x64x32xbf16, #tpu.memory_space<vmem>>, %arg10: memref<1x1x32xf32, #tpu.memory_space<vmem>>) attributes {dimension_semantics = [#tpu.dimension_semantics<parallel>], iteration_bounds = array<i64: 2>, scalar_prefetch = 0 : i64, scratch_operands = 0 : i64, tpu.core_type = #tpu.core_type<tc>, window_params = [{transform_indices = @transform_0, window_bounds = array<i64: 4, 1, 9, 9, 32>}, {pipeline_mode = #tpu.pipeline_mode<synchronous>, transform_indices = @transform_1, window_bounds = array<i64: 9, 32, 32>}, {pipeline_mode = #tpu.pipeline_mode<synchronous>, transform_indices = @transform_2, window_bounds = array<i64: 1, 32>}, {pipeline_mode = #tpu.pipeline_mode<synchronous>, transform_indices = @transform_3, window_bounds = array<i64: 1, 32>}, {pipeline_mode = #tpu.pipeline_mode<synchronous>, transform_indices = @transform_4, window_bounds = array<i64: 32, 6>}, {pipeline_mode = #tpu.pipeline_mode<synchronous>, transform_indices = @transform_5, window_bounds = array<i64: 1, 6>}, {pipeline_mode = #tpu.pipeline_mode<synchronous>, transform_indices = @transform_6, window_bounds = array<i64: 6, 32>}, {pipeline_mode = #tpu.pipeline_mode<synchronous>, transform_indices = @transform_7, window_bounds = array<i64: 1, 32>}, {transform_indices = @transform_8, window_bounds = array<i64: 1, 64, 32>}, {transform_indices = @transform_9, window_bounds = array<i64: 1, 1, 32>}]} {
    %cst = arith.constant 0.000000e+00 : f32
    %0 = vector.broadcast %cst : f32 to vector<64x32xf32>
    %c0 = arith.constant 0 : index
    %c0_0 = arith.constant 0 : index
    %c0_1 = arith.constant 0 : index
    %c0_2 = arith.constant 0 : index
    %c0_3 = arith.constant 0 : index
    %1 = vector.load %arg1[%c0, %c0_0, %c0_1, %c0_2, %c0_3] : memref<4x1x9x9x32xbf16, #tpu.memory_space<vmem>>, vector<1x1x8x8x32xbf16>
    %2 = vector.shape_cast %1 : vector<1x1x8x8x32xbf16> to vector<8x8x32xbf16>
    %3 = vector.shape_cast %2 : vector<8x8x32xbf16> to vector<64x32xbf16>
    %c0_4 = arith.constant 0 : index
    %c0_5 = arith.constant 0 : index
    %c0_6 = arith.constant 0 : index
    %4 = vector.load %arg2[%c0_4, %c0_5, %c0_6] : memref<9x32x32xbf16, #tpu.memory_space<vmem>>, vector<1x32x32xbf16>
    %5 = vector.shape_cast %4 : vector<1x32x32xbf16> to vector<32x32xbf16>
    %cst_7 = arith.constant dense<0.000000e+00> : vector<64x32xf32>
    %6 = tpu.matmul %3, %5, %cst_7 {dimension_numbers = #tpu.dot_dimension_numbers<[1], [0], [0], [1], [0, 0, 1, 1], [], []>} : vector<64x32xbf16>, vector<32x32xbf16>, vector<64x32xf32> -> vector<64x32xf32>
    %7 = arith.addf %0, %6 : vector<64x32xf32>
    %c1 = arith.constant 1 : index
    %c0_8 = arith.constant 0 : index
    %c0_9 = arith.constant 0 : index
    %c0_10 = arith.constant 0 : index
    %c0_11 = arith.constant 0 : index
    %8 = vector.load %arg1[%c1, %c0_8, %c0_9, %c0_10, %c0_11] : memref<4x1x9x9x32xbf16, #tpu.memory_space<vmem>>, vector<1x1x8x8x32xbf16>
    %9 = vector.shape_cast %8 : vector<1x1x8x8x32xbf16> to vector<8x8x32xbf16>
    %10 = vector.shape_cast %9 : vector<8x8x32xbf16> to vector<64x32xbf16>
    %c1_12 = arith.constant 1 : index
    %c0_13 = arith.constant 0 : index
    %c0_14 = arith.constant 0 : index
    %11 = vector.load %arg2[%c1_12, %c0_13, %c0_14] : memref<9x32x32xbf16, #tpu.memory_space<vmem>>, vector<1x32x32xbf16>
    %12 = vector.shape_cast %11 : vector<1x32x32xbf16> to vector<32x32xbf16>
    %cst_15 = arith.constant dense<0.000000e+00> : vector<64x32xf32>
    %13 = tpu.matmul %10, %12, %cst_15 {dimension_numbers = #tpu.dot_dimension_numbers<[1], [0], [0], [1], [0, 0, 1, 1], [], []>} : vector<64x32xbf16>, vector<32x32xbf16>, vector<64x32xf32> -> vector<64x32xf32>
    %14 = arith.addf %7, %13 : vector<64x32xf32>
    %c0_16 = arith.constant 0 : index
    %c0_17 = arith.constant 0 : index
    %c0_18 = arith.constant 0 : index
    %c1_19 = arith.constant 1 : index
    %c0_20 = arith.constant 0 : index
    %15 = vector.load %arg1[%c0_16, %c0_17, %c0_18, %c1_19, %c0_20] : memref<4x1x9x9x32xbf16, #tpu.memory_space<vmem>>, vector<1x1x8x8x32xbf16>
    %16 = vector.shape_cast %15 : vector<1x1x8x8x32xbf16> to vector<8x8x32xbf16>
    %17 = vector.shape_cast %16 : vector<8x8x32xbf16> to vector<64x32xbf16>
    %c2 = arith.constant 2 : index
    %c0_21 = arith.constant 0 : index
    %c0_22 = arith.constant 0 : index
    %18 = vector.load %arg2[%c2, %c0_21, %c0_22] : memref<9x32x32xbf16, #tpu.memory_space<vmem>>, vector<1x32x32xbf16>
    %19 = vector.shape_cast %18 : vector<1x32x32xbf16> to vector<32x32xbf16>
    %cst_23 = arith.constant dense<0.000000e+00> : vector<64x32xf32>
    %20 = tpu.matmul %17, %19, %cst_23 {dimension_numbers = #tpu.dot_dimension_numbers<[1], [0], [0], [1], [0, 0, 1, 1], [], []>} : vector<64x32xbf16>, vector<32x32xbf16>, vector<64x32xf32> -> vector<64x32xf32>
    %21 = arith.addf %14, %20 : vector<64x32xf32>
    %c2_24 = arith.constant 2 : index
    %c0_25 = arith.constant 0 : index
    %c0_26 = arith.constant 0 : index
    %c0_27 = arith.constant 0 : index
    %c0_28 = arith.constant 0 : index
    %22 = vector.load %arg1[%c2_24, %c0_25, %c0_26, %c0_27, %c0_28] : memref<4x1x9x9x32xbf16, #tpu.memory_space<vmem>>, vector<1x1x8x8x32xbf16>
    %23 = vector.shape_cast %22 : vector<1x1x8x8x32xbf16> to vector<8x8x32xbf16>
    %24 = vector.shape_cast %23 : vector<8x8x32xbf16> to vector<64x32xbf16>
    %c3 = arith.constant 3 : index
    %c0_29 = arith.constant 0 : index
    %c0_30 = arith.constant 0 : index
    %25 = vector.load %arg2[%c3, %c0_29, %c0_30] : memref<9x32x32xbf16, #tpu.memory_space<vmem>>, vector<1x32x32xbf16>
    %26 = vector.shape_cast %25 : vector<1x32x32xbf16> to vector<32x32xbf16>
    %cst_31 = arith.constant dense<0.000000e+00> : vector<64x32xf32>
    %27 = tpu.matmul %24, %26, %cst_31 {dimension_numbers = #tpu.dot_dimension_numbers<[1], [0], [0], [1], [0, 0, 1, 1], [], []>} : vector<64x32xbf16>, vector<32x32xbf16>, vector<64x32xf32> -> vector<64x32xf32>
    %28 = arith.addf %21, %27 : vector<64x32xf32>
    %c3_32 = arith.constant 3 : index
    %c0_33 = arith.constant 0 : index
    %c0_34 = arith.constant 0 : index
    %c0_35 = arith.constant 0 : index
    %c0_36 = arith.constant 0 : index
    %29 = vector.load %arg1[%c3_32, %c0_33, %c0_34, %c0_35, %c0_36] : memref<4x1x9x9x32xbf16, #tpu.memory_space<vmem>>, vector<1x1x8x8x32xbf16>
    %30 = vector.shape_cast %29 : vector<1x1x8x8x32xbf16> to vector<8x8x32xbf16>
    %31 = vector.shape_cast %30 : vector<8x8x32xbf16> to vector<64x32xbf16>
    %c4 = arith.constant 4 : index
    %c0_37 = arith.constant 0 : index
    %c0_38 = arith.constant 0 : index
    %32 = vector.load %arg2[%c4, %c0_37, %c0_38] : memref<9x32x32xbf16, #tpu.memory_space<vmem>>, vector<1x32x32xbf16>
    %33 = vector.shape_cast %32 : vector<1x32x32xbf16> to vector<32x32xbf16>
    %cst_39 = arith.constant dense<0.000000e+00> : vector<64x32xf32>
    %34 = tpu.matmul %31, %33, %cst_39 {dimension_numbers = #tpu.dot_dimension_numbers<[1], [0], [0], [1], [0, 0, 1, 1], [], []>} : vector<64x32xbf16>, vector<32x32xbf16>, vector<64x32xf32> -> vector<64x32xf32>
    %35 = arith.addf %28, %34 : vector<64x32xf32>
    %c2_40 = arith.constant 2 : index
    %c0_41 = arith.constant 0 : index
    %c0_42 = arith.constant 0 : index
    %c1_43 = arith.constant 1 : index
    %c0_44 = arith.constant 0 : index
    %36 = vector.load %arg1[%c2_40, %c0_41, %c0_42, %c1_43, %c0_44] : memref<4x1x9x9x32xbf16, #tpu.memory_space<vmem>>, vector<1x1x8x8x32xbf16>
    %37 = vector.shape_cast %36 : vector<1x1x8x8x32xbf16> to vector<8x8x32xbf16>
    %38 = vector.shape_cast %37 : vector<8x8x32xbf16> to vector<64x32xbf16>
    %c5 = arith.constant 5 : index
    %c0_45 = arith.constant 0 : index
    %c0_46 = arith.constant 0 : index
    %39 = vector.load %arg2[%c5, %c0_45, %c0_46] : memref<9x32x32xbf16, #tpu.memory_space<vmem>>, vector<1x32x32xbf16>
    %40 = vector.shape_cast %39 : vector<1x32x32xbf16> to vector<32x32xbf16>
    %cst_47 = arith.constant dense<0.000000e+00> : vector<64x32xf32>
    %41 = tpu.matmul %38, %40, %cst_47 {dimension_numbers = #tpu.dot_dimension_numbers<[1], [0], [0], [1], [0, 0, 1, 1], [], []>} : vector<64x32xbf16>, vector<32x32xbf16>, vector<64x32xf32> -> vector<64x32xf32>
    %42 = arith.addf %35, %41 : vector<64x32xf32>
    %c0_48 = arith.constant 0 : index
    %c0_49 = arith.constant 0 : index
    %c1_50 = arith.constant 1 : index
    %c0_51 = arith.constant 0 : index
    %c0_52 = arith.constant 0 : index
    %43 = vector.load %arg1[%c0_48, %c0_49, %c1_50, %c0_51, %c0_52] : memref<4x1x9x9x32xbf16, #tpu.memory_space<vmem>>, vector<1x1x8x8x32xbf16>
    %44 = vector.shape_cast %43 : vector<1x1x8x8x32xbf16> to vector<8x8x32xbf16>
    %45 = vector.shape_cast %44 : vector<8x8x32xbf16> to vector<64x32xbf16>
    %c6 = arith.constant 6 : index
    %c0_53 = arith.constant 0 : index
    %c0_54 = arith.constant 0 : index
    %46 = vector.load %arg2[%c6, %c0_53, %c0_54] : memref<9x32x32xbf16, #tpu.memory_space<vmem>>, vector<1x32x32xbf16>
    %47 = vector.shape_cast %46 : vector<1x32x32xbf16> to vector<32x32xbf16>
    %cst_55 = arith.constant dense<0.000000e+00> : vector<64x32xf32>
    %48 = tpu.matmul %45, %47, %cst_55 {dimension_numbers = #tpu.dot_dimension_numbers<[1], [0], [0], [1], [0, 0, 1, 1], [], []>} : vector<64x32xbf16>, vector<32x32xbf16>, vector<64x32xf32> -> vector<64x32xf32>
    %49 = arith.addf %42, %48 : vector<64x32xf32>
    %c1_56 = arith.constant 1 : index
    %c0_57 = arith.constant 0 : index
    %c1_58 = arith.constant 1 : index
    %c0_59 = arith.constant 0 : index
    %c0_60 = arith.constant 0 : index
    %50 = vector.load %arg1[%c1_56, %c0_57, %c1_58, %c0_59, %c0_60] : memref<4x1x9x9x32xbf16, #tpu.memory_space<vmem>>, vector<1x1x8x8x32xbf16>
    %51 = vector.shape_cast %50 : vector<1x1x8x8x32xbf16> to vector<8x8x32xbf16>
    %52 = vector.shape_cast %51 : vector<8x8x32xbf16> to vector<64x32xbf16>
    %c7 = arith.constant 7 : index
    %c0_61 = arith.constant 0 : index
    %c0_62 = arith.constant 0 : index
    %53 = vector.load %arg2[%c7, %c0_61, %c0_62] : memref<9x32x32xbf16, #tpu.memory_space<vmem>>, vector<1x32x32xbf16>
    %54 = vector.shape_cast %53 : vector<1x32x32xbf16> to vector<32x32xbf16>
    %cst_63 = arith.constant dense<0.000000e+00> : vector<64x32xf32>
    %55 = tpu.matmul %52, %54, %cst_63 {dimension_numbers = #tpu.dot_dimension_numbers<[1], [0], [0], [1], [0, 0, 1, 1], [], []>} : vector<64x32xbf16>, vector<32x32xbf16>, vector<64x32xf32> -> vector<64x32xf32>
    %56 = arith.addf %49, %55 : vector<64x32xf32>
    %c0_64 = arith.constant 0 : index
    %c0_65 = arith.constant 0 : index
    %c1_66 = arith.constant 1 : index
    %c1_67 = arith.constant 1 : index
    %c0_68 = arith.constant 0 : index
    %57 = vector.load %arg1[%c0_64, %c0_65, %c1_66, %c1_67, %c0_68] : memref<4x1x9x9x32xbf16, #tpu.memory_space<vmem>>, vector<1x1x8x8x32xbf16>
    %58 = vector.shape_cast %57 : vector<1x1x8x8x32xbf16> to vector<8x8x32xbf16>
    %59 = vector.shape_cast %58 : vector<8x8x32xbf16> to vector<64x32xbf16>
    %c8 = arith.constant 8 : index
    %c0_69 = arith.constant 0 : index
    %c0_70 = arith.constant 0 : index
    %60 = vector.load %arg2[%c8, %c0_69, %c0_70] : memref<9x32x32xbf16, #tpu.memory_space<vmem>>, vector<1x32x32xbf16>
    %61 = vector.shape_cast %60 : vector<1x32x32xbf16> to vector<32x32xbf16>
    %cst_71 = arith.constant dense<0.000000e+00> : vector<64x32xf32>
    %62 = tpu.matmul %59, %61, %cst_71 {dimension_numbers = #tpu.dot_dimension_numbers<[1], [0], [0], [1], [0, 0, 1, 1], [], []>} : vector<64x32xbf16>, vector<32x32xbf16>, vector<64x32xf32> -> vector<64x32xf32>
    %63 = arith.addf %56, %62 : vector<64x32xf32>
    %c0_72 = arith.constant 0 : index
    %c0_73 = arith.constant 0 : index
    %64 = vector.load %arg3[%c0_72, %c0_73] : memref<1x32xf32, #tpu.memory_space<vmem>>, vector<1x32xf32>
    %65 = vector.broadcast %64 : vector<1x32xf32> to vector<64x32xf32>
    %66 = arith.mulf %63, %65 : vector<64x32xf32>
    %c0_74 = arith.constant 0 : index
    %c0_75 = arith.constant 0 : index
    %67 = vector.load %arg4[%c0_74, %c0_75] : memref<1x32xf32, #tpu.memory_space<vmem>>, vector<1x32xf32>
    %68 = vector.broadcast %67 : vector<1x32xf32> to vector<64x32xf32>
    %69 = arith.addf %66, %68 : vector<64x32xf32>
    %cst_76 = arith.constant 0.000000e+00 : f32
    %70 = vector.broadcast %cst_76 : f32 to vector<64x32xf32>
    %71 = arith.maximumf %69, %70 : vector<64x32xf32>
    %72 = arith.truncf %71 : vector<64x32xf32> to vector<64x32xbf16>
    %c0_77 = arith.constant 0 : index
    %c0_78 = arith.constant 0 : index
    %c0_79 = arith.constant 0 : index
    %73 = vector.load %arg9[%c0_77, %c0_78, %c0_79] : memref<1x64x32xbf16, #tpu.memory_space<vmem>>, vector<1x64x32xbf16>
    %74 = vector.shape_cast %73 : vector<1x64x32xbf16> to vector<64x32xbf16>
    %75 = vector.shape_cast %72 : vector<64x32xbf16> to vector<1x64x32xbf16>
    tpu.vector_store %arg9[%c0_77, %c0_78, %c0_79], %75 {strides = array<i32>} : memref<1x64x32xbf16, #tpu.memory_space<vmem>>, vector<1x64x32xbf16>,
    %cst_80 = arith.constant dense<0.000000e+00> : vector<32xf32>
    %76 = vector.multi_reduction <add>, %71, %cst_80 [0] : vector<64x32xf32> to vector<32xf32>
    %77 = vector.shape_cast %76 : vector<32xf32> to vector<1x32xf32>
    %cst_81 = arith.constant 6.400000e+01 : f32
    %78 = vector.broadcast %cst_81 : f32 to vector<1x32xf32>
    %79 = arith.divf %77, %78 : vector<1x32xf32>
    %c0_82 = arith.constant 0 : index
    %c0_83 = arith.constant 0 : index
    %80 = vector.load %arg5[%c0_82, %c0_83] : memref<32x6xbf16, #tpu.memory_space<vmem>>, vector<32x6xbf16>
    %81 = arith.extf %80 : vector<32x6xbf16> to vector<32x6xf32>
    %cst_84 = arith.constant dense<0.000000e+00> : vector<1x6xf32>
    %82 = tpu.matmul %79, %81, %cst_84 {dimension_numbers = #tpu.dot_dimension_numbers<[1], [0], [0], [1], [0, 0, 1, 1], [], []>} : vector<1x32xf32>, vector<32x6xf32>, vector<1x6xf32> -> vector<1x6xf32>
    %c0_85 = arith.constant 0 : index
    %c0_86 = arith.constant 0 : index
    %83 = vector.load %arg6[%c0_85, %c0_86] : memref<1x6xf32, #tpu.memory_space<vmem>>, vector<1x6xf32>
    %84 = arith.addf %82, %83 : vector<1x6xf32>
    %cst_87 = arith.constant 0.000000e+00 : f32
    %85 = vector.broadcast %cst_87 : f32 to vector<1x6xf32>
    %86 = arith.maximumf %84, %85 : vector<1x6xf32>
    %c0_88 = arith.constant 0 : index
    %c0_89 = arith.constant 0 : index
    %87 = vector.load %arg7[%c0_88, %c0_89] : memref<6x32xbf16, #tpu.memory_space<vmem>>, vector<6x32xbf16>
    %88 = arith.extf %87 : vector<6x32xbf16> to vector<6x32xf32>
    %cst_90 = arith.constant dense<0.000000e+00> : vector<1x32xf32>
    %89 = tpu.matmul %86, %88, %cst_90 {dimension_numbers = #tpu.dot_dimension_numbers<[1], [0], [0], [1], [0, 0, 1, 1], [], []>} : vector<1x6xf32>, vector<6x32xf32>, vector<1x32xf32> -> vector<1x32xf32>
    %c0_91 = arith.constant 0 : index
    %c0_92 = arith.constant 0 : index
    %90 = vector.load %arg8[%c0_91, %c0_92] : memref<1x32xf32, #tpu.memory_space<vmem>>, vector<1x32xf32>
    %91 = arith.addf %89, %90 : vector<1x32xf32>
    %92 = arith.negf %91 : vector<1x32xf32>
    %93 = math.exp %92 : vector<1x32xf32>
    %cst_93 = arith.constant 1.000000e+00 : f32
    %94 = vector.broadcast %cst_93 : f32 to vector<1x32xf32>
    %95 = arith.addf %94, %93 : vector<1x32xf32>
    %96 = arith.divf %94, %95 : vector<1x32xf32>
    %c0_94 = arith.constant 0 : index
    %c0_95 = arith.constant 0 : index
    %c0_96 = arith.constant 0 : index
    %97 = vector.load %arg10[%c0_94, %c0_95, %c0_96] : memref<1x1x32xf32, #tpu.memory_space<vmem>>, vector<1x1x32xf32>
    %98 = vector.shape_cast %97 : vector<1x1x32xf32> to vector<1x32xf32>
    %99 = vector.shape_cast %96 : vector<1x32xf32> to vector<1x1x32xf32>
    tpu.vector_store %arg10[%c0_94, %c0_95, %c0_96], %99 {strides = array<i32>} : memref<1x1x32xf32, #tpu.memory_space<vmem>>, vector<1x1x32xf32>,
    return
  }
  func.func @transform_0(%arg0: i32) -> (i32, i32, i32, i32, i32) {
    %c0_i32 = arith.constant 0 : i32
    %c0_i32_0 = arith.constant 0 : i32
    %c0_i32_1 = arith.constant 0 : i32
    %c0_i32_2 = arith.constant 0 : i32
    %c0_i32_3 = arith.constant 0 : i32
    return %c0_i32, %arg0, %c0_i32_0, %c0_i32_1, %c0_i32_2 : i32, i32, i32, i32, i32
  }
  func.func @transform_1(%arg0: i32) -> (i32, i32, i32) {
    %c0_i32 = arith.constant 0 : i32
    %c0_i32_0 = arith.constant 0 : i32
    %c0_i32_1 = arith.constant 0 : i32
    %c0_i32_2 = arith.constant 0 : i32
    return %c0_i32, %c0_i32_0, %c0_i32_1 : i32, i32, i32
  }
  func.func @transform_2(%arg0: i32) -> (i32, i32) {
    %c0_i32 = arith.constant 0 : i32
    %c0_i32_0 = arith.constant 0 : i32
    %c0_i32_1 = arith.constant 0 : i32
    return %c0_i32, %c0_i32_0 : i32, i32
  }
  func.func @transform_3(%arg0: i32) -> (i32, i32) {
    %c0_i32 = arith.constant 0 : i32
    %c0_i32_0 = arith.constant 0 : i32
    %c0_i32_1 = arith.constant 0 : i32
    return %c0_i32, %c0_i32_0 : i32, i32
  }
  func.func @transform_4(%arg0: i32) -> (i32, i32) {
    %c0_i32 = arith.constant 0 : i32
    %c0_i32_0 = arith.constant 0 : i32
    %c0_i32_1 = arith.constant 0 : i32
    return %c0_i32, %c0_i32_0 : i32, i32
  }
  func.func @transform_5(%arg0: i32) -> (i32, i32) {
    %c0_i32 = arith.constant 0 : i32
    %c0_i32_0 = arith.constant 0 : i32
    %c0_i32_1 = arith.constant 0 : i32
    return %c0_i32, %c0_i32_0 : i32, i32
  }
  func.func @transform_6(%arg0: i32) -> (i32, i32) {
    %c0_i32 = arith.constant 0 : i32
    %c0_i32_0 = arith.constant 0 : i32
    %c0_i32_1 = arith.constant 0 : i32
    return %c0_i32, %c0_i32_0 : i32, i32
  }
  func.func @transform_7(%arg0: i32) -> (i32, i32) {
    %c0_i32 = arith.constant 0 : i32
    %c0_i32_0 = arith.constant 0 : i32
    %c0_i32_1 = arith.constant 0 : i32
    return %c0_i32, %c0_i32_0 : i32, i32
  }
  func.func @transform_8(%arg0: i32) -> (i32, i32, i32) {
    %c0_i32 = arith.constant 0 : i32
    %c0_i32_0 = arith.constant 0 : i32
    %c0_i32_1 = arith.constant 0 : i32
    return %arg0, %c0_i32, %c0_i32_0 : i32, i32, i32
  }
  func.func @transform_9(%arg0: i32) -> (i32, i32, i32) {
    %c0_i32 = arith.constant 0 : i32
    %c0_i32_0 = arith.constant 0 : i32
    %c0_i32_1 = arith.constant 0 : i32
    return %arg0, %c0_i32, %c0_i32_0 : i32, i32, i32
  }
}

module attributes {stable_mosaic.version = 11 : i64} {
  func.func @_mm_bn_kernel(%arg0: i32, %arg1: i32, %arg2: i32, %arg3: memref<1x64x24xbf16, #tpu.memory_space<vmem>>, %arg4: memref<24x32xbf16, #tpu.memory_space<vmem>>, %arg5: memref<1x32xf32, #tpu.memory_space<vmem>>, %arg6: memref<1x32xf32, #tpu.memory_space<vmem>>, %arg7: memref<1x64x32xf32, #tpu.memory_space<vmem>>, %arg8: memref<64x32xf32, #tpu.memory_space<vmem>>) attributes {dimension_semantics = [#tpu.dimension_semantics<parallel>, #tpu.dimension_semantics<parallel>, #tpu.dimension_semantics<arbitrary>], iteration_bounds = array<i64: 2, 1, 1>, scalar_prefetch = 0 : i64, scratch_operands = 1 : i64, tpu.core_type = #tpu.core_type<tc>, window_params = [{transform_indices = @transform_0, window_bounds = array<i64: 1, 64, 24>}, {transform_indices = @transform_1, window_bounds = array<i64: 24, 32>}, {pipeline_mode = #tpu.pipeline_mode<synchronous>, transform_indices = @transform_2, window_bounds = array<i64: 1, 32>}, {pipeline_mode = #tpu.pipeline_mode<synchronous>, transform_indices = @transform_3, window_bounds = array<i64: 1, 32>}, {transform_indices = @transform_4, window_bounds = array<i64: 1, 64, 32>}]} {
    %c0_i32 = arith.constant 0 : i32
    %0 = arith.cmpi eq, %arg2, %c0_i32 : i32
    %1 = arith.extui %0 : i1 to i32
    %c0_i32_0 = arith.constant 0 : i32
    %2 = arith.cmpi ne, %1, %c0_i32_0 : i32
    scf.if %2 {
      %cst_11 = arith.constant 0.000000e+00 : f32
      %13 = vector.broadcast %cst_11 : f32 to vector<64x32xf32>
      %c0_12 = arith.constant 0 : index
      %c0_13 = arith.constant 0 : index
      %14 = vector.load %arg8[%c0_12, %c0_13] : memref<64x32xf32, #tpu.memory_space<vmem>>, vector<64x32xf32>
      tpu.vector_store %arg8[%c0_12, %c0_13], %13 {strides = array<i32>} : memref<64x32xf32, #tpu.memory_space<vmem>>, vector<64x32xf32>,
    } else {
    }
    %c0 = arith.constant 0 : index
    %c0_1 = arith.constant 0 : index
    %c0_2 = arith.constant 0 : index
    %3 = vector.load %arg3[%c0, %c0_1, %c0_2] : memref<1x64x24xbf16, #tpu.memory_space<vmem>>, vector<1x64x24xbf16>
    %4 = vector.shape_cast %3 : vector<1x64x24xbf16> to vector<64x24xbf16>
    %c0_3 = arith.constant 0 : index
    %c0_4 = arith.constant 0 : index
    %5 = vector.load %arg8[%c0_3, %c0_4] : memref<64x32xf32, #tpu.memory_space<vmem>>, vector<64x32xf32>
    %c0_5 = arith.constant 0 : index
    %c0_6 = arith.constant 0 : index
    %6 = vector.load %arg4[%c0_5, %c0_6] : memref<24x32xbf16, #tpu.memory_space<vmem>>, vector<24x32xbf16>
    %cst = arith.constant dense<0.000000e+00> : vector<64x32xf32>
    %7 = tpu.matmul %4, %6, %cst {dimension_numbers = #tpu.dot_dimension_numbers<[1], [0], [0], [1], [0, 0, 1, 1], [], []>} : vector<64x24xbf16>, vector<24x32xbf16>, vector<64x32xf32> -> vector<64x32xf32>
    %8 = arith.addf %5, %7 : vector<64x32xf32>
    %c0_7 = arith.constant 0 : index
    %c0_8 = arith.constant 0 : index
    %9 = vector.load %arg8[%c0_7, %c0_8] : memref<64x32xf32, #tpu.memory_space<vmem>>, vector<64x32xf32>
    tpu.vector_store %arg8[%c0_7, %c0_8], %8 {strides = array<i32>} : memref<64x32xf32, #tpu.memory_space<vmem>>, vector<64x32xf32>,
    %c0_i32_9 = arith.constant 0 : i32
    %10 = arith.cmpi eq, %arg2, %c0_i32_9 : i32
    %11 = arith.extui %10 : i1 to i32
    %c0_i32_10 = arith.constant 0 : i32
    %12 = arith.cmpi ne, %11, %c0_i32_10 : i32
    scf.if %12 {
      %c0_11 = arith.constant 0 : index
      %c0_12 = arith.constant 0 : index
      %13 = vector.load %arg8[%c0_11, %c0_12] : memref<64x32xf32, #tpu.memory_space<vmem>>, vector<64x32xf32>
      %c0_13 = arith.constant 0 : index
      %c0_14 = arith.constant 0 : index
      %14 = vector.load %arg5[%c0_13, %c0_14] : memref<1x32xf32, #tpu.memory_space<vmem>>, vector<1x32xf32>
      %15 = vector.broadcast %14 : vector<1x32xf32> to vector<64x32xf32>
      %16 = arith.mulf %13, %15 : vector<64x32xf32>
      %c0_15 = arith.constant 0 : index
      %c0_16 = arith.constant 0 : index
      %17 = vector.load %arg6[%c0_15, %c0_16] : memref<1x32xf32, #tpu.memory_space<vmem>>, vector<1x32xf32>
      %18 = vector.broadcast %17 : vector<1x32xf32> to vector<64x32xf32>
      %19 = arith.addf %16, %18 : vector<64x32xf32>
      %c0_17 = arith.constant 0 : index
      %c0_18 = arith.constant 0 : index
      %c0_19 = arith.constant 0 : index
      %20 = vector.load %arg7[%c0_17, %c0_18, %c0_19] : memref<1x64x32xf32, #tpu.memory_space<vmem>>, vector<1x64x32xf32>
      %21 = vector.shape_cast %20 : vector<1x64x32xf32> to vector<64x32xf32>
      %22 = vector.shape_cast %19 : vector<64x32xf32> to vector<1x64x32xf32>
      tpu.vector_store %arg7[%c0_17, %c0_18, %c0_19], %22 {strides = array<i32>} : memref<1x64x32xf32, #tpu.memory_space<vmem>>, vector<1x64x32xf32>,
    } else {
    }
    return
  }
  func.func @transform_0(%arg0: i32, %arg1: i32, %arg2: i32) -> (i32, i32, i32) {
    %c0_i32 = arith.constant 0 : i32
    return %arg0, %arg1, %arg2 : i32, i32, i32
  }
  func.func @transform_1(%arg0: i32, %arg1: i32, %arg2: i32) -> (i32, i32) {
    %c0_i32 = arith.constant 0 : i32
    %c0_i32_0 = arith.constant 0 : i32
    return %arg2, %c0_i32 : i32, i32
  }
  func.func @transform_2(%arg0: i32, %arg1: i32, %arg2: i32) -> (i32, i32) {
    %c0_i32 = arith.constant 0 : i32
    %c0_i32_0 = arith.constant 0 : i32
    %c0_i32_1 = arith.constant 0 : i32
    return %c0_i32, %c0_i32_0 : i32, i32
  }
  func.func @transform_3(%arg0: i32, %arg1: i32, %arg2: i32) -> (i32, i32) {
    %c0_i32 = arith.constant 0 : i32
    %c0_i32_0 = arith.constant 0 : i32
    %c0_i32_1 = arith.constant 0 : i32
    return %c0_i32, %c0_i32_0 : i32, i32
  }
  func.func @transform_4(%arg0: i32, %arg1: i32, %arg2: i32) -> (i32, i32, i32) {
    %c0_i32 = arith.constant 0 : i32
    %c0_i32_0 = arith.constant 0 : i32
    return %arg0, %arg1, %c0_i32 : i32, i32, i32
  }
}

module attributes {stable_mosaic.version = 11 : i64} {
  func.func @_mm_bn_kernel(%arg0: i32, %arg1: i32, %arg2: i32, %arg3: memref<1x64x32xbf16, #tpu.memory_space<vmem>>, %arg4: memref<32x32xbf16, #tpu.memory_space<vmem>>, %arg5: memref<1x32xf32, #tpu.memory_space<vmem>>, %arg6: memref<1x32xf32, #tpu.memory_space<vmem>>, %arg7: memref<1x1x32xf32, #tpu.memory_space<vmem>>, %arg8: memref<1x64x32xf32, #tpu.memory_space<vmem>>, %arg9: memref<1x64x32xf32, #tpu.memory_space<vmem>>, %arg10: memref<64x32xf32, #tpu.memory_space<vmem>>) attributes {dimension_semantics = [#tpu.dimension_semantics<parallel>, #tpu.dimension_semantics<parallel>, #tpu.dimension_semantics<arbitrary>], iteration_bounds = array<i64: 2, 1, 1>, scalar_prefetch = 0 : i64, scratch_operands = 1 : i64, tpu.core_type = #tpu.core_type<tc>, window_params = [{transform_indices = @transform_0, window_bounds = array<i64: 1, 64, 32>}, {transform_indices = @transform_1, window_bounds = array<i64: 32, 32>}, {pipeline_mode = #tpu.pipeline_mode<synchronous>, transform_indices = @transform_2, window_bounds = array<i64: 1, 32>}, {pipeline_mode = #tpu.pipeline_mode<synchronous>, transform_indices = @transform_3, window_bounds = array<i64: 1, 32>}, {transform_indices = @transform_4, window_bounds = array<i64: 1, 1, 32>}, {transform_indices = @transform_5, window_bounds = array<i64: 1, 64, 32>}, {transform_indices = @transform_6, window_bounds = array<i64: 1, 64, 32>}]} {
    %c0_i32 = arith.constant 0 : i32
    %0 = arith.cmpi eq, %arg2, %c0_i32 : i32
    %1 = arith.extui %0 : i1 to i32
    %c0_i32_0 = arith.constant 0 : i32
    %2 = arith.cmpi ne, %1, %c0_i32_0 : i32
    scf.if %2 {
      %cst_14 = arith.constant 0.000000e+00 : f32
      %19 = vector.broadcast %cst_14 : f32 to vector<64x32xf32>
      %c0_15 = arith.constant 0 : index
      %c0_16 = arith.constant 0 : index
      %20 = vector.load %arg10[%c0_15, %c0_16] : memref<64x32xf32, #tpu.memory_space<vmem>>, vector<64x32xf32>
      tpu.vector_store %arg10[%c0_15, %c0_16], %19 {strides = array<i32>} : memref<64x32xf32, #tpu.memory_space<vmem>>, vector<64x32xf32>,
    } else {
    }
    %c0 = arith.constant 0 : index
    %c0_1 = arith.constant 0 : index
    %c0_2 = arith.constant 0 : index
    %3 = vector.load %arg3[%c0, %c0_1, %c0_2] : memref<1x64x32xbf16, #tpu.memory_space<vmem>>, vector<1x64x32xbf16>
    %4 = vector.shape_cast %3 : vector<1x64x32xbf16> to vector<64x32xbf16>
    %5 = arith.extf %4 : vector<64x32xbf16> to vector<64x32xf32>
    %c0_3 = arith.constant 0 : index
    %c0_4 = arith.constant 0 : index
    %c0_5 = arith.constant 0 : index
    %6 = vector.load %arg7[%c0_3, %c0_4, %c0_5] : memref<1x1x32xf32, #tpu.memory_space<vmem>>, vector<1x1x32xf32>
    %7 = vector.shape_cast %6 : vector<1x1x32xf32> to vector<1x32xf32>
    %8 = vector.broadcast %7 : vector<1x32xf32> to vector<64x32xf32>
    %9 = arith.mulf %5, %8 : vector<64x32xf32>
    %10 = arith.truncf %9 : vector<64x32xf32> to vector<64x32xbf16>
    %c0_6 = arith.constant 0 : index
    %c0_7 = arith.constant 0 : index
    %11 = vector.load %arg10[%c0_6, %c0_7] : memref<64x32xf32, #tpu.memory_space<vmem>>, vector<64x32xf32>
    %c0_8 = arith.constant 0 : index
    %c0_9 = arith.constant 0 : index
    %12 = vector.load %arg4[%c0_8, %c0_9] : memref<32x32xbf16, #tpu.memory_space<vmem>>, vector<32x32xbf16>
    %cst = arith.constant dense<0.000000e+00> : vector<64x32xf32>
    %13 = tpu.matmul %10, %12, %cst {dimension_numbers = #tpu.dot_dimension_numbers<[1], [0], [0], [1], [0, 0, 1, 1], [], []>} : vector<64x32xbf16>, vector<32x32xbf16>, vector<64x32xf32> -> vector<64x32xf32>
    %14 = arith.addf %11, %13 : vector<64x32xf32>
    %c0_10 = arith.constant 0 : index
    %c0_11 = arith.constant 0 : index
    %15 = vector.load %arg10[%c0_10, %c0_11] : memref<64x32xf32, #tpu.memory_space<vmem>>, vector<64x32xf32>
    tpu.vector_store %arg10[%c0_10, %c0_11], %14 {strides = array<i32>} : memref<64x32xf32, #tpu.memory_space<vmem>>, vector<64x32xf32>,
    %c0_i32_12 = arith.constant 0 : i32
    %16 = arith.cmpi eq, %arg2, %c0_i32_12 : i32
    %17 = arith.extui %16 : i1 to i32
    %c0_i32_13 = arith.constant 0 : i32
    %18 = arith.cmpi ne, %17, %c0_i32_13 : i32
    scf.if %18 {
      %c0_14 = arith.constant 0 : index
      %c0_15 = arith.constant 0 : index
      %19 = vector.load %arg10[%c0_14, %c0_15] : memref<64x32xf32, #tpu.memory_space<vmem>>, vector<64x32xf32>
      %c0_16 = arith.constant 0 : index
      %c0_17 = arith.constant 0 : index
      %20 = vector.load %arg5[%c0_16, %c0_17] : memref<1x32xf32, #tpu.memory_space<vmem>>, vector<1x32xf32>
      %21 = vector.broadcast %20 : vector<1x32xf32> to vector<64x32xf32>
      %22 = arith.mulf %19, %21 : vector<64x32xf32>
      %c0_18 = arith.constant 0 : index
      %c0_19 = arith.constant 0 : index
      %23 = vector.load %arg6[%c0_18, %c0_19] : memref<1x32xf32, #tpu.memory_space<vmem>>, vector<1x32xf32>
      %24 = vector.broadcast %23 : vector<1x32xf32> to vector<64x32xf32>
      %25 = arith.addf %22, %24 : vector<64x32xf32>
      %c0_20 = arith.constant 0 : index
      %c0_21 = arith.constant 0 : index
      %c0_22 = arith.constant 0 : index
      %26 = vector.load %arg8[%c0_20, %c0_21, %c0_22] : memref<1x64x32xf32, #tpu.memory_space<vmem>>, vector<1x64x32xf32>
      %27 = vector.shape_cast %26 : vector<1x64x32xf32> to vector<64x32xf32>
      %28 = arith.addf %25, %27 : vector<64x32xf32>
      %cst_23 = arith.constant 0.000000e+00 : f32
      %29 = vector.broadcast %cst_23 : f32 to vector<64x32xf32>
      %30 = arith.maximumf %28, %29 : vector<64x32xf32>
      %c0_24 = arith.constant 0 : index
      %c0_25 = arith.constant 0 : index
      %c0_26 = arith.constant 0 : index
      %31 = vector.load %arg9[%c0_24, %c0_25, %c0_26] : memref<1x64x32xf32, #tpu.memory_space<vmem>>, vector<1x64x32xf32>
      %32 = vector.shape_cast %31 : vector<1x64x32xf32> to vector<64x32xf32>
      %33 = vector.shape_cast %30 : vector<64x32xf32> to vector<1x64x32xf32>
      tpu.vector_store %arg9[%c0_24, %c0_25, %c0_26], %33 {strides = array<i32>} : memref<1x64x32xf32, #tpu.memory_space<vmem>>, vector<1x64x32xf32>,
    } else {
    }
    return
  }
  func.func @transform_0(%arg0: i32, %arg1: i32, %arg2: i32) -> (i32, i32, i32) {
    %c0_i32 = arith.constant 0 : i32
    return %arg0, %arg1, %arg2 : i32, i32, i32
  }
  func.func @transform_1(%arg0: i32, %arg1: i32, %arg2: i32) -> (i32, i32) {
    %c0_i32 = arith.constant 0 : i32
    %c0_i32_0 = arith.constant 0 : i32
    return %arg2, %c0_i32 : i32, i32
  }
  func.func @transform_2(%arg0: i32, %arg1: i32, %arg2: i32) -> (i32, i32) {
    %c0_i32 = arith.constant 0 : i32
    %c0_i32_0 = arith.constant 0 : i32
    %c0_i32_1 = arith.constant 0 : i32
    return %c0_i32, %c0_i32_0 : i32, i32
  }
  func.func @transform_3(%arg0: i32, %arg1: i32, %arg2: i32) -> (i32, i32) {
    %c0_i32 = arith.constant 0 : i32
    %c0_i32_0 = arith.constant 0 : i32
    %c0_i32_1 = arith.constant 0 : i32
    return %c0_i32, %c0_i32_0 : i32, i32
  }
  func.func @transform_4(%arg0: i32, %arg1: i32, %arg2: i32) -> (i32, i32, i32) {
    %c0_i32 = arith.constant 0 : i32
    %c0_i32_0 = arith.constant 0 : i32
    return %arg0, %c0_i32, %arg2 : i32, i32, i32
  }
  func.func @transform_5(%arg0: i32, %arg1: i32, %arg2: i32) -> (i32, i32, i32) {
    %c0_i32 = arith.constant 0 : i32
    %c0_i32_0 = arith.constant 0 : i32
    return %arg0, %arg1, %c0_i32 : i32, i32, i32
  }
  func.func @transform_6(%arg0: i32, %arg1: i32, %arg2: i32) -> (i32, i32, i32) {
    %c0_i32 = arith.constant 0 : i32
    %c0_i32_0 = arith.constant 0 : i32
    return %arg0, %arg1, %c0_i32 : i32, i32, i32
  }
}

</mosaic_0001>

<bundles_post_ra>
// kernel: block_forward.4
= control target key start
LH: loop header
LB: loop body
LE: loop exit
PB: predicated region body
PF: predicated region fallthrough
CT: control target
= control target key end

     0   :  { %s1431_s15 = smov 0   ;;  %s1433_s16 = smov 0   ;;  %s1742_s0 = inlined_call_operand.vmem [shape: bf16[2,256,24], index: 0, kind: input, shape index: {}]   ;;  %s1743_s1 = inlined_call_operand.vmem [shape: bf16[24,32], index: 1, kind: input, shape index: {}]   ;;  %s1744_s2 = inlined_call_operand.vmem [shape: f32[1,32], index: 2, kind: input, shape index: {}]   ;;  %s1745_s3 = inlined_call_operand.vmem [shape: f32[1,32], index: 3, kind: input, shape index: {}]   ;;  %s1746_s4 = inlined_call_operand.vmem [shape: bf16[2,256,32], index: 4, kind: output, shape index: {}]  }
   0x1   :  { %s1435_s17 = smov 0  }
   0x2 LB: > { %s33_s18 = sadd.s32 1, %s1399_s16  ;;  %p1169_p0 = scmp.ge.s32.totalorder %s1403_s17, 1  ;;  %s1403_s17 = sphi %s1435_s17, %s14_s17   ;;  %s1399_s16 = sphi %s1433_s16, %s1748_s16   ;;  %s1395_s15 = sphi %s1431_s15, %s1747_s15  }
   0x3   : > { %p35_p1 = scmp.ge.s32.totalorder %s33_s18, 2  ;;  %p206_p2 = scmp.lt.s32.totalorder %s1403_s17, 3 }
   0x5   : > { %s1750_s18 = smov (%p35_p1, %s33_s18), 0  ;;  %p207_p3 = pnand %p1169_p0, %p206_p2 }
   0x6   : > { %v1363_v0 = vld [vmem:[%s1743_s1] sm:$0xff] (!%p207_p3)   ;;  %v1364_v1 = vld [vmem:[%s1743_s1 + $0x8] ss:$0 sps:$4 sm:$0xff] (!%p207_p3)   ;;  %vm520_vm0 = vcmask (!%p207_p3), 1043456   ;;  %p249_p4 = scmp.lt.s32.totalorder (!%p207_p3), %s1395_s15, 1  ;;  %vm282_vm1 = vcmask (!%p207_p3), 261120  }
   0x7   : > { %210 = sbr.rel (%p207_p3) target bundleno = 291 (0x123), region = 36  ;;  %1296 = vmatprep.subr.bf16.mxu0 (!%p207_p3), %v1363_v0  ;;  %1332 = vmatprep.subr.bf16.mxu1 (!%p207_p3), %v1363_v0  ;;  %v1405_v2 = vmov (!%p207_p3), 0.0   ;;  %v522_v3 = vsel (!%p207_p3), %vm520_vm0, %v1364_v1, 0  ;;  %vm471_vm2 = vcmask (!%p207_p3), 195584   ;;  %v1543_v47 = vld [vmem:[%s1744_s2] ss:$0 sm:$0xff] (!%p207_p3) }
   0x8   : > { %1297 = vmatpush3.bf16.msra.mxu0 (!%p207_p3), %v1363_v0  ;;  %1334 = vmatpush3.bf16.msra.mxu1 (!%p207_p3), %v1363_v0  ;;  %285 = vst.msk [vmem:[#allocation2 + $0x10] sm:$0xff] (!%p207_p3), %vm282_vm1, %v1405_v2  ;;  %283 = vst.msk [vmem:[#allocation2] sm:$0xff] (!%p207_p3), %vm282_vm1, %v1405_v2  ;;  %v1548_v57 = vld [vmem:[%s1745_s3] ss:$0 sm:$0xff] (!%p207_p3)  ;;  %vm1023_vm3 = vcmask (!%p207_p3), 257024  }
   0x9   : > { %284 = vst.msk [vmem:[#allocation2 + $0x8] sm:$0xff] (!%p207_p3), %vm282_vm1, %v1405_v2  ;;  %286 = vst.msk [vmem:[#allocation2 + $0x18] sm:$0xff] (!%p207_p3), %vm282_vm1, %v1405_v2  ;;  %1336 = vmatprep.subr.msk.bf16.mxu0 (!%p207_p3), %vm520_vm0, %v1364_v1  ;;  %1337 = vmatprep.subr.msk.bf16.mxu1 (!%p207_p3), %vm520_vm0, %v1364_v1 }
   0xa   : > { %287 = vst.msk [vmem:[#allocation2 + $0x20] sm:$0xff] (!%p207_p3), %vm282_vm1, %v1405_v2  ;;  %288 = vst.msk [vmem:[#allocation2 + $0x28] sm:$0xff] (!%p207_p3), %vm282_vm1, %v1405_v2 }
   0xb   : > { %289 = vst.msk [vmem:[#allocation2 + $0x30] sm:$0xff] (!%p207_p3), %vm282_vm1, %v1405_v2  ;;  %290 = vst.msk [vmem:[#allocation2 + $0x38] sm:$0xff] (!%p207_p3), %vm282_vm1, %v1405_v2 }
   0xc   : > { %291 = vst.msk [vmem:[#allocation2 + $0x40] sm:$0xff] (!%p207_p3), %vm282_vm1, %v1405_v2  ;;  %292 = vst.msk [vmem:[#allocation2 + $0x48] sm:$0xff] (!%p207_p3), %vm282_vm1, %v1405_v2  ;;  %1299 = vmatpush3.bf16.msra.mxu0 (!%p207_p3), %v522_v3  ;;  %1335 = vmatpush3.bf16.msra.mxu1 (!%p207_p3), %v522_v3 }
   0xd   : > { %293 = vst.msk [vmem:[#allocation2 + $0x50] sm:$0xff] (!%p207_p3), %vm282_vm1, %v1405_v2  ;;  %294 = vst.msk [vmem:[#allocation2 + $0x58] sm:$0xff] (!%p207_p3), %vm282_vm1, %v1405_v2 }
   0xe   : > { %s1752_s15 = smov (!%p249_p4, %s1395_s15), 1  ;;  %295 = vst.msk [vmem:[#allocation2 + $0x60] sm:$0xff] %vm282_vm1, %v1405_v2  ;;  %296 = vst.msk [vmem:[#allocation2 + $0x68] sm:$0xff] %vm282_vm1, %v1405_v2 }
   0xf   : > { %297 = vst.msk [vmem:[#allocation2 + $0x70] sm:$0xff] %vm282_vm1, %v1405_v2  ;;  %298 = vst.msk [vmem:[#allocation2 + $0x78] sm:$0xff] %vm282_vm1, %v1405_v2  ;;  %s1244_s23 = sshll.u32 %s1752_s15, 7  ;;  %v349_v20 = vld [vmem:[#allocation2 + $0x10] sm:$0xff]  ;;  %v347_v22 = vld [vmem:[#allocation2] sm:$0xff] }
  0x10   : > { %299 = vst.msk [vmem:[#allocation2 + $0x80] sm:$0xff] %vm282_vm1, %v1405_v2  ;;  %300 = vst.msk [vmem:[#allocation2 + $0x88] sm:$0xff] %vm282_vm1, %v1405_v2  ;;  %s1498_s26 = scalar_lea.vmem %s1742_s0, %s1244_s23  ;;  %v350_v25 = vld [vmem:[#allocation2 + $0x18] sm:$0xff]  ;;  %v348_v30 = vld [vmem:[#allocation2 + $0x8] sm:$0xff]  ;;  %s1576_s7 = scalar_lea.vmem %s1746_s4, %s1244_s23 }
  0x11   : > { %301 = vst.msk [vmem:[#allocation2 + $0x90] sm:$0xff] %vm282_vm1, %v1405_v2  ;;  %302 = vst.msk [vmem:[#allocation2 + $0x98] sm:$0xff] %vm282_vm1, %v1405_v2  ;;  %v1365_v4 = vld [vmem:[%s1498_s26] sm:$0xff]   ;;  %v1367_v6 = vld [vmem:[%s1498_s26 + $0x8] sm:$0xff]  }
  0x12   : > { %303 = vst.msk [vmem:[#allocation2 + $0xa0] sm:$0xff] %vm282_vm1, %v1405_v2  ;;  %304 = vst.msk [vmem:[#allocation2 + $0xa8] sm:$0xff] %vm282_vm1, %v1405_v2  ;;  %v1366_v5 = vld [vmem:[%s1498_s26 + $0x40] sm:$0xff]   ;;  %1300 = vmatprep.mubr.msk.bf16.mxu0 %vm471_vm2, %v1365_v4  ;;  %v1368_v7 = vld [vmem:[%s1498_s26 + $0x48] sm:$0xff]  }
  0x13   : > { %305 = vst.msk [vmem:[#allocation2 + $0xb0] sm:$0xff] %vm282_vm1, %v1405_v2  ;;  %306 = vst.msk [vmem:[#allocation2 + $0xb8] sm:$0xff] %vm282_vm1, %v1405_v2  ;;  %1316 = vmatprep.mubr.msk.bf16.mxu1 %vm471_vm2, %v1366_v5  ;;  %1301 = vmatmul.mubr.msk.bf16.vlgmr.msra.gmra.mrb[0].mxu0 %vm471_vm2, %v1367_v6  ;;  %v1369_v8 = vld [vmem:[%s1498_s26 + $0x10] sm:$0xff]   ;;  %v1371_v10 = vld [vmem:[%s1498_s26 + $0x18] sm:$0xff]  }
  0x14   : > { %307 = vst.msk [vmem:[#allocation2 + $0xc0] sm:$0xff] %vm282_vm1, %v1405_v2  ;;  %308 = vst.msk [vmem:[#allocation2 + $0xc8] sm:$0xff] %vm282_vm1, %v1405_v2  ;;  %1317 = vmatmul.mubr.msk.bf16.vlgmr.msra.gmra.mrb[0].mxu1 %vm471_vm2, %v1368_v7  ;;  %v1370_v9 = vld [vmem:[%s1498_s26 + $0x50] sm:$0xff]   ;;  %1304 = vmatprep.mubr.msk.bf16.mxu0 %vm471_vm2, %v1369_v8  ;;  %v1372_v11 = vld [vmem:[%s1498_s26 + $0x58] sm:$0xff]  }
  0x15   : > { %309 = vst.msk [vmem:[#allocation2 + $0xd0] sm:$0xff] %vm282_vm1, %v1405_v2  ;;  %310 = vst.msk [vmem:[#allocation2 + $0xd8] sm:$0xff] %vm282_vm1, %v1405_v2  ;;  %1320 = vmatprep.mubr.msk.bf16.mxu1 %vm471_vm2, %v1370_v9  ;;  %v1373_v12 = vld [vmem:[%s1498_s26 + $0x20] sm:$0xff]   ;;  %v1375_v14 = vld [vmem:[%s1498_s26 + $0x28] sm:$0xff]  }
  0x16   : > { %311 = vst.msk [vmem:[#allocation2 + $0xe0] sm:$0xff] %vm282_vm1, %v1405_v2  ;;  %312 = vst.msk [vmem:[#allocation2 + $0xe8] sm:$0xff] %vm282_vm1, %v1405_v2  ;;  %v1374_v13 = vld [vmem:[%s1498_s26 + $0x60] sm:$0xff]   ;;  %v1376_v15 = vld [vmem:[%s1498_s26 + $0x68] sm:$0xff]  }
  0x17   : > { %313 = vst.msk [vmem:[#allocation2 + $0xf0] sm:$0xff] %vm282_vm1, %v1405_v2  ;;  %314 = vst.msk [vmem:[#allocation2 + $0xf8] sm:$0xff] %vm282_vm1, %v1405_v2  ;;  %v1377_v16 = vld [vmem:[%s1498_s26 + $0x30] sm:$0xff]   ;;  %v1379_v18 = vld [vmem:[%s1498_s26 + $0x38] sm:$0xff]  }
  0x18   : > { %v1378_v17 = vld [vmem:[%s1498_s26 + $0x70] sm:$0xff]   ;;  %v1380_v19 = vld [vmem:[%s1498_s26 + $0x78] sm:$0xff]   ;;  %v363_v24 = vld [vmem:[#allocation2 + $0x80] sm:$0xff] }
  0x19   : > { %v365_v21 = vld [vmem:[#allocation2 + $0x90] sm:$0xff]  ;;  %v366_v29 = vld [vmem:[#allocation2 + $0x98] sm:$0xff]  ;;  %v364_v35 = vld [vmem:[#allocation2 + $0x88] sm:$0xff] }
  0x1a   : > { %v353_v44 = vld [vmem:[#allocation2 + $0x30] sm:$0xff]  ;;  %v351_v46 = vld [vmem:[#allocation2 + $0x20] sm:$0xff]  ;;  %v354_v50 = vld [vmem:[#allocation2 + $0x38] sm:$0xff] }
  0x1b   : > { %1305 = vmatmul.mubr.msk.bf16.gmra.mrb[4].mxu0 %vm471_vm2, %v1371_v10  ;;  %v369_v45 = vld [vmem:[#allocation2 + $0xb0] sm:$0xff]  ;;  %v367_v49 = vld [vmem:[#allocation2 + $0xa0] sm:$0xff]  ;;  %v370_v54 = vld [vmem:[#allocation2 + $0xb8] sm:$0xff] }
  0x1c   : > { %1321 = vmatmul.mubr.msk.bf16.gmra.mrb[4].mxu1 %vm471_vm2, %v1372_v11  ;;  %1308 = vmatprep.mubr.msk.bf16.mxu0 %vm471_vm2, %v1373_v12  ;;  %v352_v55 = vld [vmem:[#allocation2 + $0x28] sm:$0xff] }
  0x1d   : > { %1324 = vmatprep.mubr.msk.bf16.mxu1 %vm471_vm2, %v1374_v13  ;;  %v368_v62 = vld [vmem:[#allocation2 + $0xa8] sm:$0xff] }
  0x23   : > { %1309 = vmatmul.mubr.msk.bf16.gmra.mrb[8].mxu0 %vm471_vm2, %v1375_v14 }
  0x24   : > { %1325 = vmatmul.mubr.msk.bf16.gmra.mrb[8].mxu1 %vm471_vm2, %v1376_v15  ;;  %1312 = vmatprep.mubr.msk.bf16.mxu0 %vm471_vm2, %v1377_v16 }
  0x25   : > { %1328 = vmatprep.mubr.msk.bf16.mxu1 %vm471_vm2, %v1378_v17 }
  0x2b   : > { %1313 = vmatmul.mubr.msk.bf16.gmra.mrb[12].mxu0 %vm471_vm2, %v1379_v18 }
  0x2c   : > { %1329 = vmatmul.mubr.msk.bf16.gmra.mrb[12].mxu1 %vm471_vm2, %v1380_v19 }
  0xe6   : > { %v1302_v23 = vpop.f32.mrb[0].mxu0 }
  0xe7   : > { %v687_v26 = vadd.f32 %v1302_v23, %v349_v20  ;;  %v1318_v27 = vpop.f32.mrb[0].mxu1  ;;  %v558_v28 = vpop.f32.mrb[1].mxu0 }
  0xe8   : > { %v703_v31 = vadd.f32 %v1318_v27, %v365_v21  ;;  %v685_v32 = vadd.f32 %v558_v28, %v347_v22  ;;  %v622_v33 = vpop.f32.mrb[1].mxu1  ;;  %v1303_v34 = vpop.f32.mrb[2].mxu0 }
  0xe9   : > { %720 = vst.msk [vmem:[#allocation2 + $0x10] sm:$0xff] %vm282_vm1, %v687_v26  ;;  %v701_v36 = vadd.f32 %v622_v33, %v363_v24  ;;  %v688_v37 = vadd.f32 %v1303_v34, %v350_v25  ;;  %v1319_v38 = vpop.f32.mrb[2].mxu1  ;;  %v561_v39 = vpop.f32.mrb[3].mxu0 }
  0xea   : > { %736 = vst.msk [vmem:[#allocation2 + $0x90] sm:$0xff] %vm282_vm1, %v703_v31  ;;  %718 = vst.msk [vmem:[#allocation2] sm:$0xff] %vm282_vm1, %v685_v32  ;;  %v704_v40 = vadd.f32 %v1319_v38, %v366_v29  ;;  %v686_v41 = vadd.f32 %v561_v39, %v348_v30  ;;  %v625_v42 = vpop.f32.mrb[3].mxu1 }
  0xeb   : > { %734 = vst.msk [vmem:[#allocation2 + $0x80] sm:$0xff] %vm282_vm1, %v701_v36  ;;  %721 = vst.msk [vmem:[#allocation2 + $0x18] sm:$0xff] %vm282_vm1, %v688_v37  ;;  %v702_v43 = vadd.f32 %v625_v42, %v364_v35 }
  0xec   : > { %737 = vst.msk [vmem:[#allocation2 + $0x98] sm:$0xff] %vm282_vm1, %v704_v40  ;;  %719 = vst.msk [vmem:[#allocation2 + $0x8] sm:$0xff] %vm282_vm1, %v686_v41 }
  0xed   : > { %735 = vst.msk [vmem:[#allocation2 + $0x88] sm:$0xff] %vm282_vm1, %v702_v43 }
  0xee   : > { %v1306_v48 = vpop.f32.mrb[4].mxu0 }
  0xef   : > { %v691_v51 = vadd.f32 %v1306_v48, %v353_v44  ;;  %v1322_v52 = vpop.f32.mrb[4].mxu1  ;;  %v574_v53 = vpop.f32.mrb[5].mxu0 }
  0xf0   : > { %v755_v56 = vld [vmem:[#allocation2 + $0x10] sm:$0xff]  ;;  %v707_v58 = vadd.f32 %v1322_v52, %v369_v45  ;;  %v689_v59 = vadd.f32 %v574_v53, %v351_v46  ;;  %v638_v60 = vpop.f32.mrb[5].mxu1  ;;  %v1307_v61 = vpop.f32.mrb[6].mxu0 }
  0xf1   : > { %v794_v63 = vmul.f32 %v1543_v47, %v755_v56  ;;  %v771_v0 = vld [vmem:[#allocation2 + $0x90] sm:$0xff]  ;;  %v753_v1 = vld [vmem:[#allocation2] sm:$0xff]  ;;  %724 = vst.msk [vmem:[#allocation2 + $0x30] sm:$0xff] %vm282_vm1, %v691_v51  ;;  %v705_v2 = vadd.f32 %v638_v60, %v367_v49  ;;  %v692_v3 = vadd.f32 %v1307_v61, %v354_v50  ;;  %v1323_v4 = vpop.f32.mrb[6].mxu1  ;;  %v577_v5 = vpop.f32.mrb[7].mxu0 }
  0xf2   : > { %v810_v6 = vmul.f32 %v1543_v47, %v771_v0  ;;  %v792_v7 = vmul.f32 %v1543_v47, %v753_v1  ;;  %v769_v8 = vld [vmem:[#allocation2 + $0x80] sm:$0xff]  ;;  %v756_v9 = vld [vmem:[#allocation2 + $0x18] sm:$0xff]  ;;  %740 = vst.msk [vmem:[#allocation2 + $0xb0] sm:$0xff] %vm282_vm1, %v707_v58  ;;  %722 = vst.msk [vmem:[#allocation2 + $0x20] sm:$0xff] %vm282_vm1, %v689_v59  ;;  %v708_v10 = vadd.f32 %v1323_v4, %v370_v54  ;;  %v641_v12 = vpop.f32.mrb[7].mxu1 }
  0xf3   : > { %v690_v11 = vadd.f32 %v577_v5, %v352_v55  ;;  %v833_v13 = vadd.f32 %v1548_v57, %v794_v63  ;;  %v808_v14 = vmul.f32 %v1543_v47, %v769_v8  ;;  %v795_v15 = vmul.f32 %v1543_v47, %v756_v9  ;;  %v772_v16 = vld [vmem:[#allocation2 + $0x98] sm:$0xff]  ;;  %v754_v17 = vld [vmem:[#allocation2 + $0x8] sm:$0xff]  ;;  %738 = vst.msk [vmem:[#allocation2 + $0xa0] sm:$0xff] %vm282_vm1, %v705_v2 }
  0xf4   : > { %725 = vst.msk [vmem:[#allocation2 + $0x38] sm:$0xff] %vm282_vm1, %v692_v3  ;;  %v706_v18 = vadd.f32 %v641_v12, %v368_v62  ;;  %v849_v19 = vadd.f32 %v1548_v57, %v810_v6  ;;  %v831_v20 = vadd.f32 %v1548_v57, %v792_v7  ;;  %v811_v21 = vmul.f32 %v1543_v47, %v772_v16  ;;  %v770_v23 = vld [vmem:[#allocation2 + $0x88] sm:$0xff] }
  0xf5   : > { %v793_v22 = vmul.f32 %v1543_v47, %v754_v17  ;;  %741 = vst.msk [vmem:[#allocation2 + $0xb8] sm:$0xff] %vm282_vm1, %v708_v10  ;;  %723 = vst.msk [vmem:[#allocation2 + $0x28] sm:$0xff] %vm282_vm1, %v690_v11  ;;  %v865_v24 = vmax.f32 %v833_v13, 0.0  ;;  %v847_v25 = vadd.f32 %v1548_v57, %v808_v14  ;;  %v834_v26 = vadd.f32 %v1548_v57, %v795_v15  ;;  %v357_v14 = vld [vmem:[#allocation2 + $0x50] sm:$0xff] }
  0xf6   : > { %v809_v27 = vmul.f32 %v1543_v47, %v770_v23  ;;  %739 = vst.msk [vmem:[#allocation2 + $0xa8] sm:$0xff] %vm282_vm1, %v706_v18  ;;  %v881_v28 = vmax.f32 %v849_v19, 0.0  ;;  %v863_v29 = vmax.f32 %v831_v20, 0.0  ;;  %v850_v30 = vadd.f32 %v1548_v57, %v811_v21  ;;  %v1580_v32 = vpop.f32.mrb[8].mxu0  ;;  %v373_v19 = vld [vmem:[#allocation2 + $0xd0] sm:$0xff]  ;;  %v355_v20 = vld [vmem:[#allocation2 + $0x40] sm:$0xff] }
  0xf7   : > { %v832_v31 = vadd.f32 %v1548_v57, %v793_v22  ;;  %v1248_v33 = vpack.c.bf16 %v865_v24, %v865_v24  ;;  %v879_v34 = vmax.f32 %v847_v25, 0.0  ;;  %v866_v35 = vmax.f32 %v834_v26, 0.0  ;;  %v1583_v37 = vpop.f32.mrb[8].mxu1  ;;  %v1585_v38 = vpop.f32.mrb[9].mxu0  ;;  %v371_v21 = vld [vmem:[#allocation2 + $0xc0] sm:$0xff] }
  0xf8   : > { %v848_v36 = vadd.f32 %v1548_v57, %v809_v27  ;;  %v1264_v39 = vpack.c.bf16 %v881_v28, %v881_v28  ;;  %v1246_v40 = vpack.c.bf16 %v863_v29, %v863_v29  ;;  %v882_v41 = vmax.f32 %v850_v30, 0.0  ;;  %v759_v43 = vld [vmem:[#allocation2 + $0x30] sm:$0xff]  ;;  %v1587_v44 = vpop.f32.mrb[9].mxu1  ;;  %v1589_v45 = vpop.f32.mrb[10].mxu0  ;;  %v358_v27 = vld [vmem:[#allocation2 + $0x58] sm:$0xff] }
  0xf9   : > { %v864_v42 = vmax.f32 %v832_v31, 0.0  ;;  %1026 = vst.msk [vmem:[%s1576_s7 + $0x8] sm:$0xf] %vm1023_vm3, %v1248_v33  ;;  %v1262_v46 = vpack.c.bf16 %v879_v34, %v879_v34  ;;  %v1249_v48 = vpack.c.bf16 %v866_v35, %v866_v35  ;;  %v798_v50 = vmul.f32 %v1543_v47, %v759_v43  ;;  %v775_v51 = vld [vmem:[#allocation2 + $0xb0] sm:$0xff]  ;;  %v757_v52 = vld [vmem:[#allocation2 + $0x20] sm:$0xff]  ;;  %v1594_v53 = vpop.f32.mrb[10].mxu1 }
  0xfa   : > { %v880_v49 = vmax.f32 %v848_v36, 0.0  ;;  %v1596_v54 = vpop.f32.mrb[11].mxu0  ;;  %1042 = vst.msk [vmem:[%s1576_s7 + $0x48] sm:$0xf] %vm1023_vm3, %v1264_v39  ;;  %1024 = vst.msk [vmem:[%s1576_s7] sm:$0xf] %vm1023_vm3, %v1246_v40  ;;  %v1265_v55 = vpack.c.bf16 %v882_v41, %v882_v41  ;;  %v814_v58 = vmul.f32 %v1543_v47, %v775_v51  ;;  %v796_v59 = vmul.f32 %v1543_v47, %v757_v52 }
  0xfb   : > { %v1247_v56 = vpack.c.bf16 %v864_v42, %v864_v42  ;;  %v773_v60 = vld [vmem:[#allocation2 + $0xa0] sm:$0xff]  ;;  %v760_v61 = vld [vmem:[#allocation2 + $0x38] sm:$0xff]  ;;  %v1604_v62 = vpop.f32.mrb[11].mxu1  ;;  %1040 = vst.msk [vmem:[%s1576_s7 + $0x40] sm:$0xf] %vm1023_vm3, %v1262_v46  ;;  %v837_v0 = vadd.f32 %v1548_v57, %v798_v50  ;;  %v356_v36 = vld [vmem:[#allocation2 + $0x48] sm:$0xff] }
  0xfc   : > { %1027 = vst.msk [vmem:[%s1576_s7 + $0xc] sm:$0xf] %vm1023_vm3, %v1249_v48  ;;  %v1263_v63 = vpack.c.bf16 %v880_v49, %v880_v49  ;;  %v812_v1 = vmul.f32 %v1543_v47, %v773_v60  ;;  %v799_v2 = vmul.f32 %v1543_v47, %v760_v61  ;;  %v776_v3 = vld [vmem:[#allocation2 + $0xb8] sm:$0xff]  ;;  %v758_v4 = vld [vmem:[#allocation2 + $0x28] sm:$0xff]  ;;  %1043 = vst.msk [vmem:[%s1576_s7 + $0x4c] sm:$0xf] %vm1023_vm3, %v1265_v55 }
  0xfd   : > { %1025 = vst.msk [vmem:[%s1576_s7 + $0x4] sm:$0xf] %vm1023_vm3, %v1247_v56  ;;  %v853_v5 = vadd.f32 %v1548_v57, %v814_v58  ;;  %v835_v6 = vadd.f32 %v1548_v57, %v796_v59  ;;  %v815_v7 = vmul.f32 %v1543_v47, %v776_v3  ;;  %v797_v8 = vmul.f32 %v1543_v47, %v758_v4  ;;  %v774_v9 = vld [vmem:[#allocation2 + $0xa8] sm:$0xff]  ;;  %v374_v28 = vld [vmem:[#allocation2 + $0xd8] sm:$0xff]  ;;  %v361_v49 = vld [vmem:[#allocation2 + $0x70] sm:$0xff] }
  0xfe   : > { %1041 = vst.msk [vmem:[%s1576_s7 + $0x44] sm:$0xf] %vm1023_vm3, %v1263_v63  ;;  %v869_v10 = vmax.f32 %v837_v0, 0.0  ;;  %v851_v11 = vadd.f32 %v1548_v57, %v812_v1  ;;  %v838_v12 = vadd.f32 %v1548_v57, %v799_v2  ;;  %v813_v13 = vmul.f32 %v1543_v47, %v774_v9  ;;  %v1314_v22 = vpop.f32.mrb[12].mxu0  ;;  %v372_v39 = vld [vmem:[#allocation2 + $0xc8] sm:$0xff]  ;;  %v377_v50 = vld [vmem:[#allocation2 + $0xf0] sm:$0xff] }
  0xff   : > { %v885_v15 = vmax.f32 %v853_v5, 0.0  ;;  %v867_v16 = vmax.f32 %v835_v6, 0.0  ;;  %v854_v17 = vadd.f32 %v1548_v57, %v815_v7  ;;  %v836_v18 = vadd.f32 %v1548_v57, %v797_v8  ;;  %v1330_v29 = vpop.f32.mrb[12].mxu1  ;;  %v606_v30 = vpop.f32.mrb[13].mxu0  ;;  %v359_v51 = vld [vmem:[#allocation2 + $0x60] sm:$0xff]  ;;  %v362_v61 = vld [vmem:[#allocation2 + $0x78] sm:$0xff] }
 0x100   : > { %v1252_v23 = vpack.c.bf16 %v869_v10, %v869_v10  ;;  %v883_v24 = vmax.f32 %v851_v11, 0.0  ;;  %v870_v25 = vmax.f32 %v838_v12, 0.0  ;;  %v852_v26 = vadd.f32 %v1548_v57, %v813_v13  ;;  %v670_v40 = vpop.f32.mrb[13].mxu1  ;;  %v1315_v41 = vpop.f32.mrb[14].mxu0  ;;  %v378_v63 = vld [vmem:[#allocation2 + $0xf8] sm:$0xff]  ;;  %v360_v4 = vld [vmem:[#allocation2 + $0x68] sm:$0xff] }
 0x101   : > { %v1268_v31 = vpack.c.bf16 %v885_v15, %v885_v15  ;;  %v1250_v33 = vpack.c.bf16 %v867_v16, %v867_v16  ;;  %v886_v34 = vmax.f32 %v854_v17, 0.0  ;;  %v868_v35 = vmax.f32 %v836_v18, 0.0  ;;  %v1331_v52 = vpop.f32.mrb[14].mxu1  ;;  %v609_v55 = vpop.f32.mrb[15].mxu0 }
 0x102   : > { %1030 = vst.msk [vmem:[%s1576_s7 + $0x18] sm:$0xf] %vm1023_vm3, %v1252_v23  ;;  %v1266_v42 = vpack.c.bf16 %v883_v24, %v883_v24  ;;  %v1253_v43 = vpack.c.bf16 %v870_v25, %v870_v25  ;;  %v884_v46 = vmax.f32 %v852_v26, 0.0  ;;  %v695_v48 = vadd.f32 %v1580_v32, %v357_v14  ;;  %v375_v32 = vld [vmem:[#allocation2 + $0xe0] sm:$0xff]  ;;  %v673_v0 = vpop.f32.mrb[15].mxu1 }
 0x103   : > { %1046 = vst.msk [vmem:[%s1576_s7 + $0x58] sm:$0xf] %vm1023_vm3, %v1268_v31  ;;  %1028 = vst.msk [vmem:[%s1576_s7 + $0x10] sm:$0xf] %vm1023_vm3, %v1250_v33  ;;  %v1269_v56 = vpack.c.bf16 %v886_v34, %v886_v34  ;;  %v1251_v58 = vpack.c.bf16 %v868_v35, %v868_v35  ;;  %v711_v59 = vadd.f32 %v1583_v37, %v373_v19 }
 0x104   : > { %v693_v60 = vadd.f32 %v1585_v38, %v355_v20  ;;  %1044 = vst.msk [vmem:[%s1576_s7 + $0x50] sm:$0xf] %vm1023_vm3, %v1266_v42  ;;  %1031 = vst.msk [vmem:[%s1576_s7 + $0x1c] sm:$0xf] %vm1023_vm3, %v1253_v43  ;;  %v1267_v1 = vpack.c.bf16 %v884_v46, %v884_v46  ;;  %v709_v2 = vadd.f32 %v1587_v44, %v371_v21  ;;  %v376_v38 = vld [vmem:[#allocation2 + $0xe8] sm:$0xff] }
 0x105   : > { %728 = vst.msk [vmem:[#allocation2 + $0x50] sm:$0xff] %vm282_vm1, %v695_v48  ;;  %v696_v3 = vadd.f32 %v1589_v45, %v358_v27  ;;  %v712_v37 = vadd.f32 %v1594_v53, %v374_v28  ;;  %744 = vst.msk [vmem:[#allocation2 + $0xd0] sm:$0xff] %vm282_vm1, %v711_v59  ;;  %v694_v5 = vadd.f32 %v1596_v54, %v356_v36 }
 0x106   : > { %1047 = vst.msk [vmem:[%s1576_s7 + $0x5c] sm:$0xf] %vm1023_vm3, %v1269_v56  ;;  %1029 = vst.msk [vmem:[%s1576_s7 + $0x14] sm:$0xf] %vm1023_vm3, %v1251_v58  ;;  %v710_v6 = vadd.f32 %v1604_v62, %v372_v39  ;;  %v699_v7 = vadd.f32 %v1314_v22, %v361_v49  ;;  %v715_v44 = vadd.f32 %v1330_v29, %v377_v50 }
 0x107   : > { %726 = vst.msk [vmem:[#allocation2 + $0x40] sm:$0xff] %vm282_vm1, %v693_v60  ;;  %742 = vst.msk [vmem:[#allocation2 + $0xc0] sm:$0xff] %vm282_vm1, %v709_v2  ;;  %v697_v45 = vadd.f32 %v606_v30, %v359_v51  ;;  %v713_v53 = vadd.f32 %v670_v40, %v375_v32  ;;  %v700_v8 = vadd.f32 %v1315_v41, %v362_v61 }
 0x108   : > { %1045 = vst.msk [vmem:[%s1576_s7 + $0x54] sm:$0xf] %vm1023_vm3, %v1267_v1  ;;  %v716_v9 = vadd.f32 %v1331_v52, %v378_v63  ;;  %v698_v54 = vadd.f32 %v609_v55, %v360_v4  ;;  %v714_v62 = vadd.f32 %v673_v0, %v376_v38 }
 0x109   : > { %729 = vst.msk [vmem:[#allocation2 + $0x58] sm:$0xff] %vm282_vm1, %v696_v3  ;;  %745 = vst.msk [vmem:[#allocation2 + $0xd8] sm:$0xff] %vm282_vm1, %v712_v37 }
 0x10a   : > { %727 = vst.msk [vmem:[#allocation2 + $0x48] sm:$0xff] %vm282_vm1, %v694_v5  ;;  %743 = vst.msk [vmem:[#allocation2 + $0xc8] sm:$0xff] %vm282_vm1, %v710_v6 }
 0x10b   : > { %732 = vst.msk [vmem:[#allocation2 + $0x70] sm:$0xff] %vm282_vm1, %v699_v7  ;;  %748 = vst.msk [vmem:[#allocation2 + $0xf0] sm:$0xff] %vm282_vm1, %v715_v44 }
 0x10c   : > { %730 = vst.msk [vmem:[#allocation2 + $0x60] sm:$0xff] %vm282_vm1, %v697_v45  ;;  %746 = vst.msk [vmem:[#allocation2 + $0xe0] sm:$0xff] %vm282_vm1, %v713_v53  ;;  %v763_v10 = vld [vmem:[#allocation2 + $0x50] sm:$0xff] }
 0x10d   : > { %733 = vst.msk [vmem:[#allocation2 + $0x78] sm:$0xff] %vm282_vm1, %v700_v8  ;;  %749 = vst.msk [vmem:[#allocation2 + $0xf8] sm:$0xff] %vm282_vm1, %v716_v9  ;;  %v802_v11 = vmul.f32 %v1543_v47, %v763_v10  ;;  %v779_v12 = vld [vmem:[#allocation2 + $0xd0] sm:$0xff] }
 0x10e   : > { %731 = vst.msk [vmem:[#allocation2 + $0x68] sm:$0xff] %vm282_vm1, %v698_v54  ;;  %747 = vst.msk [vmem:[#allocation2 + $0xe8] sm:$0xff] %vm282_vm1, %v714_v62  ;;  %v761_v13 = vld [vmem:[#allocation2 + $0x40] sm:$0xff]  ;;  %v818_v14 = vmul.f32 %v1543_v47, %v779_v12 }
 0x10f   : > { %v800_v15 = vmul.f32 %v1543_v47, %v761_v13  ;;  %v777_v16 = vld [vmem:[#allocation2 + $0xc0] sm:$0xff]  ;;  %v841_v19 = vadd.f32 %v1548_v57, %v802_v11 }
 0x110   : > { %v764_v17 = vld [vmem:[#allocation2 + $0x58] sm:$0xff]  ;;  %v816_v20 = vmul.f32 %v1543_v47, %v777_v16  ;;  %v857_v25 = vadd.f32 %v1548_v57, %v818_v14 }
 0x111   : > { %v780_v18 = vld [vmem:[#allocation2 + $0xd8] sm:$0xff]  ;;  %v803_v21 = vmul.f32 %v1543_v47, %v764_v17  ;;  %v762_v23 = vld [vmem:[#allocation2 + $0x48] sm:$0xff]  ;;  %v839_v26 = vadd.f32 %v1548_v57, %v800_v15  ;;  %v873_v29 = vmax.f32 %v841_v19, 0.0 }
 0x112   : > { %v819_v22 = vmul.f32 %v1543_v47, %v780_v18  ;;  %v778_v24 = vld [vmem:[#allocation2 + $0xc8] sm:$0xff]  ;;  %v801_v27 = vmul.f32 %v1543_v47, %v762_v23  ;;  %v855_v30 = vadd.f32 %v1548_v57, %v816_v20  ;;  %v889_v34 = vmax.f32 %v857_v25, 0.0  ;;  %v767_v40 = vld [vmem:[#allocation2 + $0x70] sm:$0xff] }
 0x113   : > { %v817_v28 = vmul.f32 %v1543_v47, %v778_v24  ;;  %v842_v31 = vadd.f32 %v1548_v57, %v803_v21  ;;  %v871_v35 = vmax.f32 %v839_v26, 0.0  ;;  %v1256_v41 = vpack.c.bf16 %v873_v29, %v873_v29  ;;  %v783_v48 = vld [vmem:[#allocation2 + $0xf0] sm:$0xff]  ;;  %v765_v49 = vld [vmem:[#allocation2 + $0x60] sm:$0xff] }
 0x114   : > { %v858_v33 = vadd.f32 %v1548_v57, %v819_v22  ;;  %v840_v36 = vadd.f32 %v1548_v57, %v801_v27  ;;  %v887_v42 = vmax.f32 %v855_v30, 0.0  ;;  %v1272_v50 = vpack.c.bf16 %v889_v34, %v889_v34  ;;  %v781_v56 = vld [vmem:[#allocation2 + $0xe0] sm:$0xff]  ;;  %v768_v58 = vld [vmem:[#allocation2 + $0x78] sm:$0xff] }
 0x115   : > { %v856_v39 = vadd.f32 %v1548_v57, %v817_v28  ;;  %v874_v43 = vmax.f32 %v842_v31, 0.0  ;;  %v1254_v51 = vpack.c.bf16 %v871_v35, %v871_v35  ;;  %v784_v59 = vld [vmem:[#allocation2 + $0xf8] sm:$0xff]  ;;  %1034 = vst.msk [vmem:[%s1576_s7 + $0x28] sm:$0xf] %vm1023_vm3, %v1256_v41  ;;  %v806_v63 = vmul.f32 %v1543_v47, %v767_v40  ;;  %v766_v0 = vld [vmem:[#allocation2 + $0x68] sm:$0xff] }
 0x116   : > { %v890_v46 = vmax.f32 %v858_v33, 0.0  ;;  %v872_v52 = vmax.f32 %v840_v36, 0.0  ;;  %v1270_v60 = vpack.c.bf16 %v887_v42, %v887_v42  ;;  %v782_v1 = vld [vmem:[#allocation2 + $0xe8] sm:$0xff]  ;;  %1050 = vst.msk [vmem:[%s1576_s7 + $0x68] sm:$0xf] %vm1023_vm3, %v1272_v50  ;;  %v822_v37 = vmul.f32 %v1543_v47, %v783_v48 }
 0x117   : > { %v888_v55 = vmax.f32 %v856_v39, 0.0  ;;  %v1257_v32 = vpack.c.bf16 %v874_v43, %v874_v43  ;;  %1032 = vst.msk [vmem:[%s1576_s7 + $0x20] sm:$0xf] %vm1023_vm3, %v1254_v51  ;;  %v804_v4 = vmul.f32 %v1543_v47, %v765_v49  ;;  %v845_v38 = vadd.f32 %v1548_v57, %v806_v63 }
 0x118   : > { %v1273_v61 = vpack.c.bf16 %v890_v46, %v890_v46  ;;  %v1255_v2 = vpack.c.bf16 %v872_v52, %v872_v52  ;;  %1048 = vst.msk [vmem:[%s1576_s7 + $0x60] sm:$0xf] %vm1023_vm3, %v1270_v60  ;;  %v820_v5 = vmul.f32 %v1543_v47, %v781_v56  ;;  %v807_v6 = vmul.f32 %v1543_v47, %v768_v58 }
 0x119   : > { %v1271_v3 = vpack.c.bf16 %v888_v55, %v888_v55  ;;  %1035 = vst.msk [vmem:[%s1576_s7 + $0x2c] sm:$0xf] %vm1023_vm3, %v1257_v32  ;;  %v823_v7 = vmul.f32 %v1543_v47, %v784_v59  ;;  %v861_v44 = vadd.f32 %v1548_v57, %v822_v37  ;;  %v843_v45 = vadd.f32 %v1548_v57, %v804_v4 }
 0x11a   : > { %1051 = vst.msk [vmem:[%s1576_s7 + $0x6c] sm:$0xf] %vm1023_vm3, %v1273_v61  ;;  %1033 = vst.msk [vmem:[%s1576_s7 + $0x24] sm:$0xf] %vm1023_vm3, %v1255_v2  ;;  %v805_v53 = vmul.f32 %v1543_v47, %v766_v0  ;;  %v821_v8 = vmul.f32 %v1543_v47, %v782_v1  ;;  %v877_v9 = vmax.f32 %v845_v38, 0.0  ;;  %v859_v54 = vadd.f32 %v1548_v57, %v820_v5 }
 0x11b   : > { %1049 = vst.msk [vmem:[%s1576_s7 + $0x64] sm:$0xf] %vm1023_vm3, %v1271_v3  ;;  %v846_v62 = vadd.f32 %v1548_v57, %v807_v6  ;;  %v862_v10 = vadd.f32 %v1548_v57, %v823_v7  ;;  %v893_v11 = vmax.f32 %v861_v44, 0.0  ;;  %v875_v12 = vmax.f32 %v843_v45, 0.0 }
 0x11c   : > { %v844_v13 = vadd.f32 %v1548_v57, %v805_v53  ;;  %v860_v14 = vadd.f32 %v1548_v57, %v821_v8  ;;  %v1260_v15 = vpack.c.bf16 %v877_v9, %v877_v9  ;;  %v891_v16 = vmax.f32 %v859_v54, 0.0 }
 0x11d   : > { %v878_v47 = vmax.f32 %v846_v62, 0.0  ;;  %v894_v17 = vmax.f32 %v862_v10, 0.0  ;;  %v1276_v18 = vpack.c.bf16 %v893_v11, %v893_v11  ;;  %v1258_v19 = vpack.c.bf16 %v875_v12, %v875_v12 }
 0x11e   : > { %v876_v20 = vmax.f32 %v844_v13, 0.0  ;;  %v892_v21 = vmax.f32 %v860_v14, 0.0  ;;  %1038 = vst.msk [vmem:[%s1576_s7 + $0x38] sm:$0xf] %vm1023_vm3, %v1260_v15  ;;  %v1274_v22 = vpack.c.bf16 %v891_v16, %v891_v16 }
 0x11f   : > { %v1261_v23 = vpack.c.bf16 %v878_v47, %v878_v47  ;;  %v1277_v24 = vpack.c.bf16 %v894_v17, %v894_v17  ;;  %1054 = vst.msk [vmem:[%s1576_s7 + $0x78] sm:$0xf] %vm1023_vm3, %v1276_v18  ;;  %1036 = vst.msk [vmem:[%s1576_s7 + $0x30] sm:$0xf] %vm1023_vm3, %v1258_v19 }
 0x120   : > { %v1259_v57 = vpack.c.bf16 %v876_v20, %v876_v20  ;;  %v1275_v25 = vpack.c.bf16 %v892_v21, %v892_v21  ;;  %1052 = vst.msk [vmem:[%s1576_s7 + $0x70] sm:$0xf] %vm1023_vm3, %v1274_v22 }
 0x121   : > { %1039 = vst.msk [vmem:[%s1576_s7 + $0x3c] sm:$0xf] %vm1023_vm3, %v1261_v23  ;;  %1055 = vst.msk [vmem:[%s1576_s7 + $0x7c] sm:$0xf] %vm1023_vm3, %v1277_v24 }
 0x122   : > { %1037 = vst.msk [vmem:[%s1576_s7 + $0x34] sm:$0xf] %vm1023_vm3, %v1259_v57  ;;  %1053 = vst.msk [vmem:[%s1576_s7 + $0x74] sm:$0xf] %vm1023_vm3, %v1275_v25 }
 0x123 PF: > { %s14_s17 = sadd.s32 1, %s1403_s17   ;;  %s1747_s15 = smov %s1399_s16 }
 0x124   : > { %p11_p5 = scmp.ge.s32.totalorder %s14_s17, 4   ;;  %s1748_s16 = smov %s1750_s18 }
 0x126   :  { %13 = sbr.rel (!%p11_p5) target bundleno = 2 (0x2), region = 77 }

// kernel: block_forward.6
= control target key start
LH: loop header
LB: loop body
LE: loop exit
PB: predicated region body
PF: predicated region fallthrough
CT: control target
= control target key end

     0   :  { %s726_s15 = smov 0   ;;  %s728_s16 = smov 0   ;;  %s802_s0 = inlined_call_operand.vmem [shape: bf16[2,64,24], index: 0, kind: input, shape index: {}]   ;;  %s803_s1 = inlined_call_operand.vmem [shape: bf16[24,32], index: 1, kind: input, shape index: {}]   ;;  %s804_s2 = inlined_call_operand.vmem [shape: f32[1,32], index: 2, kind: input, shape index: {}]   ;;  %s805_s3 = inlined_call_operand.vmem [shape: f32[1,32], index: 3, kind: input, shape index: {}]   ;;  %s806_s4 = inlined_call_operand.vmem [shape: f32[2,64,32], index: 4, kind: output, shape index: {}]  }
   0x1   :  { %s730_s17 = smov 0  }
   0x2 LB: > { %s33_s18 = sadd.s32 1, %s694_s16  ;;  %p600_p0 = scmp.ge.s32.totalorder %s698_s17, 1  ;;  %s698_s17 = sphi %s730_s17, %s14_s17   ;;  %s694_s16 = sphi %s728_s16, %s808_s16   ;;  %s690_s15 = sphi %s726_s15, %s807_s15  }
   0x3   : > { %p35_p1 = scmp.ge.s32.totalorder %s33_s18, 2  ;;  %p206_p2 = scmp.lt.s32.totalorder %s698_s17, 3 }
   0x5   : > { %s810_s18 = smov (%p35_p1, %s33_s18), 0  ;;  %p207_p3 = pnand %p600_p0, %p206_p2 }
   0x6   : > { %v670_v0 = vld [vmem:[%s803_s1] sm:$0xff] (!%p207_p3)   ;;  %v671_v1 = vld [vmem:[%s803_s1 + $0x8] ss:$0 sps:$4 sm:$0xff] (!%p207_p3)   ;;  %vm352_vm0 = vcmask (!%p207_p3), 1043456   ;;  %p249_p4 = scmp.lt.s32.totalorder (!%p207_p3), %s690_s15, 1  ;;  %vm282_vm1 = vcmask (!%p207_p3), 261120  }
   0x7   : > { %210 = sbr.rel (%p207_p3) target bundleno = 250 (0xfa), region = 36  ;;  %627 = vmatprep.subr.bf16.mxu0 (!%p207_p3), %v670_v0  ;;  %639 = vmatprep.subr.bf16.mxu1 (!%p207_p3), %v670_v0  ;;  %v700_v2 = vmov (!%p207_p3), 0.0   ;;  %v354_v3 = vsel (!%p207_p3), %vm352_vm0, %v671_v1, 0  ;;  %vm339_vm2 = vcmask (!%p207_p3), 195584   ;;  %v615_v32 = vld [vmem:[%s804_s2] ss:$0 sm:$0xff] (!%p207_p3) }
   0x8   : > { %628 = vmatpush3.bf16.msra.mxu0 (!%p207_p3), %v670_v0  ;;  %641 = vmatpush3.bf16.msra.mxu1 (!%p207_p3), %v670_v0  ;;  %285 = vst.msk [vmem:[#allocation2 + $0x10] sm:$0xff] (!%p207_p3), %vm282_vm1, %v700_v2  ;;  %283 = vst.msk [vmem:[#allocation2] sm:$0xff] (!%p207_p3), %vm282_vm1, %v700_v2  ;;  %v616_v34 = vld [vmem:[%s805_s3] ss:$0 sm:$0xff] (!%p207_p3) }
   0x9   : > { %284 = vst.msk [vmem:[#allocation2 + $0x8] sm:$0xff] (!%p207_p3), %vm282_vm1, %v700_v2  ;;  %286 = vst.msk [vmem:[#allocation2 + $0x18] sm:$0xff] (!%p207_p3), %vm282_vm1, %v700_v2  ;;  %643 = vmatprep.subr.msk.bf16.mxu0 (!%p207_p3), %vm352_vm0, %v671_v1  ;;  %644 = vmatprep.subr.msk.bf16.mxu1 (!%p207_p3), %vm352_vm0, %v671_v1 }
   0xa   : > { %287 = vst.msk [vmem:[#allocation2 + $0x20] sm:$0xff] (!%p207_p3), %vm282_vm1, %v700_v2  ;;  %288 = vst.msk [vmem:[#allocation2 + $0x28] sm:$0xff] (!%p207_p3), %vm282_vm1, %v700_v2 }
   0xb   : > { %289 = vst.msk [vmem:[#allocation2 + $0x30] sm:$0xff] (!%p207_p3), %vm282_vm1, %v700_v2  ;;  %290 = vst.msk [vmem:[#allocation2 + $0x38] sm:$0xff] (!%p207_p3), %vm282_vm1, %v700_v2 }
   0xc   : > { %630 = vmatpush3.bf16.msra.mxu0 (!%p207_p3), %v354_v3  ;;  %642 = vmatpush3.bf16.msra.mxu1 (!%p207_p3), %v354_v3 }
   0xe   : > { %s812_s15 = smov (!%p249_p4, %s690_s15), 1 }
   0xf   : > { %s619_s23 = sshll.u32 %s812_s15, 5  ;;  %v301_v8 = vld [vmem:[#allocation2 + $0x10] sm:$0xff]  ;;  %v299_v10 = vld [vmem:[#allocation2] sm:$0xff]  ;;  %s620_s29 = sshll.u32 %s812_s15, 6 }
  0x10   : > { %s259_s26 = scalar_lea.vmem %s802_s0, %s619_s23  ;;  %v302_v13 = vld [vmem:[#allocation2 + $0x18] sm:$0xff]  ;;  %v300_v18 = vld [vmem:[#allocation2 + $0x8] sm:$0xff]  ;;  %s275_s8 = scalar_lea.vmem %s806_s4, %s620_s29 }
  0x11   : > { %v672_v4 = vld [vmem:[%s259_s26] sm:$0xff]   ;;  %v673_v5 = vld [vmem:[%s259_s26 + $0x10] sm:$0xff]   ;;  %v674_v6 = vld [vmem:[%s259_s26 + $0x8] sm:$0xff]  }
  0x12   : > { %631 = vmatprep.mubr.msk.bf16.mxu0 %vm339_vm2, %v672_v4  ;;  %635 = vmatprep.mubr.msk.bf16.mxu1 %vm339_vm2, %v673_v5  ;;  %v675_v7 = vld [vmem:[%s259_s26 + $0x18] sm:$0xff]   ;;  %v305_v9 = vld [vmem:[#allocation2 + $0x30] sm:$0xff]  ;;  %v303_v12 = vld [vmem:[#allocation2 + $0x20] sm:$0xff] }
  0x13   : > { %632 = vmatmul.mubr.msk.bf16.vlgmr.msra.gmra.mrb[0].mxu0 %vm339_vm2, %v674_v6  ;;  %636 = vmatmul.mubr.msk.bf16.vlgmr.msra.gmra.mrb[0].mxu1 %vm339_vm2, %v675_v7  ;;  %v306_v17 = vld [vmem:[#allocation2 + $0x38] sm:$0xff]  ;;  %v304_v23 = vld [vmem:[#allocation2 + $0x28] sm:$0xff] }
  0xe6   : > { %v633_v11 = vpop.f32.mrb[0].mxu0  ;;  %v637_v15 = vpop.f32.mrb[0].mxu1 }
  0xe7   : > { %v423_v14 = vadd.f32 %v633_v11, %v301_v8  ;;  %v390_v16 = vpop.f32.mrb[1].mxu0  ;;  %v427_v19 = vadd.f32 %v637_v15, %v305_v9  ;;  %v406_v21 = vpop.f32.mrb[1].mxu1 }
  0xe8   : > { %v421_v20 = vadd.f32 %v390_v16, %v299_v10  ;;  %v634_v22 = vpop.f32.mrb[2].mxu0  ;;  %v425_v24 = vadd.f32 %v406_v21, %v303_v12  ;;  %v638_v26 = vpop.f32.mrb[2].mxu1 }
  0xe9   : > { %432 = vst.msk [vmem:[#allocation2 + $0x10] sm:$0xff] %vm282_vm1, %v423_v14  ;;  %v424_v25 = vadd.f32 %v634_v22, %v302_v13  ;;  %v393_v27 = vpop.f32.mrb[3].mxu0  ;;  %436 = vst.msk [vmem:[#allocation2 + $0x30] sm:$0xff] %vm282_vm1, %v427_v19  ;;  %v428_v28 = vadd.f32 %v638_v26, %v306_v17  ;;  %v409_v30 = vpop.f32.mrb[3].mxu1 }
  0xea   : > { %430 = vst.msk [vmem:[#allocation2] sm:$0xff] %vm282_vm1, %v421_v20  ;;  %v422_v29 = vadd.f32 %v393_v27, %v300_v18  ;;  %434 = vst.msk [vmem:[#allocation2 + $0x20] sm:$0xff] %vm282_vm1, %v425_v24  ;;  %v426_v31 = vadd.f32 %v409_v30, %v304_v23 }
  0xeb   : > { %433 = vst.msk [vmem:[#allocation2 + $0x18] sm:$0xff] %vm282_vm1, %v424_v25  ;;  %437 = vst.msk [vmem:[#allocation2 + $0x38] sm:$0xff] %vm282_vm1, %v428_v28 }
  0xec   : > { %431 = vst.msk [vmem:[#allocation2 + $0x8] sm:$0xff] %vm282_vm1, %v422_v29  ;;  %435 = vst.msk [vmem:[#allocation2 + $0x28] sm:$0xff] %vm282_vm1, %v426_v31 }
  0xf0   : > { %v443_v33 = vld [vmem:[#allocation2 + $0x10] sm:$0xff] }
  0xf1   : > { %v458_v35 = vmul.f32 %v615_v32, %v443_v33  ;;  %v447_v36 = vld [vmem:[#allocation2 + $0x30] sm:$0xff]  ;;  %v441_v37 = vld [vmem:[#allocation2] sm:$0xff] }
  0xf2   : > { %v462_v38 = vmul.f32 %v615_v32, %v447_v36  ;;  %v456_v39 = vmul.f32 %v615_v32, %v441_v37  ;;  %v445_v40 = vld [vmem:[#allocation2 + $0x20] sm:$0xff]  ;;  %v444_v41 = vld [vmem:[#allocation2 + $0x18] sm:$0xff] }
  0xf3   : > { %v473_v42 = vadd.f32 %v616_v34, %v458_v35  ;;  %v460_v43 = vmul.f32 %v615_v32, %v445_v40  ;;  %v459_v44 = vmul.f32 %v615_v32, %v444_v41  ;;  %v448_v45 = vld [vmem:[#allocation2 + $0x38] sm:$0xff]  ;;  %v442_v46 = vld [vmem:[#allocation2 + $0x8] sm:$0xff] }
  0xf4   : > { %v477_v47 = vadd.f32 %v616_v34, %v462_v38  ;;  %v471_v48 = vadd.f32 %v616_v34, %v456_v39  ;;  %v463_v49 = vmul.f32 %v615_v32, %v448_v45  ;;  %v457_v50 = vmul.f32 %v615_v32, %v442_v46  ;;  %v446_v51 = vld [vmem:[#allocation2 + $0x28] sm:$0xff] }
  0xf5   : > { %481 = vst.msk [vmem:[%s275_s8 + $0x10] sm:$0xff] %vm282_vm1, %v473_v42  ;;  %v475_v52 = vadd.f32 %v616_v34, %v460_v43  ;;  %v474_v53 = vadd.f32 %v616_v34, %v459_v44  ;;  %v461_v54 = vmul.f32 %v615_v32, %v446_v51 }
  0xf6   : > { %485 = vst.msk [vmem:[%s275_s8 + $0x30] sm:$0xff] %vm282_vm1, %v477_v47  ;;  %479 = vst.msk [vmem:[%s275_s8] sm:$0xff] %vm282_vm1, %v471_v48  ;;  %v478_v55 = vadd.f32 %v616_v34, %v463_v49  ;;  %v472_v56 = vadd.f32 %v616_v34, %v457_v50 }
  0xf7   : > { %483 = vst.msk [vmem:[%s275_s8 + $0x20] sm:$0xff] %vm282_vm1, %v475_v52  ;;  %482 = vst.msk [vmem:[%s275_s8 + $0x18] sm:$0xff] %vm282_vm1, %v474_v53  ;;  %v476_v57 = vadd.f32 %v616_v34, %v461_v54 }
  0xf8   : > { %486 = vst.msk [vmem:[%s275_s8 + $0x38] sm:$0xff] %vm282_vm1, %v478_v55  ;;  %480 = vst.msk [vmem:[%s275_s8 + $0x8] sm:$0xff] %vm282_vm1, %v472_v56 }
  0xf9   : > { %484 = vst.msk [vmem:[%s275_s8 + $0x28] sm:$0xff] %vm282_vm1, %v476_v57 }
  0xfa PF: > { %s14_s17 = sadd.s32 1, %s698_s17   ;;  %s807_s15 = smov %s694_s16 }
  0xfb   : > { %p11_p5 = scmp.ge.s32.totalorder %s14_s17, 4   ;;  %s808_s16 = smov %s810_s18 }
  0xfd   :  { %13 = sbr.rel (!%p11_p5) target bundleno = 2 (0x2), region = 77 }

// kernel: block_forward.5
= control target key start
LH: loop header
LB: loop body
LE: loop exit
PB: predicated region body
PF: predicated region fallthrough
CT: control target
= control target key end

     0   :  { %s3171_s30 = smov 0   ;;  %s3173_s10 = smov 0   ;;  %s3591_s0 = inlined_call_operand.vmem [shape: bf16[4,2,9,9,32], index: 0, kind: input, shape index: {}]   ;;  %s3592_s1 = inlined_call_operand.vmem [shape: bf16[9,32,32], index: 1, kind: input, shape index: {}]   ;;  %s3593_s2 = inlined_call_operand.vmem [shape: f32[1,32], index: 2, kind: input, shape index: {}]   ;;  %s3594_s3 = inlined_call_operand.vmem [shape: f32[1,32], index: 3, kind: input, shape index: {}]   ;;  %s3595_s4 = inlined_call_operand.vmem [shape: bf16[32,6], index: 4, kind: input, shape index: {}]   ;;  %s3596_s5 = inlined_call_operand.vmem [shape: f32[1,6], index: 5, kind: input, shape index: {}]   ;;  %s3597_s6 = inlined_call_operand.vmem [shape: bf16[6,32], index: 6, kind: input, shape index: {}]   ;;  %s3598_s7 = inlined_call_operand.vmem [shape: f32[1,32], index: 7, kind: input, shape index: {}]   ;;  %s3599_s8 = inlined_call_operand.vmem [shape: bf16[2,64,32], index: 8, kind: output, shape index: {0}]   ;;  %s3600_s9 = inlined_call_operand.vmem [shape: f32[2,1,32], index: 9, kind: output, shape index: {1}]  }
   0x1   :  { %s3175_s11 = smov 0  }
   0x2 LB: > { %s2527_s12 = sadd.s32 4294967295, %s3116_s11   ;;  %s3188_s13 = sadd.s32 1, %s3116_s11   ;;  %s3116_s11 = sphi %s3175_s11, %s3605_s11   ;;  %s3112_s10 = sphi %s3173_s10, %s3604_s10   ;;  %s3108_s30 = sphi %s3171_s30, %s3603_s30  }
   0x3   : > { %s24_s14 = ssub.s32 %s3116_s11, %s3188_s13  ;;  %s27_s15 = sadd.s32 1, %s3112_s10 }
   0x4   : > { %p25_p0 = scmp.eq.s32.totalorder %s24_s14, 0  ;;  %p34_p1 = scmp.ne.s32.totalorder %s3112_s10, %s3108_s30 }
   0x5   : > { %p35_p2 = scmp.eq.s32.totalorder %s3116_s11, 0  ;;  %p2530_p4 = scmp.ge.s32.totalorder %s3116_s11, 2 }
   0x6   : > { %s3197_s16 = scalar_select %p25_p0, %s3112_s10, %s27_s15  }
   0x7   : > { %p36_p3 = por %p35_p2, %p34_p1  ;;  %280 = sbr.rel (%p2530_p4) target bundleno = 37 (0x25), region = 44 }
   0xe   : > { %283 = sbr.rel (!%p36_p3) target bundleno = 37 (0x25), region = 48  ;;  %s285_s17 = sand.u32 (%p36_p3), 1, %s3112_s10  }
   0xf   : > { %s3019_s18 = smul.u32 (%p36_p3), 72, %s3116_s11 }
  0x10   : > { %s3018_s19 = smul.u32 (%p36_p3), 288, %s285_s17 }
  0x11   : > { %s3205_s22 = scalar_lea.vmem (%p36_p3), %s3591_s0, %s3019_s18 }
  0x12   : > { %v306_v0 = vld [vmem:[%s3205_s22] sm:$0xff] (%p36_p3)   ;;  %v310_v1 = vld [vmem:[%s3205_s22 + $0x8] sm:$0xff] (%p36_p3)   ;;  %v314_v2 = vld [vmem:[%s3205_s22 + $0x10] sm:$0xff] (%p36_p3)   ;;  %s3210_s23 = scalar_lea.vmem (%p36_p3), [#allocation2], %s3018_s19 }
  0x13   : > { %307 = vst [vmem:[%s3210_s23] sm:$0xff] (%p36_p3), %v306_v0   ;;  %311 = vst [vmem:[%s3210_s23 + $0x8] sm:$0xff] (%p36_p3), %v310_v1   ;;  %v318_v3 = vld [vmem:[%s3205_s22 + $0x18] sm:$0xff] (%p36_p3)   ;;  %v322_v4 = vld [vmem:[%s3205_s22 + $0x20] sm:$0xff] (%p36_p3)  }
  0x14   : > { %315 = vst [vmem:[%s3210_s23 + $0x10] sm:$0xff] (%p36_p3), %v314_v2   ;;  %v326_v5 = vld [vmem:[%s3205_s22 + $0x28] sm:$0xff] (%p36_p3)   ;;  %319 = vst [vmem:[%s3210_s23 + $0x18] sm:$0xff] (%p36_p3), %v318_v3   ;;  %v330_v6 = vld [vmem:[%s3205_s22 + $0x30] sm:$0xff] (%p36_p3)  }
  0x15   : > { %323 = vst [vmem:[%s3210_s23 + $0x20] sm:$0xff] %v322_v4   ;;  %327 = vst [vmem:[%s3210_s23 + $0x28] sm:$0xff] %v326_v5   ;;  %v334_v7 = vld [vmem:[%s3205_s22 + $0x38] sm:$0xff]   ;;  %v338_v8 = vld [vmem:[%s3205_s22 + $0x40] sm:$0xff]  }
  0x16   : > { %331 = vst [vmem:[%s3210_s23 + $0x30] sm:$0xff] %v330_v6   ;;  %335 = vst [vmem:[%s3210_s23 + $0x38] sm:$0xff] %v334_v7   ;;  %v342_v9 = vld [vmem:[%s3205_s22 + $0x90] sm:$0xff]   ;;  %v346_v10 = vld [vmem:[%s3205_s22 + $0x98] sm:$0xff]  }
  0x17   : > { %339 = vst [vmem:[%s3210_s23 + $0x40] sm:$0xff] %v338_v8   ;;  %v350_v11 = vld [vmem:[%s3205_s22 + $0xa0] sm:$0xff]   ;;  %343 = vst [vmem:[%s3210_s23 + $0x48] sm:$0xff] %v342_v9   ;;  %v354_v12 = vld [vmem:[%s3205_s22 + $0xa8] sm:$0xff]  }
  0x18   : > { %347 = vst [vmem:[%s3210_s23 + $0x50] sm:$0xff] %v346_v10   ;;  %351 = vst [vmem:[%s3210_s23 + $0x58] sm:$0xff] %v350_v11   ;;  %v358_v13 = vld [vmem:[%s3205_s22 + $0xb0] sm:$0xff]   ;;  %v362_v14 = vld [vmem:[%s3205_s22 + $0xb8] sm:$0xff]  }
  0x19   : > { %355 = vst [vmem:[%s3210_s23 + $0x60] sm:$0xff] %v354_v12   ;;  %359 = vst [vmem:[%s3210_s23 + $0x68] sm:$0xff] %v358_v13   ;;  %v366_v15 = vld [vmem:[%s3205_s22 + $0xc0] sm:$0xff]   ;;  %v370_v16 = vld [vmem:[%s3205_s22 + $0xc8] sm:$0xff]  }
  0x1a   : > { %363 = vst [vmem:[%s3210_s23 + $0x70] sm:$0xff] %v362_v14   ;;  %v374_v17 = vld [vmem:[%s3205_s22 + $0xd0] sm:$0xff]   ;;  %367 = vst [vmem:[%s3210_s23 + $0x78] sm:$0xff] %v366_v15   ;;  %v378_v18 = vld [vmem:[%s3205_s22 + $0x120] sm:$0xff]  }
  0x1b   : > { %371 = vst [vmem:[%s3210_s23 + $0x80] sm:$0xff] %v370_v16   ;;  %375 = vst [vmem:[%s3210_s23 + $0x88] sm:$0xff] %v374_v17   ;;  %v382_v19 = vld [vmem:[%s3205_s22 + $0x128] sm:$0xff]   ;;  %v386_v20 = vld [vmem:[%s3205_s22 + $0x130] sm:$0xff]  }
  0x1c   : > { %379 = vst [vmem:[%s3210_s23 + $0x90] sm:$0xff] %v378_v18   ;;  %383 = vst [vmem:[%s3210_s23 + $0x98] sm:$0xff] %v382_v19   ;;  %v390_v21 = vld [vmem:[%s3205_s22 + $0x138] sm:$0xff]   ;;  %v394_v22 = vld [vmem:[%s3205_s22 + $0x140] sm:$0xff]  }
  0x1d   : > { %387 = vst [vmem:[%s3210_s23 + $0xa0] sm:$0xff] %v386_v20   ;;  %v398_v23 = vld [vmem:[%s3205_s22 + $0x148] sm:$0xff]   ;;  %391 = vst [vmem:[%s3210_s23 + $0xa8] sm:$0xff] %v390_v21   ;;  %v402_v24 = vld [vmem:[%s3205_s22 + $0x150] sm:$0xff]  }
  0x1e   : > { %395 = vst [vmem:[%s3210_s23 + $0xb0] sm:$0xff] %v394_v22   ;;  %399 = vst [vmem:[%s3210_s23 + $0xb8] sm:$0xff] %v398_v23   ;;  %v406_v25 = vld [vmem:[%s3205_s22 + $0x158] sm:$0xff]   ;;  %v410_v26 = vld [vmem:[%s3205_s22 + $0x160] sm:$0xff]  }
  0x1f   : > { %403 = vst [vmem:[%s3210_s23 + $0xc0] sm:$0xff] %v402_v24   ;;  %407 = vst [vmem:[%s3210_s23 + $0xc8] sm:$0xff] %v406_v25   ;;  %v414_v27 = vld [vmem:[%s3205_s22 + $0x1b0] sm:$0xff]   ;;  %v418_v28 = vld [vmem:[%s3205_s22 + $0x1b8] sm:$0xff]  }
  0x20   : > { %411 = vst [vmem:[%s3210_s23 + $0xd0] sm:$0xff] %v410_v26   ;;  %v422_v29 = vld [vmem:[%s3205_s22 + $0x1c0] sm:$0xff]   ;;  %415 = vst [vmem:[%s3210_s23 + $0xd8] sm:$0xff] %v414_v27   ;;  %v426_v30 = vld [vmem:[%s3205_s22 + $0x1c8] sm:$0xff]  }
  0x21   : > { %419 = vst [vmem:[%s3210_s23 + $0xe0] sm:$0xff] %v418_v28   ;;  %423 = vst [vmem:[%s3210_s23 + $0xe8] sm:$0xff] %v422_v29   ;;  %v430_v31 = vld [vmem:[%s3205_s22 + $0x1d0] sm:$0xff]   ;;  %v434_v32 = vld [vmem:[%s3205_s22 + $0x1d8] sm:$0xff]  }
  0x22   : > { %427 = vst [vmem:[%s3210_s23 + $0xf0] sm:$0xff] %v426_v30   ;;  %431 = vst [vmem:[%s3210_s23 + $0xf8] sm:$0xff] %v430_v31   ;;  %v438_v33 = vld [vmem:[%s3205_s22 + $0x1e0] sm:$0xff]   ;;  %v442_v34 = vld [vmem:[%s3205_s22 + $0x1e8] sm:$0xff]  }
  0x23   : > { %435 = vst [vmem:[%s3210_s23 + $0x100] sm:$0xff] %v434_v32   ;;  %v446_v35 = vld [vmem:[%s3205_s22 + $0x1f0] sm:$0xff]   ;;  %439 = vst [vmem:[%s3210_s23 + $0x108] sm:$0xff] %v438_v33  }
  0x24   : > { %443 = vst [vmem:[%s3210_s23 + $0x110] sm:$0xff] %v442_v34   ;;  %447 = vst [vmem:[%s3210_s23 + $0x118] sm:$0xff] %v446_v35  }
  0x25 PF: > { %p2532_p5 = scmp.ge.s32.totalorder %s3116_s11, 1  ;;  %p615_p6 = scmp.lt.s32.totalorder %s3116_s11, 3 }
  0x27   : > { %p616_p7 = pnand %p2532_p5, %p615_p6 }
  0x28   : > { %v3048_v36 = vld [vmem:[%s3592_s1 + $0x10] sm:$0xff] (!%p616_p7)   ;;  %s622_s26 = sand.u32 (!%p616_p7), 1, %s3108_s30   ;;  %v3049_v37 = vld [vmem:[%s3592_s1 + $0x40] sm:$0xff] (!%p616_p7)   ;;  %v3050_v38 = vld [vmem:[%s3592_s1 + $0x18] sm:$0xff] (!%p616_p7)   ;;  %vm727_vm0 = vcmask (!%p616_p7), 261120   ;;  %vm3119_vm4 = vmmov (!%p616_p7), 0  }
  0x29   : > { %619 = sbr.rel (%p616_p7) target bundleno = 826 (0x33a), region = 89  ;;  %2824 = vmatprep.subr.bf16.mxu1 (!%p616_p7), %v3048_v36  ;;  %2872 = vmatprep.subr.bf16.mxu0 (!%p616_p7), %v3049_v37  ;;  %v3051_v39 = vld [vmem:[%s3592_s1 + $0x48] sm:$0xff] (!%p616_p7)   ;;  %v3056_v44 = vld [vmem:[%s3592_s1 + $0x50] sm:$0xff] (!%p616_p7)   ;;  %v3060_v48 = vld [vmem:[%s3592_s1] sm:$0xff] (!%p616_p7)   ;;  %vm930_vm1 = vsmask.f32 (!%p616_p7), 3328 }
  0x2a   : > { %s3020_s29 = smul.u32 (!%p616_p7), 288, %s622_s26  ;;  %2825 = vmatpush3.bf16.msra.mxu1 (!%p616_p7), %v3048_v36  ;;  %2873 = vmatpush3.bf16.msra.mxu0 (!%p616_p7), %v3049_v37  ;;  %v3062_v50 = vld [vmem:[%s3592_s1 + $0x58] sm:$0xff] (!%p616_p7)   ;;  %v3063_v51 = vld [vmem:[%s3592_s1 + $0x8] sm:$0xff] (!%p616_p7)   ;;  %vm931_vm2 = vsmask.f32 (!%p616_p7), 7440  ;;  %v3334_v62 = vld [vmem:[%s3592_s1 + $0x60] sm:$0xff] (!%p616_p7)  }
  0x2b   : > { %2826 = vmatprep.subr.bf16.mxu1 (!%p616_p7), %v3050_v38  ;;  %2874 = vmatprep.subr.bf16.mxu0 (!%p616_p7), %v3051_v39  ;;  %v3069_v2 = vld [vmem:[%s3592_s1 + $0x20] sm:$0xff] (!%p616_p7)   ;;  %vm3342_vm3 = vmor (!%p616_p7), %vm930_vm1, %vm931_vm2  ;;  %v3071_v11 = vld [vmem:[%s3592_s1 + $0x28] sm:$0xff] (!%p616_p7)   ;;  %v3120_v3 = vmov (!%p616_p7), 0.0   ;;  %p660_p8 = scmp.lt.s32.totalorder (!%p616_p7), %s2527_s12, 1  ;;  %vm2237_vm5 = vcmask (!%p616_p7), 257024   ;;  %vm2359_vm6 = vcmask (!%p616_p7), 1045504  }
  0x2c   : > { %s3296_s30 = scalar_lea.vmem (!%p616_p7), [#allocation2], %s3020_s29  ;;  %v3363_v32 = vld [vmem:[%s3592_s1 + $0x30] sm:$0xff] (!%p616_p7)   ;;  %vm2355_vm7 = vcmask (!%p616_p7), 48128   ;;  %vm2439_vm8 = vcmask (!%p616_p7), 253952  }
  0x2d   : > { %v3052_v40 = vld [vmem:[%s3296_s30 + $0x48] ss:$8 sps:$4 sm:$0xff] (!%p616_p7)   ;;  %v3053_v41 = vld [vmem:[%s3296_s30 + $0xd8] ss:$8 sps:$4 sm:$0xff] (!%p616_p7)   ;;  %v2626_v54 = vld [vmem:[%s3296_s30 + $0x94] sm:$0x1] (!%p616_p7) }
  0x2e   : > { %2828 = vmatprep.mubr.msk.bf16.mxu1 (!%p616_p7), %vm727_vm0, %v3052_v40  ;;  %v3054_v42 = vld [vmem:[%s3296_s30 + $0x58] ss:$8 sps:$4 sm:$0xff] (!%p616_p7)   ;;  %2827 = vmatpush3.bf16.msra.mxu1 (!%p616_p7), %v3050_v38  ;;  %v3055_v43 = vld [vmem:[%s3296_s30 + $0xe8] ss:$8 sps:$4 sm:$0xff] (!%p616_p7)   ;;  %v2628_v58 = vld [vmem:[%s3296_s30 + $0x9c] sm:$0x1] (!%p616_p7) }
  0x2f   : > { %2876 = vmatprep.mubr.msk.bf16.mxu0 (!%p616_p7), %vm727_vm0, %v3053_v41  ;;  %2875 = vmatpush3.bf16.msra.mxu0 (!%p616_p7), %v3051_v39  ;;  %v3057_v45 = vld [vmem:[%s3296_s30 + $0x68] ss:$8 sps:$4 sm:$0xff] (!%p616_p7)   ;;  %v3058_v46 = vld [vmem:[%s3296_s30 + $0xf8] ss:$8 sps:$4 sm:$0xff] (!%p616_p7)   ;;  %v1447_v59 = vshll.u32 (!%p616_p7), %v2626_v54, 16  ;;  %v1461_v1 = vshll.u32 (!%p616_p7), %v2628_v58, 16 }
  0x30   : > { %2884 = vmatprep.subr.bf16.mxu0 %v3056_v44  ;;  %v3059_v47 = vld [vmem:[%s3296_s30 + $0x78] ss:$8 sps:$4 sm:$0xff]   ;;  %v3061_v49 = vld [vmem:[%s3296_s30 + $0x108] ss:$8 sps:$4 sm:$0xff]   ;;  %2836 = vmatprep.subr.bf16.mxu1 %v3060_v48  ;;  %v2630_v13 = vld [vmem:[%s3296_s30 + $0xa4] sm:$0x1] }
  0x31   : > { %2829 = vmatmul.mubr.msk.bf16.vlgmr.msra.gmra.mrb[0].mxu1 %vm727_vm0, %v3054_v42  ;;  %v3064_v52 = vld [vmem:[%s3296_s30] ss:$8 sps:$4 sm:$0xff]   ;;  %v2625_v53 = vld [vmem:[%s3296_s30 + $0x90] sm:$0xf]  ;;  %v2627_v55 = vld [vmem:[%s3296_s30 + $0x98] sm:$0xf] }
  0x32   : > { %2877 = vmatmul.mubr.msk.bf16.vlgmr.msra.gmra.mrb[0].mxu0 %vm727_vm0, %v3055_v43  ;;  %2832 = vmatprep.mubr.msk.bf16.mxu1 %vm727_vm0, %v3057_v45  ;;  %v1438_v56 = vshrl.u32 %v2625_v53, 16  ;;  %v1441_v57 = vshll.u32 %v2625_v53, 16  ;;  %v1452_v60 = vshrl.u32 %v2627_v55, 16  ;;  %v1455_v61 = vshll.u32 %v2627_v55, 16  ;;  %v3065_v9 = vld [vmem:[%s3296_s30 + $0x10] ss:$8 sps:$4 sm:$0xff]  }
  0x33   : > { %2885 = vmatpush3.bf16.msra.mxu0 %v3056_v44  ;;  %2880 = vmatprep.mubr.msk.bf16.mxu0 %vm727_vm0, %v3058_v46  ;;  %v1449_v4 = vrot.slane %v1447_v59, 5  ;;  %v1463_v8 = vrot.slane %v1461_v1, 5  ;;  %v2629_v10 = vld [vmem:[%s3296_s30 + $0xa0] sm:$0xf]  ;;  %v2631_v14 = vld [vmem:[%s3296_s30 + $0xa8] sm:$0xf] }
  0x34   : > { %2837 = vmatpush3.bf16.msra.mxu1 %v3060_v48  ;;  %2886 = vmatprep.subr.bf16.mxu0 %v3062_v50  ;;  %v1440_v63 = vrot.slane %v1438_v56, 4  ;;  %v1443_v0 = vrot.slane %v1441_v57, 5  ;;  %v1454_v5 = vrot.slane %v1452_v60, 4  ;;  %v1457_v6 = vrot.slane %v1455_v61, 5  ;;  %v2632_v15 = vld [vmem:[%s3296_s30 + $0xac] sm:$0x1] }
  0x35   : > { %2838 = vmatprep.subr.bf16.mxu1 %v3063_v51  ;;  %v1466_v17 = vshrl.u32 %v2629_v10, 16  ;;  %v1469_v18 = vshll.u32 %v2629_v10, 16  ;;  %v1475_v19 = vshll.u32 %v2630_v13, 16  ;;  %v1480_v21 = vshrl.u32 %v2631_v14, 16  ;;  %v3067_v35 = vld [vmem:[%s3296_s30 + $0x20] ss:$8 sps:$4 sm:$0xff]  }
  0x36   : > { %v1444_v7 = vor.u32 %v1443_v0, %v1440_v63  ;;  %v1458_v12 = vor.u32 %v1457_v6, %v1454_v5  ;;  %v1483_v22 = vshll.u32 %v2631_v14, 16  ;;  %v1489_v23 = vshll.u32 %v2632_v15, 16  ;;  %v2633_v36 = vld [vmem:[%s3296_s30 + $0xb0] sm:$0xf]  ;;  %v2634_v37 = vld [vmem:[%s3296_s30 + $0xb4] sm:$0x1] }
  0x37   : > { %2887 = vmatpush3.bf16.msra.mxu0 %v3062_v50  ;;  %v1468_v25 = vrot.slane %v1466_v17, 4  ;;  %v1471_v26 = vrot.slane %v1469_v18, 5  ;;  %v1477_v27 = vrot.slane %v1475_v19, 5  ;;  %v1482_v29 = vrot.slane %v1480_v21, 4  ;;  %v2635_v39 = vld [vmem:[%s3296_s30 + $0xb8] sm:$0xf] }
  0x38   : > { %2839 = vmatpush3.bf16.msra.mxu1 %v3063_v51  ;;  %2896 = vmatprep.subr.bf16.mxu0 %v3334_v62  ;;  %v1445_v16 = vrot.slane %v1444_v7, 4  ;;  %v1459_v20 = vrot.slane %v1458_v12, 4  ;;  %v1485_v30 = vrot.slane %v1483_v22, 5  ;;  %v1491_v31 = vrot.slane %v1489_v23, 5  ;;  %v2636_v40 = vld [vmem:[%s3296_s30 + $0xbc] sm:$0x1] }
  0x39   : > { %2833 = vmatmul.mubr.msk.bf16.gmra.mrb[4].mxu1 %vm727_vm0, %v3059_v47  ;;  %2848 = vmatprep.subr.bf16.mxu1 %v3069_v2  ;;  %v1472_v34 = vor.u32 %v1471_v26, %v1468_v25  ;;  %v1494_v41 = vshrl.u32 %v2633_v36, 16  ;;  %v1497_v42 = vshll.u32 %v2633_v36, 16  ;;  %v1503_v44 = vshll.u32 %v2634_v37, 16  ;;  %v3068_v54 = vld [vmem:[%s3296_s30 + $0x30] ss:$8 sps:$4 sm:$0xff]   ;;  %v3070_v55 = vld [vmem:[%s3592_s1 + $0x68] sm:$0xff]  }
  0x3a   : > { %2881 = vmatmul.mubr.msk.bf16.gmra.mrb[4].mxu0 %vm727_vm0, %v3061_v49  ;;  %2840 = vmatprep.mubr.msk.bf16.mxu1 %vm727_vm0, %v3064_v52  ;;  %v1450_v24 = vsel %vm3342_vm3, %v1445_v16, %v1449_v4  ;;  %v1464_v28 = vsel %vm3342_vm3, %v1459_v20, %v1463_v8  ;;  %v1486_v38 = vor.u32 %v1485_v30, %v1482_v29  ;;  %v1508_v45 = vshrl.u32 %v2635_v39, 16  ;;  %v2637_v63 = vld [vmem:[%s3296_s30 + $0xc0] sm:$0xf]  ;;  %v2638_v0 = vld [vmem:[%s3296_s30 + $0xc4] sm:$0x1]  ;;  %v3395_v20 = vld [vmem:[%s3592_s1 + $0x70] sm:$0xff]  }
  0x3b   : > { %v2645_v33 = vcombine.low %v1450_v24, %v1464_v28  ;;  %v1473_v43 = vrot.slane %v1472_v34, 4  ;;  %v1511_v46 = vshll.u32 %v2635_v39, 16  ;;  %v1496_v48 = vrot.slane %v1494_v41, 4  ;;  %v2639_v1 = vld [vmem:[%s3296_s30 + $0xc8] sm:$0xf]  ;;  %s3607_s12 = smov (!%p660_p8, %s2527_s12), 1 }
  0x3c   : > { %v1487_v47 = vrot.slane %v1486_v38, 4  ;;  %v1499_v49 = vrot.slane %v1497_v42, 5  ;;  %v1517_v50 = vshll.u32 %v2636_v40, 16  ;;  %v1510_v52 = vrot.slane %v1508_v45, 4  ;;  %v2640_v4 = vld [vmem:[%s3296_s30 + $0xcc] sm:$0x1]  ;;  %s667_s19 = scalar_lea.vmem %s3600_s9, %s3607_s12 }
  0x3d   : > { %2888 = vmatprep.mubr.msk.bf16.mxu0 %vm727_vm0, %v2645_v33  ;;  %v1478_v51 = vsel %vm3342_vm3, %v1473_v43, %v1477_v27  ;;  %v1513_v53 = vrot.slane %v1511_v46, 5  ;;  %v1505_v58 = vrot.slane %v1503_v44, 5  ;;  %v1522_v5 = vshrl.u32 %v2637_v63, 16  ;;  %v914_v22 = vld [vmem:[%s3296_s30] sm:$0xf]  ;;  %s2745_s24 = sshll.u32 %s3607_s12, 5 }
  0x3e   : > { %v1492_v56 = vsel %vm3342_vm3, %v1487_v47, %v1491_v31  ;;  %v1500_v57 = vor.u32 %v1499_v49, %v1496_v48  ;;  %v1519_v59 = vrot.slane %v1517_v50, 5  ;;  %v1525_v6 = vshll.u32 %v2637_v63, 16  ;;  %v915_v23 = vld [vmem:[%s3296_s30 + $0x4] sm:$0x1]  ;;  %v916_v25 = vld [vmem:[%s3296_s30 + $0x8] sm:$0xf]  ;;  %s3539_s26 = scalar_lea.vmem %s3599_s8, %s2745_s24 }
  0x3f   : > { %v2646_v60 = vcombine.low %v1478_v51, %v1492_v56  ;;  %v1514_v61 = vor.u32 %v1513_v53, %v1510_v52  ;;  %v1531_v7 = vshll.u32 %v2638_v0, 16  ;;  %v1539_v10 = vshll.u32 %v2639_v1, 16  ;;  %v917_v26 = vld [vmem:[%s3296_s30 + $0xc] sm:$0x1]  ;;  %v3072_v41 = vld [vmem:[%s3296_s30 + $0x8] ss:$8 sps:$4 sm:$0xff]  }
  0x40   : > { %v1524_v13 = vrot.slane %v1522_v5, 4  ;;  %v1527_v14 = vrot.slane %v1525_v6, 5  ;;  %v934_v27 = vshrl.u32 %v914_v22, 16  ;;  %v937_v28 = vshll.u32 %v914_v22, 16  ;;  %v918_v46 = vld [vmem:[%s3296_s30 + $0x10] sm:$0xf] }
  0x41   : > { %2841 = vmatmul.mubr.msk.bf16.vlgmr.msra.gmra.mrb[0].mxu1 %vm727_vm0, %v3065_v9  ;;  %v1515_v8 = vrot.slane %v1514_v61, 4  ;;  %v1536_v9 = vshrl.u32 %v2639_v1, 16  ;;  %v1533_v15 = vrot.slane %v1531_v7, 5  ;;  %v1541_v18 = vrot.slane %v1539_v10, 5  ;;  %v919_v47 = vld [vmem:[%s3296_s30 + $0x14] sm:$0x1] }
  0x42   : > { %2849 = vmatpush3.bf16.msra.mxu1 %v3069_v2  ;;  %2844 = vmatprep.mubr.msk.bf16.mxu1 %vm727_vm0, %v3067_v35  ;;  %v1501_v2 = vrot.slane %v1500_v57, 4  ;;  %v1528_v21 = vor.u32 %v1527_v14, %v1524_v13  ;;  %v943_v30 = vshll.u32 %v915_v23, 16  ;;  %v948_v31 = vshrl.u32 %v916_v25, 16  ;;  %v920_v50 = vld [vmem:[%s3296_s30 + $0x18] sm:$0xf] }
  0x43   : > { %2850 = vmatprep.subr.bf16.mxu1 %v3071_v11  ;;  %2889 = vmatmul.mubr.msk.bf16.vlgmr.msra.gmra.mrb[0].mxu0 %vm727_vm0, %v2646_v60  ;;  %v1520_v16 = vsel %vm3342_vm3, %v1515_v8, %v1519_v59  ;;  %v1538_v17 = vrot.slane %v1536_v9, 4  ;;  %v951_v33 = vshll.u32 %v916_v25, 16  ;;  %v936_v35 = vrot.slane %v934_v27, 4  ;;  %v921_v51 = vld [vmem:[%s3296_s30 + $0x1c] sm:$0x1] }
  0x44   : > { %2897 = vmatpush3.bf16.msra.mxu0 %v3334_v62  ;;  %v1506_v12 = vsel %vm3342_vm3, %v1501_v2, %v1505_v58  ;;  %v1529_v29 = vrot.slane %v1528_v21, 4  ;;  %v939_v36 = vrot.slane %v937_v28, 5  ;;  %v957_v37 = vshll.u32 %v917_v26, 16  ;;  %v3073_v7 = vld [vmem:[%s3296_s30 + $0x18] ss:$8 sps:$4 sm:$0xff]  }
  0x45   : > { %2898 = vmatprep.subr.bf16.mxu0 %v3070_v55  ;;  %v2647_v62 = vcombine.low %v1506_v12, %v1520_v16  ;;  %v1542_v24 = vor.u32 %v1541_v18, %v1538_v17  ;;  %v950_v39 = vrot.slane %v948_v31, 4  ;;  %v953_v40 = vrot.slane %v951_v33, 5  ;;  %v922_v10 = vld [vmem:[%s3296_s30 + $0x20] sm:$0xf]  ;;  %v924_v12 = vld [vmem:[%s3296_s30 + $0x28] sm:$0xf] }
  0x46   : > { %2851 = vmatpush3.bf16.msra.mxu1 %v3071_v11  ;;  %v1545_v11 = vshll.u32 %v2640_v4, 16  ;;  %v1534_v38 = vsel %vm3342_vm3, %v1529_v29, %v1533_v15  ;;  %v940_v43 = vor.u32 %v939_v36, %v936_v35  ;;  %v945_v44 = vrot.slane %v943_v30, 5  ;;  %v925_v14 = vld [vmem:[%s3296_s30 + $0x2c] sm:$0x1]  ;;  %v3078_v26 = vld [vmem:[%s3592_s1 + $0x78] sm:$0xff]  }
  0x47   : > { %2860 = vmatprep.subr.bf16.mxu1 %v3363_v32  ;;  %2892 = vmatprep.mubr.msk.bf16.mxu0 %vm727_vm0, %v2647_v62  ;;  %v1543_v34 = vrot.slane %v1542_v24, 4  ;;  %v959_v45 = vrot.slane %v957_v37, 5  ;;  %v954_v49 = vor.u32 %v953_v40, %v950_v39  ;;  %v962_v52 = vshrl.u32 %v918_v46, 16  ;;  %v3075_v31 = vld [vmem:[%s3296_s30 + $0x28] ss:$8 sps:$4 sm:$0xff]   ;;  %v3079_v33 = vld [vmem:[%s3592_s1 + $0x38] sm:$0xff]  }
  0x48   : > { %v1547_v19 = vrot.slane %v1545_v11, 5  ;;  %2899 = vmatpush3.bf16.msra.mxu0 %v3070_v55  ;;  %v965_v53 = vshll.u32 %v918_v46, 16  ;;  %v971_v55 = vshll.u32 %v919_v47, 16  ;;  %v976_v56 = vshrl.u32 %v920_v50, 16  ;;  %v923_v11 = vld [vmem:[%s3296_s30 + $0x24] sm:$0x1] }
  0x49   : > { %2845 = vmatmul.mubr.msk.bf16.gmra.mrb[4].mxu1 %vm727_vm0, %v3068_v54  ;;  %2908 = vmatprep.subr.bf16.mxu0 %v3395_v20  ;;  %v941_v54 = vrot.slane %v940_v43, 4  ;;  %v979_v57 = vshll.u32 %v920_v50, 16  ;;  %v955_v58 = vrot.slane %v954_v49, 4  ;;  %v964_v59 = vrot.slane %v962_v52, 4  ;;  %v926_v36 = vld [vmem:[%s3296_s30 + $0x30] sm:$0xf] }
  0x4a   : > { %v1548_v42 = vsel %vm3342_vm3, %v1543_v34, %v1547_v19  ;;  %v967_v60 = vrot.slane %v965_v53, 5  ;;  %v985_v61 = vshll.u32 %v921_v51, 16  ;;  %v978_v0 = vrot.slane %v976_v56, 4  ;;  %v927_v37 = vld [vmem:[%s3296_s30 + $0x34] sm:$0x1] }
  0x4b   : > { %v2648_v48 = vcombine.low %v1534_v38, %v1548_v42  ;;  %v946_v63 = vsel %vm3342_vm3, %v941_v54, %v945_v44  ;;  %v981_v1 = vrot.slane %v979_v57, 5  ;;  %v960_v2 = vsel %vm3342_vm3, %v955_v58, %v959_v45  ;;  %v928_v38 = vld [vmem:[%s3296_s30 + $0x38] sm:$0xf]  ;;  %v929_v40 = vld [vmem:[%s3296_s30 + $0x3c] sm:$0x1]  ;;  %v3084_v44 = vld [vmem:[%s3592_s1 + $0x80] sm:$0xff]  }
  0x4c   : > { %v968_v4 = vor.u32 %v967_v60, %v964_v59  ;;  %v973_v5 = vrot.slane %v971_v55, 5  ;;  %v987_v6 = vrot.slane %v985_v61, 5  ;;  %v2571_v8 = vcombine.low %v946_v63, %v960_v2  ;;  %v3077_v58 = vld [vmem:[%s3296_s30 + $0x38] ss:$8 sps:$4 sm:$0xff]  }
  0x4d   : > { %2893 = vmatmul.mubr.msk.bf16.gmra.mrb[4].mxu0 %vm727_vm0, %v2648_v48  ;;  %v982_v9 = vor.u32 %v981_v1, %v978_v0  ;;  %v990_v15 = vshrl.u32 %v922_v10, 16  ;;  %v993_v16 = vshll.u32 %v922_v10, 16  ;;  %v999_v17 = vshll.u32 %v923_v11, 16  ;;  %v3081_v0 = vld [vmem:[%s3296_s30 + $0x50] ss:$8 sps:$4 sm:$0xff]  }
  0x4e   : > { %2900 = vmatprep.mubr.msk.bf16.mxu0 %vm727_vm0, %v3072_v41  ;;  %v969_v13 = vrot.slane %v968_v4, 4  ;;  %2852 = vmatprep.mubr.msk.bf16.mxu1 %vm727_vm0, %v2571_v8  ;;  %v1004_v19 = vshrl.u32 %v924_v12, 16  ;;  %v1007_v62 = vshll.u32 %v924_v12, 16  ;;  %v1013_v21 = vshll.u32 %v925_v14, 16  ;;  %v3080_v2 = vld [vmem:[%s3296_s30 + $0x90] ss:$8 sps:$4 sm:$0xff]  }
  0x4f   : > { %v983_v18 = vrot.slane %v982_v9, 4  ;;  %v992_v23 = vrot.slane %v990_v15, 4  ;;  %v995_v24 = vrot.slane %v993_v16, 5  ;;  %v1001_v25 = vrot.slane %v999_v17, 5  ;;  %v3082_v8 = vld [vmem:[%s3296_s30 + $0xa0] ss:$8 sps:$4 sm:$0xff]  }
  0x50   : > { %v974_v22 = vsel %vm3342_vm3, %v969_v13, %v973_v5  ;;  %v1006_v28 = vrot.slane %v1004_v19, 4  ;;  %v1009_v29 = vrot.slane %v1007_v62, 5  ;;  %v1015_v30 = vrot.slane %v1013_v21, 5  ;;  %v3083_v5 = vld [vmem:[%s3296_s30 + $0x60] ss:$8 sps:$4 sm:$0xff]  }
  0x51   : > { %v988_v27 = vsel %vm3342_vm3, %v983_v18, %v987_v6  ;;  %v996_v35 = vor.u32 %v995_v24, %v992_v23  ;;  %v1018_v41 = vshrl.u32 %v926_v36, 16  ;;  %v1021_v42 = vshll.u32 %v926_v36, 16  ;;  %v3089_v6 = vld [vmem:[%s3592_s1 + $0x88] sm:$0xff]   ;;  %v3085_v9 = vld [vmem:[%s3296_s30 + $0xb0] ss:$8 sps:$4 sm:$0xff]  }
  0x52   : > { %v2572_v34 = vcombine.low %v974_v22, %v988_v27  ;;  %v1010_v39 = vor.u32 %v1009_v29, %v1006_v28  ;;  %v1027_v43 = vshll.u32 %v927_v37, 16  ;;  %v1032_v46 = vshrl.u32 %v928_v38, 16  ;;  %v2699_v10 = vld [vmem:[%s3296_s30 + $0x8] sm:$0xf]  ;;  %v2700_v11 = vld [vmem:[%s3296_s30 + $0xc] sm:$0x1] }
  0x53   : > { %v997_v45 = vrot.slane %v996_v35, 4  ;;  %v1035_v47 = vshll.u32 %v928_v38, 16  ;;  %v1041_v48 = vshll.u32 %v929_v40, 16  ;;  %v1020_v49 = vrot.slane %v1018_v41, 4  ;;  %v2701_v12 = vld [vmem:[%s3296_s30 + $0x10] sm:$0xf] }
  0x54   : > { %2853 = vmatmul.mubr.msk.bf16.vlgmr.msra.gmra.mrb[0].mxu1 %vm727_vm0, %v2572_v34  ;;  %v1023_v50 = vrot.slane %v1021_v42, 5  ;;  %v1029_v51 = vrot.slane %v1027_v43, 5  ;;  %v1034_v53 = vrot.slane %v1032_v46, 4  ;;  %v3088_v13 = vld [vmem:[%s3296_s30 + $0x80] ss:$8 sps:$4 sm:$0xff]   ;;  %v1942_v15 = vshrl.u32 %v2699_v10, 16 }
  0x55   : > { %2901 = vmatmul.mubr.msk.bf16.vlgmr.msra.gmra.mrb[0].mxu0 %vm727_vm0, %v3073_v7  ;;  %2861 = vmatpush3.bf16.msra.mxu1 %v3363_v32  ;;  %v1002_v52 = vsel %vm3342_vm3, %v997_v45, %v1001_v25  ;;  %v1037_v54 = vrot.slane %v1035_v47, 5  ;;  %v1043_v55 = vrot.slane %v1041_v48, 5  ;;  %v3086_v7 = vld [vmem:[%s3296_s30 + $0x70] ss:$8 sps:$4 sm:$0xff]   ;;  %v2702_v14 = vld [vmem:[%s3296_s30 + $0x14] sm:$0x1] }
  0x56   : > { %2909 = vmatpush3.bf16.msra.mxu0 %v3395_v20  ;;  %2904 = vmatprep.mubr.msk.bf16.mxu0 %vm727_vm0, %v3075_v31  ;;  %v1011_v20 = vrot.slane %v1010_v39, 4  ;;  %v1024_v57 = vor.u32 %v1023_v50, %v1020_v49  ;;  %v1945_v16 = vshll.u32 %v2699_v10, 16  ;;  %v1951_v17 = vshll.u32 %v2700_v11, 16  ;;  %v2703_v21 = vld [vmem:[%s3296_s30 + $0x18] sm:$0xf] }
  0x57   : > { %2910 = vmatprep.subr.bf16.mxu0 %v3078_v26  ;;  %2862 = vmatprep.subr.bf16.mxu1 %v3079_v33  ;;  %v1038_v60 = vor.u32 %v1037_v54, %v1034_v53  ;;  %v1956_v18 = vshrl.u32 %v2701_v12, 16  ;;  %v1959_v19 = vshll.u32 %v2701_v12, 16  ;;  %v1965_v62 = vshll.u32 %v2702_v14, 16  ;;  %v2704_v22 = vld [vmem:[%s3296_s30 + $0x1c] sm:$0x1] }
  0x58   : > { %v1016_v56 = vsel %vm3342_vm3, %v1011_v20, %v1015_v30  ;;  %v1025_v32 = vrot.slane %v1024_v57, 4  ;;  %v1944_v23 = vrot.slane %v1942_v15, 4  ;;  %v1947_v24 = vrot.slane %v1945_v16, 5  ;;  %v2705_v27 = vld [vmem:[%s3296_s30 + $0x20] sm:$0xf] }
  0x59   : > { %v2573_v59 = vcombine.low %v1002_v52, %v1016_v56  ;;  %2863 = vmatpush3.bf16.msra.mxu1 %v3079_v33  ;;  %v1039_v61 = vrot.slane %v1038_v60, 4  ;;  %v1953_v25 = vrot.slane %v1951_v17, 5  ;;  %v1961_v28 = vrot.slane %v1959_v19, 5  ;;  %v2706_v30 = vld [vmem:[%s3296_s30 + $0x24] sm:$0x1] }
  0x5a   : > { %2911 = vmatpush3.bf16.msra.mxu0 %v3078_v26  ;;  %v1030_v63 = vsel %vm3342_vm3, %v1025_v32, %v1029_v51  ;;  %v1958_v26 = vrot.slane %v1956_v18, 4  ;;  %v1967_v29 = vrot.slane %v1965_v62, 5  ;;  %v1970_v31 = vshrl.u32 %v2703_v21, 16  ;;  %v2707_v38 = vld [vmem:[%s3296_s30 + $0x28] sm:$0xf] }
  0x5b   : > { %2920 = vmatprep.subr.bf16.mxu0 %v3084_v44  ;;  %2856 = vmatprep.mubr.msk.bf16.mxu1 %vm727_vm0, %v2573_v59  ;;  %v1044_v1 = vsel %vm3342_vm3, %v1039_v61, %v1043_v55  ;;  %v1973_v33 = vshll.u32 %v2703_v21, 16  ;;  %v1948_v34 = vor.u32 %v1947_v24, %v1944_v23  ;;  %v1979_v35 = vshll.u32 %v2704_v22, 16  ;;  %v2708_v43 = vld [vmem:[%s3296_s30 + $0x2c] sm:$0x1]  ;;  %v2709_v48 = vld [vmem:[%s3296_s30 + $0x30] sm:$0xf] }
  0x5c   : > { %v2574_v4 = vcombine.low %v1030_v63, %v1044_v1  ;;  %v1984_v36 = vshrl.u32 %v2705_v27, 16  ;;  %v1987_v37 = vshll.u32 %v2705_v27, 16  ;;  %v1962_v39 = vor.u32 %v1961_v28, %v1958_v26  ;;  %v3087_v20 = vld [vmem:[%s3296_s30 + $0xc0] ss:$8 sps:$4 sm:$0xff]   ;;  %v2710_v55 = vld [vmem:[%s3296_s30 + $0x34] sm:$0x1] }
  0x5d   : > { %2905 = vmatmul.mubr.msk.bf16.gmra.mrb[4].mxu0 %vm727_vm0, %v3077_v58  ;;  %v1972_v40 = vrot.slane %v1970_v31, 4  ;;  %v1975_v41 = vrot.slane %v1973_v33, 5  ;;  %v1993_v42 = vshll.u32 %v2706_v30, 16  ;;  %v1981_v45 = vrot.slane %v1979_v35, 5  ;;  %v2711_v61 = vld [vmem:[%s3296_s30 + $0x38] sm:$0xf] }
  0x5e   : > { %2912 = vmatprep.mubr.msk.bf16.mxu0 %vm727_vm0, %v3081_v0  ;;  %2857 = vmatmul.mubr.msk.bf16.gmra.mrb[4].mxu1 %vm727_vm0, %v2574_v4  ;;  %v1986_v46 = vrot.slane %v1984_v36, 4  ;;  %v1989_v47 = vrot.slane %v1987_v37, 5  ;;  %v1963_v49 = vrot.slane %v1962_v39, 4  ;;  %v1998_v52 = vshrl.u32 %v2707_v38, 16  ;;  %v2714_v11 = vld [vmem:[%s3296_s30 + $0x44] sm:$0x1] }
  0x5f   : > { %2864 = vmatprep.mubr.msk.bf16.mxu1 %vm727_vm0, %v3080_v2  ;;  %v1976_v50 = vor.u32 %v1975_v41, %v1972_v40  ;;  %v1995_v51 = vrot.slane %v1993_v42, 5  ;;  %v2001_v56 = vshll.u32 %v2707_v38, 16  ;;  %v2007_v57 = vshll.u32 %v2708_v43, 16  ;;  %v2712_v2 = vld [vmem:[%s3296_s30 + $0x3c] sm:$0x1]  ;;  %v2755_v43 = vld [vmem:[%s3595_s4] sm:$0xff]  }
  0x60   : > { %v1990_v54 = vor.u32 %v1989_v47, %v1986_v46  ;;  %v1968_v58 = vsel %vm3342_vm3, %v1963_v49, %v1967_v29  ;;  %v2000_v60 = vrot.slane %v1998_v52, 4  ;;  %v2012_v32 = vshrl.u32 %v2709_v48, 16 }
  0x61   : > { %v1977_v59 = vrot.slane %v1976_v50, 4  ;;  %v2003_v1 = vrot.slane %v2001_v56, 5  ;;  %v2026_v12 = vshrl.u32 %v2711_v61, 16  ;;  %v2009_v15 = vrot.slane %v2007_v57, 5  ;;  %v2730_v56 = vld [vmem:[%s3594_s3] ss:$0 sm:$0xff] }
  0x62   : > { %v1991_v0 = vrot.slane %v1990_v54, 4  ;;  %v2035_v17 = vshll.u32 %v2712_v2, 16  ;;  %v3118_v42 = vmov 0.0|0.0  }
  0x63   : > { %v1982_v4 = vsel %vm3342_vm3, %v1977_v59, %v1981_v45  ;;  %v2004_v10 = vor.u32 %v2003_v1, %v2000_v60  ;;  %v2028_v19 = vrot.slane %v2026_v12, 4  ;;  %2948 = vmatprep.subr.bf16.mxu1 %v3118_v42 }
  0x64   : > { %v2037_v30 = vrot.slane %v2035_v17, 5 }
  0x65   : > { %2913 = vmatmul.mubr.msk.bf16.vlgmr.msra.gmra.mrb[0].mxu0 %vm727_vm0, %v3083_v5  ;;  %v2014_v5 = vrot.slane %v2012_v32, 4  ;;  %v2005_v18 = vrot.slane %v2004_v10, 4 }
  0x66   : > { %2921 = vmatpush3.bf16.msra.mxu0 %v3084_v44  ;;  %2916 = vmatprep.mubr.msk.bf16.mxu0 %vm727_vm0, %v3086_v7  ;;  %v1949_v44 = vrot.slane %v1948_v34, 4  ;;  %v2021_v7 = vshll.u32 %v2710_v55, 16 }
  0x67   : > { %2922 = vmatprep.subr.bf16.mxu0 %v3089_v6  ;;  %2865 = vmatmul.mubr.msk.bf16.vlgmr.msra.gmra.mrb[0].mxu1 %vm727_vm0, %v3082_v8  ;;  %v2713_v8 = vld [vmem:[%s3296_s30 + $0x40] sm:$0xf]  ;;  %v2010_v28 = vsel %vm3342_vm3, %v2005_v18, %v2009_v15 }
  0x68   : > { %2868 = vmatprep.mubr.msk.bf16.mxu1 %vm727_vm0, %v3085_v9  ;;  %v1954_v53 = vsel %vm3342_vm3, %v1949_v44, %v1953_v25  ;;  %v1996_v9 = vsel %vm3342_vm3, %v1991_v0, %v1995_v51  ;;  %v2040_v21 = vshrl.u32 %v2713_v8, 16  ;;  %v2023_v23 = vrot.slane %v2021_v7, 5  ;;  %2950 = vmatpush3.bf16.msra.mxu1 %v2755_v43  ;;  %v2762_v44 = vld [vmem:[%s3595_s4 + $0x8] sm:$0xff]  }
  0x69   : > { %v2719_v63 = vcombine.low %v1954_v53, %v1968_v58  ;;  %v2720_v14 = vcombine.low %v1982_v4, %v1996_v9  ;;  %v2043_v24 = vshll.u32 %v2713_v8, 16  ;;  %v2049_v25 = vshll.u32 %v2714_v11, 16  ;;  %2951 = vmatprep.subr.bf16.mxu1 %v3118_v42  ;;  %v2729_v53 = vld [vmem:[%s3593_s2] ss:$0 sm:$0xff] }
  0x6a   : > { %2923 = vmatpush3.bf16.msra.mxu0 %v3089_v6  ;;  %v2015_v6 = vshll.u32 %v2709_v48, 16  ;;  %v2042_v27 = vrot.slane %v2040_v21, 4 }
  0x6b   : > { %v2045_v31 = vrot.slane %v2043_v24, 5  ;;  %v2051_v36 = vrot.slane %v2049_v25, 5 }
  0x6c   : > { %v2017_v16 = vrot.slane %v2015_v6, 5  ;;  %2953 = vmatpush3.bf16.msra.mxu1 %v2762_v44 }
  0x6d   : > { %2917 = vmatmul.mubr.msk.bf16.gmra.mrb[4].mxu0 %vm727_vm0, %v3088_v13  ;;  %v2029_v13 = vshll.u32 %v2711_v61, 16  ;;  %v2046_v35 = vor.u32 %v2045_v31, %v2042_v27  ;;  %2943 = vmatprep.subr.mxu1 %v3120_v3 }
  0x6e   : > { %2924 = vmatprep.mubr.msk.bf16.mxu0 %vm727_vm0, %v2719_v63  ;;  %v2018_v22 = vor.u32 %v2017_v16, %v2014_v5 }
  0x6f   : > { %2869 = vmatmul.mubr.msk.bf16.gmra.mrb[4].mxu1 %vm727_vm0, %v3087_v20  ;;  %v2031_v62 = vrot.slane %v2029_v13, 5  ;;  %v2047_v39 = vrot.slane %v2046_v35, 4 }
  0x70   : > { %v2019_v29 = vrot.slane %v2018_v22, 4  ;;  %2940 = vmatprep.mubr.msk.f32.mxu1 %vm3119_vm4, %v3120_v3 }
  0x71   : > { %v2032_v26 = vor.u32 %v2031_v62, %v2028_v19  ;;  %v2052_v40 = vsel %vm3342_vm3, %v2047_v39, %v2051_v36 }
  0x72   : > { %v2024_v34 = vsel %vm3342_vm3, %v2019_v29, %v2023_v23 }
  0x73   : > { %v2033_v33 = vrot.slane %v2032_v26, 4  ;;  %v2721_v37 = vcombine.low %v2010_v28, %v2024_v34 }
  0x75   : > { %2925 = vmatmul.mubr.msk.bf16.vlgmr.msra.gmra.mrb[0].mxu0 %vm727_vm0, %v2720_v14  ;;  %v2038_v38 = vsel %vm3342_vm3, %v2033_v33, %v2037_v30 }
  0x76   : > { %2928 = vmatprep.mubr.msk.bf16.mxu0 %vm727_vm0, %v2721_v37  ;;  %v2722_v41 = vcombine.low %v2038_v38, %v2052_v40 }
  0x7d   : > { %2929 = vmatmul.mubr.msk.bf16.gmra.mrb[4].mxu0 %vm727_vm0, %v2722_v41 }
 0x13a   : > { %v2866_v45 = vpop.f32.mrb[0].mxu1 }
 0x13b   : > { %v1251_v46 = vpop.f32.mrb[1].mxu1 }
 0x13c   : > { %v2867_v47 = vpop.f32.mrb[2].mxu1 }
 0x13d   : > { %v1254_v48 = vpop.f32.mrb[3].mxu1 }
 0x142   : > { %v2870_v20 = vpop.f32.mrb[4].mxu1 }
 0x143   : > { %v1267_v49 = vpop.f32.mrb[5].mxu1 }
 0x144   : > { %v2871_v50 = vpop.f32.mrb[6].mxu1 }
 0x145   : > { %v1270_v51 = vpop.f32.mrb[7].mxu1 }
 0x148   : > { %v2926_v52 = vpop.f32.mrb[0].mxu0 }
 0x149   : > { %v2954_v54 = vadd.f32 %v2926_v52, %v2866_v45  ;;  %v2128_v55 = vpop.f32.mrb[1].mxu0 }
 0x14a   : > { %v2955_v57 = vadd.f32 %v2128_v55, %v1251_v46  ;;  %v2927_v58 = vpop.f32.mrb[2].mxu0 }
 0x14b   : > { %v2176_v59 = vmul.f32 %v2954_v54, %v2729_v53  ;;  %v2956_v60 = vadd.f32 %v2927_v58, %v2867_v47  ;;  %v2131_v32 = vpop.f32.mrb[3].mxu0 }
 0x14c   : > { %v2174_v61 = vmul.f32 %v2955_v57, %v2729_v53  ;;  %v2957_v63 = vadd.f32 %v2131_v32, %v1254_v48  ;;  %v2352_v32 = vld [vmem:[%s3597_s6] sm:$0x7] }
 0x14d   : > { %v2191_v0 = vadd.f32 %v2730_v56, %v2176_v59  ;;  %v2177_v1 = vmul.f32 %v2956_v60, %v2729_v53 }
 0x14e   : > { %v2189_v2 = vadd.f32 %v2730_v56, %v2174_v61  ;;  %v2175_v4 = vmul.f32 %v2957_v63, %v2729_v53  ;;  %v2353_v61 = vunpack.c.l.bf16 %v2352_v32  ;;  %v2277_v63 = vld [vmem:[%s3596_s5] sm:$0x1] }
 0x14f   : > { %v2199_v5 = vmax.f32 %v2191_v0, 0.0  ;;  %v2192_v6 = vadd.f32 %v2730_v56, %v2177_v1 }
 0x150   : > { %v2197_v7 = vmax.f32 %v2189_v2, 0.0  ;;  %v2190_v8 = vadd.f32 %v2730_v56, %v2175_v4  ;;  %v2930_v14 = vpop.f32.mrb[4].mxu0 }
 0x151   : > { %v2748_v9 = vpack.c.bf16 %v2199_v5, %v2199_v5  ;;  %v2200_v10 = vmax.f32 %v2192_v6, 0.0  ;;  %v2958_v18 = vadd.f32 %v2930_v14, %v2870_v20  ;;  %v2144_v19 = vpop.f32.mrb[5].mxu0  ;;  %v2249_v23 = vsel %vm727_vm0, %v2199_v5, 0.0 }
 0x152   : > { %v2746_v11 = vpack.c.bf16 %v2197_v7, %v2197_v7  ;;  %v2198_v12 = vmax.f32 %v2190_v8, 0.0  ;;  %v2246_v15 = vsel %vm727_vm0, %v2197_v7, 0.0  ;;  %v2959_v21 = vadd.f32 %v2144_v19, %v1267_v49  ;;  %v2931_v22 = vpop.f32.mrb[6].mxu0 }
 0x153   : > { %2240 = vst.msk [vmem:[%s3539_s26 + $0x8] sm:$0xf] %vm2237_vm5, %v2748_v9  ;;  %v2749_v13 = vpack.c.bf16 %v2200_v10, %v2200_v10  ;;  %v2180_v24 = vmul.f32 %v2958_v18, %v2729_v53  ;;  %v2960_v25 = vadd.f32 %v2931_v22, %v2871_v50  ;;  %v2147_v26 = vpop.f32.mrb[7].mxu0  ;;  %v2251_v30 = vsel %vm727_vm0, %v2200_v10, 0.0 }
 0x154   : > { %2238 = vst.msk [vmem:[%s3539_s26] sm:$0xf] %vm2237_vm5, %v2746_v11  ;;  %v2747_v16 = vpack.c.bf16 %v2198_v12, %v2198_v12  ;;  %v2247_v17 = vsel %vm727_vm0, %v2198_v12, 0.0  ;;  %v2178_v28 = vmul.f32 %v2959_v21, %v2729_v53  ;;  %v2961_v29 = vadd.f32 %v2147_v26, %v1270_v51 }
 0x155   : > { %2241 = vst.msk [vmem:[%s3539_s26 + $0xc] sm:$0xf] %vm2237_vm5, %v2749_v13  ;;  %v2248_v62 = vadd.f32 %v2247_v17, %v2246_v15  ;;  %v2195_v31 = vadd.f32 %v2730_v56, %v2180_v24  ;;  %v2181_v33 = vmul.f32 %v2960_v25, %v2729_v53 }
 0x156   : > { %2239 = vst.msk [vmem:[%s3539_s26 + $0x4] sm:$0xf] %vm2237_vm5, %v2747_v16  ;;  %v2193_v34 = vadd.f32 %v2730_v56, %v2178_v28  ;;  %v2179_v36 = vmul.f32 %v2961_v29, %v2729_v53 }
 0x157   : > { %v2250_v27 = vadd.f32 %v2249_v23, %v2248_v62  ;;  %v2203_v37 = vmax.f32 %v2195_v31, 0.0  ;;  %v2196_v38 = vadd.f32 %v2730_v56, %v2181_v33 }
 0x158   : > { %v2201_v39 = vmax.f32 %v2193_v34, 0.0  ;;  %v2194_v40 = vadd.f32 %v2730_v56, %v2179_v36 }
 0x159   : > { %v2252_v35 = vadd.f32 %v2251_v30, %v2250_v27  ;;  %v2752_v41 = vpack.c.bf16 %v2203_v37, %v2203_v37  ;;  %v2204_v42 = vmax.f32 %v2196_v38, 0.0  ;;  %v2257_v50 = vsel %vm727_vm0, %v2203_v37, 0.0 }
 0x15a   : > { %v2750_v43 = vpack.c.bf16 %v2201_v39, %v2201_v39  ;;  %v2253_v44 = vsel %vm727_vm0, %v2201_v39, 0.0  ;;  %v2202_v45 = vmax.f32 %v2194_v40, 0.0 }
 0x15b   : > { %2244 = vst.msk [vmem:[%s3539_s26 + $0x18] sm:$0xf] %vm2237_vm5, %v2752_v41  ;;  %v2254_v46 = vadd.f32 %v2253_v44, %v2252_v35  ;;  %v2753_v47 = vpack.c.bf16 %v2204_v42, %v2204_v42  ;;  %v2259_v52 = vsel %vm727_vm0, %v2204_v42, 0.0 }
 0x15c   : > { %2242 = vst.msk [vmem:[%s3539_s26 + $0x10] sm:$0xf] %vm2237_vm5, %v2750_v43  ;;  %v2751_v48 = vpack.c.bf16 %v2202_v45, %v2202_v45  ;;  %v2255_v20 = vsel %vm727_vm0, %v2202_v45, 0.0 }
 0x15d   : > { %2245 = vst.msk [vmem:[%s3539_s26 + $0x1c] sm:$0xf] %vm2237_vm5, %v2753_v47  ;;  %v2256_v49 = vadd.f32 %v2255_v20, %v2254_v46 }
 0x15e   : > { %2243 = vst.msk [vmem:[%s3539_s26 + $0x14] sm:$0xf] %vm2237_vm5, %v2751_v48 }
 0x15f   : > { %v2258_v51 = vadd.f32 %v2257_v50, %v2256_v49 }
 0x161   : > { %v2260_v53 = vadd.f32 %v2259_v52, %v2258_v51 }
 0x163   : > { %v2261_v54 = vrot.slane %v2260_v53, 4 }
 0x165   : > { %v2262_v55 = vadd.f32 %v2261_v54, %v2260_v53 }
 0x167   : > { %v2263_v56 = vrot.slane %v2262_v55, 2 }
 0x169   : > { %v2264_v57 = vadd.f32 %v2263_v56, %v2262_v55 }
 0x16b   : > { %v2265_v58 = vrot.slane %v2264_v57, 1 }
 0x16d   : > { %v2266_v59 = vadd.f32 %v2265_v58, %v2264_v57 }
 0x16f   : > { %v2268_v60 = vmul.f32 0.015625, %v2266_v59 }
 0x171   : > { %2941 = vmatmul.mubr.msk.f32.vlgmr.msra.gmra.mrb[8].mxu1 %vm727_vm0, %v2268_v60 }
 0x172   : > { %2945 = vmatprep.mubr.msk.f32.mxu1 %vm3119_vm4, %v3120_v3  ;;  %2944 = vmatpush3.msk.msra.mxu1 %vm2359_vm6, %v2353_v61  ;;  %v2354_v3 = vld [vmem:[%s3598_s7] sm:$0x1] }
 0x244   : > { %v2347_v0 = vpop.f32.mrb[8].mxu1 }
 0x245   : > { %v2348_v1 = vadd.f32 %v2347_v0, %v2277_v63  ;;  %v2942_v2 = vpop.f32.mrb[9].mxu1 }
 0x247   : > { %v2351_v4 = vmax.f32 %v2348_v1, 0.0 }
 0x249   : > { %2946 = vmatmul.mubr.msk.f32.vlgmr.msra.gmra.mrb[10].mxu1 %vm2355_vm7, %v2351_v4 }
 0x31c   : > { %v2429_v5 = vpop.f32.mrb[10].mxu1 }
 0x31d   : > { %v2430_v6 = vadd.f32 %v2429_v5, %v2354_v3  ;;  %v2947_v7 = vpop.f32.mrb[11].mxu1 }
 0x31f   : > { %v2742_v8 = vmul.f32 -1.442695, %v2430_v6 }
 0x321   : > { %3090 = vpow2.f32 %v2742_v8 }
 0x32b   : > { %v3091_v9 = vpop.eup %3090 }
 0x32c   : > { %v2436_v10 = vadd.f32 1.0, %v3091_v9 }
 0x32e   : > { %3092 = vrcp.f32 %v2436_v10 }
 0x338   : > { %v3093_v11 = vpop.eup %3092 }
 0x339   : > { %2440 = vst.msk [vmem:[%s667_s19] sm:$0x1] %vm2439_vm8, %v3093_v11 }
 0x33a PF: > { %p17_p9 = scmp.ge.s32.totalorder %s3188_s13, 4   ;;  %s3603_s30 = smov %s3112_s10 }
 0x33b   : > { %s3604_s10 = smov %s3197_s16  ;;  %s3605_s11 = smov %s3188_s13 }
 0x33c   :  { %19 = sbr.rel (!%p17_p9) target bundleno = 2 (0x2), region = 153 }

// kernel: block_forward.7
= control target key start
LH: loop header
LB: loop body
LE: loop exit
PB: predicated region body
PF: predicated region fallthrough
CT: control target
= control target key end

     0   :  { %11 = vsyncpa [#allocation4], 0  ;;  %s1196_s0 = inlined_call_operand.vmem [shape: bf16[2,64,32], index: 0, kind: input, shape index: {}]   ;;  %s1197_s1 = inlined_call_operand.vmem [shape: bf16[32,32], index: 1, kind: input, shape index: {}]   ;;  %s1198_s2 = inlined_call_operand.vmem [shape: f32[1,32], index: 2, kind: input, shape index: {}]   ;;  %s1199_s3 = inlined_call_operand.vmem [shape: f32[1,32], index: 3, kind: input, shape index: {}]   ;;  %s1200_s4 = inlined_call_operand.vmem [shape: f32[2,1,32], index: 4, kind: input, shape index: {}]   ;;  %s1201_s5 = inlined_call_operand.vmem [shape: f32[2,64,32], index: 5, kind: input, shape index: {}]   ;;  %s1202_s6 = inlined_call_operand.hbm [shape: f32[2,64,32], index: 6, kind: output, shape index: {}]  }
   0x1   :  { %13 = vsyncpa [#allocation4 + $0x1], 0  ;;  %s1016_s21 = smov 0   ;;  %s1018_s22 = smov 0  }
   0x2   :  { %s1020_s23 = smov 0   ;;  %s1022_s24 = smov 0  }
   0x3   :  { %s1024_s25 = smov 0   ;;  %s1026_s26 = smov 0  }
   0x4 LB: > { %s768_s27 = sadd.s32 4294967295, %s975_s26   ;;  %s769_s28 = sadd.s32 4294967294, %s975_s26   ;;  %s975_s26 = sphi %s1026_s26, %s19_s26   ;;  %s971_s25 = sphi %s1024_s25, %s1209_s25   ;;  %s967_s24 = sphi %s1022_s24, %s1208_s24   ;;  %s963_s23 = sphi %s1020_s23, %s1207_s23   ;;  %s959_s22 = sphi %s1018_s22, %s1206_s22   ;;  %s955_s21 = sphi %s1016_s21, %s1205_s21  }
   0x5   : > { %s38_s29 = sadd.s32 1, %s971_s25  ;;  %s201_s30 = sadd.s32 1, %s963_s23 }
   0x6   : > { %p40_p0 = scmp.ge.s32.totalorder %s38_s29, 2  ;;  %p211_p1 = scmp.ne.s32.totalorder %s963_s23, %s959_s22 }
   0x7   : > { %p212_p2 = scmp.eq.s32.totalorder %s768_s27, 1  ;;  %p217_p3 = scmp.ne.s32.totalorder %s959_s22, %s955_s21 }
   0x8   : > { %s1211_s29 = smov (%p40_p0, %s38_s29), 0  ;;  %p218_p5 = scmp.eq.s32.totalorder %s769_s28, 1 }
   0x9   : > { %p1056_p4 = por %p212_p2, %p211_p1  ;;  %s196_s8 = ssub.s32 %s971_s25, %s1211_s29 }
   0xa   : > { %p773_p6 = scmp.ge.s32.totalorder %s975_s26, 1  ;;  %p199_p7 = scmp.eq.s32.totalorder %s196_s8, 0 }
   0xb   : > { %p1063_p8 = por %p218_p5, %p217_p3  ;;  %p289_p9 = scmp.lt.s32.totalorder %s975_s26, 3 }
   0xc   : > { %s1069_s10 = scalar_select %p199_p7, %s963_s23, %s201_s30  }
   0xd   : > { %p290_p10 = pnand %p773_p6, %p289_p9 }
   0xe   : > { %v895_v0 = vld [vmem:[%s1197_s1] sm:$0xff] (!%p290_p10)   ;;  %p347_p11 = scmp.lt.s32.totalorder (!%p290_p10), %s967_s24, 1  ;;  %v896_v1 = vld [vmem:[%s1197_s1 + $0x8] sm:$0xff] (!%p290_p10)   ;;  %vm387_vm0 = vcmask (!%p290_p10), 261120   ;;  %v977_v2 = vmov (!%p290_p10), 0.0   ;;  %s343_s17 = sand.u32 (!%p290_p10), 1, %s959_s22  }
   0xf   : > { %293 = sbr.rel (%p290_p10) target bundleno = 283 (0x11b), region = 44  ;;  %821 = vmatprep.subr.bf16.mxu0 (!%p290_p10), %v895_v0  ;;  %833 = vmatprep.subr.bf16.mxu1 (!%p290_p10), %v895_v0  ;;  %390 = vst.msk [vmem:[#allocation2 + $0x10] sm:$0xff] (!%p290_p10), %vm387_vm0, %v977_v2  ;;  %388 = vst.msk [vmem:[#allocation2] sm:$0xff] (!%p290_p10), %vm387_vm0, %v977_v2  ;;  %v786_v52 = vld [vmem:[%s1198_s2] ss:$0 sm:$0xff] (!%p290_p10)  ;;  %s774_s18 = sshll.u32 (!%p290_p10), %s343_s17, 6 }
  0x10   : > { %822 = vmatpush3.bf16.msra.mxu0 (!%p290_p10), %v895_v0  ;;  %835 = vmatpush3.bf16.msra.mxu1 (!%p290_p10), %v895_v0  ;;  %389 = vst.msk [vmem:[#allocation2 + $0x8] sm:$0xff] (!%p290_p10), %vm387_vm0, %v977_v2  ;;  %391 = vst.msk [vmem:[#allocation2 + $0x18] sm:$0xff] (!%p290_p10), %vm387_vm0, %v977_v2  ;;  %v787_v54 = vld [vmem:[%s1199_s3] ss:$0 sm:$0xff] (!%p290_p10)  ;;  %s345_s20 = scalar_lea.vmem (!%p290_p10), [#allocation3], %s774_s18  ;;  %s1150_s8 = scalar_lea.sflag (!%p290_p10), [#allocation4], %s343_s17 }
  0x11   : > { %392 = vst.msk [vmem:[#allocation2 + $0x20] sm:$0xff] (!%p290_p10), %vm387_vm0, %v977_v2  ;;  %393 = vst.msk [vmem:[#allocation2 + $0x28] sm:$0xff] (!%p290_p10), %vm387_vm0, %v977_v2  ;;  %823 = vmatprep.subr.bf16.mxu0 (!%p290_p10), %v896_v1  ;;  %834 = vmatprep.subr.bf16.mxu1 (!%p290_p10), %v896_v1  ;;  %s638_s27 = sshll.u32 (!%p290_p10), %s345_s20, 4  ;;  %s978_s12 = smov (!%p290_p10), [#allocation3]   ;;  %s1142_s27 = int_to_ptr.vmem [resolvable:$true] %s638_s27 }
  0x12   : > { %394 = vst.msk [vmem:[#allocation2 + $0x30] sm:$0xff] (!%p290_p10), %vm387_vm0, %v977_v2  ;;  %395 = vst.msk [vmem:[#allocation2 + $0x38] sm:$0xff] (!%p290_p10), %vm387_vm0, %v977_v2  ;;  %s897_s11 = scalar_lea.vmem (!%p290_p10), %s1142_s27, 1024  ;;  %s901_s13 = sshll.u32 (!%p290_p10), %s978_s12, 4  ;;  %s902_s13 = int_to_ptr.vmem [resolvable:$false] %s901_s13 }
  0x13   : > { %p898_p12 = scmp.ne.s32.totalorder (!%p290_p10), %s1142_s27, %s897_s11  ;;  %p904_p1 = scmp.lt.s32.totalorder (!%p290_p10), %s1142_s27, %s902_s13 }
  0x14   : > { %824 = vmatpush3.bf16.msra.mxu0 (!%p290_p10), %v896_v1  ;;  %836 = vmatpush3.bf16.msra.mxu1 (!%p290_p10), %v896_v1 }
  0x15   : > { %p899_p13 = pnand (!%p290_p10), %p898_p12, %p1056_p4 }
  0x16   : > { %s1079_s15 = scalar_select %p347_p11, %s967_s24, 1  ;;  %v433_v28 = vld [vmem:[#allocation2 + $0x10] sm:$0xff]  ;;  %v431_v29 = vld [vmem:[#allocation2] sm:$0xff] }
  0x17   : > { %v434_v32 = vld [vmem:[#allocation2 + $0x18] sm:$0xff]  ;;  %v432_v36 = vld [vmem:[#allocation2 + $0x8] sm:$0xff]  ;;  %p900_p0 = pneg %p899_p13 }
  0x18   : > { %s793_s16 = sshll.u32 %s1079_s15, 5  ;;  %s370_s19 = scalar_lea.vmem %s1200_s4, %s1079_s15  ;;  %v435_v35 = vld [vmem:[#allocation2 + $0x20] sm:$0xff]  ;;  %v436_v45 = vld [vmem:[#allocation2 + $0x28] sm:$0xff] }
  0x19   : > { %s357_s28 = scalar_lea.vmem %s1196_s0, %s793_s16  ;;  %v779_v3 = vld [vmem:[%s370_s19] ss:$0 sm:$0xff]  ;;  %v437_v31 = vld [vmem:[#allocation2 + $0x30] sm:$0xff]  ;;  %v438_v40 = vld [vmem:[#allocation2 + $0x38] sm:$0xff]  ;;  %s794_s30 = sshll.u32 %s1079_s15, 6 }
  0x1a   : > { %v797_v4 = vld [vmem:[%s357_s28] sm:$0xff]   ;;  %v813_v5 = vld [vmem:[%s357_s28 + $0x10] sm:$0xff]   ;;  %v812_v6 = vld [vmem:[%s357_s28 + $0x8] sm:$0xff]   ;;  %s1116_s14 = scalar_lea.vmem %s1201_s5, %s794_s30  ;;  %s795_s19 = sshll.u32 %s967_s24, 10 }
  0x1b   : > { %v798_v7 = vunpack.c.l.bf16 %v797_v4  ;;  %v799_v8 = vunpack.c.h.bf16 %v797_v4  ;;  %v806_v9 = vunpack.c.l.bf16 %v813_v5  ;;  %v807_v10 = vunpack.c.h.bf16 %v813_v5  ;;  %v814_v17 = vld [vmem:[%s357_s28 + $0x18] sm:$0xff]   ;;  %v592_v57 = vld [vmem:[%s1116_s14 + $0x10] sm:$0xff]  ;;  %v590_v61 = vld [vmem:[%s1116_s14] sm:$0xff]  ;;  %s1140_s30 = scalar_lea.hbm %s1202_s6, %s795_s19 }
  0x1c   : > { %v802_v11 = vunpack.c.l.bf16 %v812_v6  ;;  %v803_v12 = vunpack.c.h.bf16 %v812_v6  ;;  %v810_v20 = vunpack.c.l.bf16 %v814_v17  ;;  %v811_v21 = vunpack.c.h.bf16 %v814_v17  ;;  %v596_v4 = vld [vmem:[%s1116_s14 + $0x30] sm:$0xff] }
  0x1d   : > { %v419_v13 = vmul.f32 %v798_v7, %v779_v3  ;;  %v420_v14 = vmul.f32 %v799_v8, %v779_v3  ;;  %v423_v15 = vmul.f32 %v806_v9, %v779_v3  ;;  %v424_v16 = vmul.f32 %v807_v10, %v779_v3  ;;  %v591_v9 = vld [vmem:[%s1116_s14 + $0x8] sm:$0xff]  ;;  %v594_v10 = vld [vmem:[%s1116_s14 + $0x20] sm:$0xff] }
  0x1e   : > { %v421_v18 = vmul.f32 %v802_v11, %v779_v3  ;;  %v422_v19 = vmul.f32 %v803_v12, %v779_v3  ;;  %v425_v25 = vmul.f32 %v810_v20, %v779_v3  ;;  %v426_v26 = vmul.f32 %v811_v21, %v779_v3  ;;  %v593_v3 = vld [vmem:[%s1116_s14 + $0x18] sm:$0xff]  ;;  %v595_v21 = vld [vmem:[%s1116_s14 + $0x28] sm:$0xff] }
  0x1f   : > { %v427_v22 = vpack.c.bf16 %v420_v14, %v419_v13  ;;  %v429_v23 = vpack.c.bf16 %v424_v16, %v423_v15  ;;  %v597_v16 = vld [vmem:[%s1116_s14 + $0x38] sm:$0xff]  ;;  %s903_s14 = scalar_lea.vmem %s902_s13, 2048 }
  0x20   : > { %v428_v24 = vpack.c.bf16 %v422_v19, %v421_v18  ;;  %v430_v27 = vpack.c.bf16 %v426_v26, %v425_v25  ;;  %p905_p2 = scmp.lt.s32.totalorder %s903_s14, %s897_s11 }
  0x21   : > { %825 = vmatprep.mubr.msk.bf16.mxu0 %vm387_vm0, %v427_v22  ;;  %829 = vmatprep.mubr.msk.bf16.mxu1 %vm387_vm0, %v429_v23 }
  0x22   : > { %826 = vmatmul.mubr.msk.bf16.vlgmr.msra.gmra.mrb[0].mxu0 %vm387_vm0, %v428_v24  ;;  %830 = vmatmul.mubr.msk.bf16.vlgmr.msra.gmra.mrb[0].mxu1 %vm387_vm0, %v430_v27  ;;  %p906_p3 = por %p905_p2, %p904_p1 }
  0x24   : > { %p907_p5 = pnand %p906_p3, %p900_p0 }
  0xf5   : > { %v827_v30 = vpop.f32.mrb[0].mxu0  ;;  %v831_v37 = vpop.f32.mrb[0].mxu1 }
  0xf6   : > { %v535_v33 = vadd.f32 %v827_v30, %v433_v28  ;;  %v502_v34 = vpop.f32.mrb[1].mxu0  ;;  %v539_v41 = vadd.f32 %v831_v37, %v437_v31  ;;  %v518_v42 = vpop.f32.mrb[1].mxu1 }
  0xf7   : > { %v533_v38 = vadd.f32 %v502_v34, %v431_v29  ;;  %v828_v39 = vpop.f32.mrb[2].mxu0  ;;  %v537_v46 = vadd.f32 %v518_v42, %v435_v35  ;;  %v832_v47 = vpop.f32.mrb[2].mxu1 }
  0xf8   : > { %543 = vst.msk [vmem:[#allocation2 + $0x10] sm:$0xff] %vm387_vm0, %v535_v33  ;;  %v536_v43 = vadd.f32 %v828_v39, %v434_v32  ;;  %v505_v44 = vpop.f32.mrb[3].mxu0  ;;  %547 = vst.msk [vmem:[#allocation2 + $0x30] sm:$0xff] %vm387_vm0, %v539_v41  ;;  %v540_v49 = vadd.f32 %v832_v47, %v438_v40  ;;  %v521_v50 = vpop.f32.mrb[3].mxu1 }
  0xf9   : > { %541 = vst.msk [vmem:[#allocation2] sm:$0xff] %vm387_vm0, %v533_v38  ;;  %v534_v48 = vadd.f32 %v505_v44, %v432_v36  ;;  %545 = vst.msk [vmem:[#allocation2 + $0x20] sm:$0xff] %vm387_vm0, %v537_v46  ;;  %v538_v51 = vadd.f32 %v521_v50, %v436_v45 }
  0xfa   : > { %544 = vst.msk [vmem:[#allocation2 + $0x18] sm:$0xff] %vm387_vm0, %v536_v43  ;;  %548 = vst.msk [vmem:[#allocation2 + $0x38] sm:$0xff] %vm387_vm0, %v540_v49 }
  0xfb   : > { %542 = vst.msk [vmem:[#allocation2 + $0x8] sm:$0xff] %vm387_vm0, %v534_v48  ;;  %546 = vst.msk [vmem:[#allocation2 + $0x28] sm:$0xff] %vm387_vm0, %v538_v51 }
  0xff   : > { %v554_v53 = vld [vmem:[#allocation2 + $0x10] sm:$0xff] }
 0x100   : > { %v569_v55 = vmul.f32 %v786_v52, %v554_v53  ;;  %v552_v56 = vld [vmem:[#allocation2] sm:$0xff]  ;;  %v558_v58 = vld [vmem:[#allocation2 + $0x30] sm:$0xff] }
 0x101   : > { %v567_v59 = vmul.f32 %v786_v52, %v552_v56  ;;  %v555_v60 = vld [vmem:[#allocation2 + $0x18] sm:$0xff]  ;;  %v573_v63 = vmul.f32 %v786_v52, %v558_v58  ;;  %v556_v0 = vld [vmem:[#allocation2 + $0x20] sm:$0xff] }
 0x102   : > { %v584_v62 = vadd.f32 %v787_v54, %v569_v55  ;;  %v570_v1 = vmul.f32 %v786_v52, %v555_v60  ;;  %v553_v2 = vld [vmem:[#allocation2 + $0x8] sm:$0xff]  ;;  %v571_v6 = vmul.f32 %v786_v52, %v556_v0  ;;  %v559_v7 = vld [vmem:[#allocation2 + $0x38] sm:$0xff] }
 0x103   : > { %v582_v5 = vadd.f32 %v787_v54, %v567_v59  ;;  %v568_v8 = vmul.f32 %v786_v52, %v553_v2  ;;  %v588_v12 = vadd.f32 %v787_v54, %v573_v63  ;;  %v574_v14 = vmul.f32 %v786_v52, %v559_v7  ;;  %v557_v15 = vld [vmem:[#allocation2 + $0x28] sm:$0xff] }
 0x104   : > { %v600_v11 = vadd.f32 %v592_v57, %v584_v62  ;;  %v585_v13 = vadd.f32 %v787_v54, %v570_v1  ;;  %v586_v18 = vadd.f32 %v787_v54, %v571_v6  ;;  %v572_v20 = vmul.f32 %v786_v52, %v557_v15 }
 0x105   : > { %v598_v17 = vadd.f32 %v590_v61, %v582_v5  ;;  %v583_v19 = vadd.f32 %v787_v54, %v568_v8  ;;  %v604_v23 = vadd.f32 %v596_v4, %v588_v12  ;;  %v589_v25 = vadd.f32 %v787_v54, %v574_v14 }
 0x106   : > { %v608_v22 = vmax.f32 %v600_v11, 0.0  ;;  %v601_v24 = vadd.f32 %v593_v3, %v585_v13  ;;  %v602_v27 = vadd.f32 %v594_v10, %v586_v18  ;;  %v587_v29 = vadd.f32 %v787_v54, %v572_v20 }
 0x107   : > { %v606_v26 = vmax.f32 %v598_v17, 0.0  ;;  %v599_v28 = vadd.f32 %v591_v9, %v583_v19  ;;  %v612_v30 = vmax.f32 %v604_v23, 0.0  ;;  %v605_v32 = vadd.f32 %v597_v16, %v589_v25 }
 0x108   : > { %v609_v31 = vmax.f32 %v601_v24, 0.0  ;;  %616 = vst.msk [vmem:[%s345_s20 + $0x10] sm:$0xff] %vm387_vm0, %v608_v22  ;;  %v610_v33 = vmax.f32 %v602_v27, 0.0  ;;  %v603_v35 = vadd.f32 %v595_v21, %v587_v29 }
 0x109   : > { %v607_v34 = vmax.f32 %v599_v28, 0.0  ;;  %614 = vst.msk [vmem:[%s345_s20] sm:$0xff] %vm387_vm0, %v606_v26  ;;  %v613_v36 = vmax.f32 %v605_v32, 0.0  ;;  %620 = vst.msk [vmem:[%s345_s20 + $0x30] sm:$0xff] %vm387_vm0, %v612_v30 }
 0x10a   : > { %617 = vst.msk [vmem:[%s345_s20 + $0x18] sm:$0xff] %vm387_vm0, %v609_v31  ;;  %v611_v37 = vmax.f32 %v603_v35, 0.0  ;;  %618 = vst.msk [vmem:[%s345_s20 + $0x20] sm:$0xff] %vm387_vm0, %v610_v33 }
 0x10b   : > { %615 = vst.msk [vmem:[%s345_s20 + $0x8] sm:$0xff] %vm387_vm0, %v607_v34  ;;  %621 = vst.msk [vmem:[%s345_s20 + $0x38] sm:$0xff] %vm387_vm0, %v613_v36 }
 0x10c   : > { %619 = vst.msk [vmem:[%s345_s20 + $0x28] sm:$0xff] %vm387_vm0, %v611_v37 }
 0x10d   : > { %910 = shalt.err (!%p907_p5)
}
 0x10e   : > { %s911_s15 = scalar_lea.hbm %s1140_s30, 1024  ;;  %s915_s18 = scalar_lea.hbm %s1202_s6, 2048 }
 0x10f   : > { %p912_p6 = scmp.ne.s32.totalorder %s1140_s30, %s911_s15  ;;  %p916_p10 = scmp.lt.u32.totalorder %s1140_s30, %s1202_s6 }
 0x110   : > { %p917_p11 = scmp.lt.u32.totalorder %s915_s18, %s911_s15  ;;  %p919_p13 = scmp.lt.u32.totalorder %s911_s15, %s1140_s30 }
 0x111   : > { %p913_p7 = pnand %p912_p6, %p1056_p4 }
 0x112   : > { %p918_p12 = por %p917_p11, %p916_p10 }
 0x113   : > { %p914_p9 = pneg %p913_p7 }
 0x114   : > { %p920_p0 = por %p919_p13, %p918_p12 }
 0x116   : > { %p921_p1 = pnand %p920_p0, %p914_p9 }
 0x118   : > { %924 = shalt.err (!%p921_p1)
}
 0x119   : > { %s979_s24 = smov 128   ;;  %s980_s28 = smov 8  }
 0x11a   : > { %837 = dma.vmem_to_hbm [thread:$0]  (%p1056_p4), %s1142_s27, 1024, %s1140_s30, %s1150_s8, %s979_s24, %s979_s24, %s980_s28  }
 0x11b PF: > { %p843_p2 = scmp.ge.s32.totalorder %s975_s26, 2  ;;  %s653_s11 = sand.u32 1, %s955_s21  }
 0x11c   : > { %s654_s12 = scalar_lea.sflag [#allocation4], %s653_s11 }
 0x11d   : > { %p840_p3 = pnand %p843_p2, %p1063_p8 }
 0x11f   : > { %950 = dma.done.wait (!%p840_p3), %s654_s12, 1024  }
 0x120   : > { %952 = vsyncadd (!%p840_p3), %s654_s12, 4294966272  ;;  %s19_s26 = sadd.s32 1, %s975_s26   ;;  %s1205_s21 = smov %s959_s22 }
 0x121   : > { %p16_p5 = scmp.ge.s32.totalorder %s19_s26, 4   ;;  %s1206_s22 = smov %s963_s23 }
 0x122   : > { %s1207_s23 = smov %s1069_s10  ;;  %s1208_s24 = smov %s971_s25 }
 0x123   : > { %s1209_s25 = smov %s1211_s29  ;;  %18 = sbr.rel (!%p16_p5) target bundleno = 4 (0x4), region = 96 }
 0x12a   :  { %659 = vsyncpa [#allocation4], 1 }
 0x12b   :  { %661 = vsyncpa [#allocation4 + $0x1], 1 }

</bundles_post_ra>
